<compile_context>
chip_gen: v6e
topology: v6e:2x2x1
jax: 0.10.0
libtpu: 0.0.40
codegen_flags: <defaults>
</compile_context>

<pallas_src>
import jax
import jax.numpy as jnp
from jax import lax
from jax.experimental import pallas as pl
from jax.experimental.pallas import tpu as pltpu

# ---- scaled-down "ViT-B-32"-style config (synthetic weights) ----------------
IMG_SIZE = 32          # stands in for 224
PATCH = 8              # stands in for 32
WIDTH = 64             # stands in for 768
HEADS = 2              # stands in for 12
LAYERS = 2             # stands in for 12
MLP = 4 * WIDTH
EMBED = 32             # stands in for 512 (CLIP feature dim)
N_PATCH = (IMG_SIZE // PATCH) ** 2
SEQ = N_PATCH + 1
SEQ_PAD = ((SEQ + 7) // 8) * 8   # pad tokens to a sublane multiple (17 -> 24)
HEAD_DIM = WIDTH // HEADS
PATCH_DIM = 3 * PATCH * PATCH

CLIP_MEAN = jnp.array([0.48145466, 0.4578275, 0.40821073], jnp.float32)
CLIP_STD = jnp.array([0.26862954, 0.26130258, 0.27577711], jnp.float32)


# ---- small in-kernel helper ---------------------------------------------------
def _layernorm(x, g, b):
    mu = jnp.mean(x, axis=-1, keepdims=True)
    var = jnp.mean((x - mu) ** 2, axis=-1, keepdims=True)
    return (x - mu) * lax.rsqrt(var + 1e-5) * g + b


# ---- fused encoder kernel (factory closes over the batch tile TB) ------------
# grid = (ceil(B/TB), LAYERS); batch axis "parallel", layer axis "arbitrary".
# The stacked residual stream (TB*SEQ_PAD, WIDTH) persists in VMEM scratch
# across the layer axis; features are written only on the last layer step.
def _make_encoder_kernel(tb):
    def kernel(
        patches_ref,                     # (TB*SEQ_PAD, PATCH_DIM)  zero cls/pad rows
        pw_ref, pb_ref,                  # (PATCH_DIM, WIDTH), (1, WIDTH)  mean/std folded
        pos_ref,                         # (TB*SEQ_PAD, WIDTH)  tiled, cls folded into row 0
        ln_pre_g_ref, ln_pre_b_ref,      # (1, WIDTH)
        vecs_ref,                        # (1, 9, WIDTH) packed per-layer vectors
        q_w_ref, k_w_ref, v_w_ref,       # (1, WIDTH, WIDTH) each, layer-blocked
        out_w_ref,                       # (1, WIDTH, WIDTH)
        fc1_w_ref, fc1_b_ref,            # (1, WIDTH, MLP), (1, 1, MLP)
        fc2_w_ref,                       # (1, MLP, WIDTH)
        ln_post_g_ref, ln_post_b_ref,    # (1, WIDTH)
        proj_ref,                        # (WIDTH, EMBED)
        o_ref,                           # (1, TB, EMBED)
        x_vmem,                          # scratch: (TB*SEQ_PAD, WIDTH) f32
    ):
        layer = pl.program_id(1)

        # ---- stem (patch embed + cls/pos + ln_pre), first layer step only ----
        @pl.when(layer == 0)
        def _():
            tok = jnp.dot(patches_ref[...], pw_ref[...],
                          preferred_element_type=jnp.float32) + pb_ref[...]
            x0 = tok + pos_ref[...]
            x_vmem[...] = _layernorm(x0, ln_pre_g_ref[...], ln_pre_b_ref[...])

        x = x_vmem[...]

        # packed per-layer vectors: one DMA instead of nine tiny ones
        vecs = vecs_ref[0]                                  # (9, WIDTH)
        ln1_g, ln1_b = vecs[0:1], vecs[1:2]
        q_b, k_b, v_b = vecs[2:3], vecs[3:4], vecs[4:5]
        out_b = vecs[5:6]
        ln2_g, ln2_b = vecs[6:7], vecs[7:8]
        fc2_b = vecs[8:9]

        # ---- attention (pre-LN residual block, CLIP style) --------------------
        h = _layernorm(x, ln1_g, ln1_b)
        q = jnp.dot(h, q_w_ref[0], preferred_element_type=jnp.float32) + q_b
        k = jnp.dot(h, k_w_ref[0], preferred_element_type=jnp.float32) + k_b
        v = jnp.dot(h, v_w_ref[0], preferred_element_type=jnp.float32) + v_b

        scale = float(HEAD_DIM) ** -0.5
        # hoisted once: mask padded key positions (>= SEQ) inside each image
        key_valid = lax.broadcasted_iota(jnp.int32, (SEQ_PAD, SEQ_PAD), 1) < SEQ

        # per-image / per-head attention (scores must stay block-diagonal per
        # image); heads go into lane slices, images into sublane slices, then a
        # SINGLE output projection matmul on the stacked tile.
        img_rows = []
        for b in range(tb):
            r0 = b * SEQ_PAD
            heads = []
            for hh in range(HEADS):
                lo = hh * HEAD_DIM
                qi = q[r0:r0 + SEQ_PAD, lo:lo + HEAD_DIM]
                ki = k[r0:r0 + SEQ_PAD, lo:lo + HEAD_DIM]
                vi = v[r0:r0 + SEQ_PAD, lo:lo + HEAD_DIM]
                s = lax.dot_general(qi, ki, (((1,), (1,)), ((), ())),
                                    preferred_element_type=jnp.float32) * scale
                s = jnp.where(key_valid, s, -1e30)
                m = jnp.max(s, axis=-1, keepdims=True)
                p = jnp.exp(s - m)
                p = p / jnp.sum(p, axis=-1, keepdims=True)   # exact softmax divide
                heads.append(jnp.dot(p, vi, preferred_element_type=jnp.float32))
            img_rows.append(jnp.concatenate(heads, axis=1))   # (SEQ_PAD, WIDTH)
        o_all = jnp.concatenate(img_rows, axis=0)             # (TB*SEQ_PAD, WIDTH)
        x = x + jnp.dot(o_all, out_w_ref[0],
                        preferred_element_type=jnp.float32) + out_b

        # ---- MLP ---------------------------------------------------------------
        h = _layernorm(x, ln2_g, ln2_b)
        h = jnp.dot(h, fc1_w_ref[0], preferred_element_type=jnp.float32) + fc1_b_ref[0]
        # TODO(synk): open_clip uses exact (erf) GELU; tanh approximation used here.
        h = jax.nn.gelu(h, approximate=True)
        x = x + jnp.dot(h, fc2_w_ref[0], preferred_element_type=jnp.float32) + fc2_b
        x_vmem[...] = x

        # ---- head (ln_post + projection + L2-normalize), last layer only -------
        @pl.when(layer == LAYERS - 1)
        def _():
            cls_rows = jnp.concatenate(
                [x[b * SEQ_PAD:b * SEQ_PAD + 1, :] for b in range(tb)], axis=0)
            cls_rows = _layernorm(cls_rows, ln_post_g_ref[...], ln_post_b_ref[...])
            f = jnp.dot(cls_rows, proj_ref[...],
                        preferred_element_type=jnp.float32)   # (TB, EMBED)
            # image_features /= image_features.norm(dim=-1, keepdim=True)  (no eps)
            f = f * lax.rsqrt(jnp.sum(f * f, axis=-1, keepdims=True))
            o_ref[0] = f

    return kernel


# ---- loss kernels --------------------------------------------------------------
def _cosine_loss_kernel(a_ref, b_ref, o_ref):
    # loss = 1 - mean(cosine_similarity(a, b, dim=1, eps=1e-8))
    a = a_ref[...]
    b = b_ref[...]
    if b.shape[0] != a.shape[0]:          # broadcast a (1, EMBED) text row in-kernel
        b = jnp.broadcast_to(b, a.shape)
    dot = jnp.sum(a * b, axis=-1, keepdims=True)
    na = jnp.sqrt(jnp.sum(a * a, axis=-1, keepdims=True))
    nb = jnp.sqrt(jnp.sum(b * b, axis=-1, keepdims=True))
    cos = dot / jnp.maximum(na * nb, 1e-8)                 # (B, 1)
    o_ref[...] = 1.0 - jnp.sum(cos, keepdims=True) / a.shape[0]


def _directional_loss_kernel(img_ref, src_ref, txt_ref, txt_src_ref, o_ref):
    # edit_direction = img - src; /= norm   (no eps, matching torch semantics)
    ed = img_ref[...] - src_ref[...]
    ed = ed * lax.rsqrt(jnp.sum(ed * ed, axis=-1, keepdims=True))
    td = txt_ref[...] - txt_src_ref[...]
    td = td * lax.rsqrt(jnp.sum(td * td, axis=-1, keepdims=True))
    if td.shape[0] != ed.shape[0]:
        td = jnp.broadcast_to(td, ed.shape)
    dot = jnp.sum(ed * td, axis=-1, keepdims=True)
    na = jnp.sqrt(jnp.sum(ed * ed, axis=-1, keepdims=True))
    nb = jnp.sqrt(jnp.sum(td * td, axis=-1, keepdims=True))
    cos = dot / jnp.maximum(na * nb, 1e-8)
    o_ref[...] = 1.0 - jnp.sum(cos, keepdims=True) / ed.shape[0]


def _single_block_call(kernel, out_shape, *args):
    """Single-block pallas_call: every operand is one full VMEM tile."""
    def spec(shape):
        zeros = (0,) * len(shape)
        return pl.BlockSpec(shape, lambda *_: zeros)
    return pl.pallas_call(
        kernel,
        grid=(1,),
        out_shape=jax.ShapeDtypeStruct(out_shape, jnp.float32),
        in_specs=[spec(a.shape) for a in args],
        out_specs=spec(out_shape),
    )(*args)


# ---- deterministic synthetic parameters ---------------------------------------
def init_params(key):
    keys = iter(jax.random.split(key, 32))

    def nrm(shape, scale=0.02):
        return (scale * jax.random.normal(next(keys), shape)).astype(jnp.float32)

    def ones(shape):
        return jnp.ones(shape, jnp.float32)

    def zeros(shape):
        return jnp.zeros(shape, jnp.float32)

    return {
        "patch_w": nrm((PATCH_DIM, WIDTH)),           # conv(stride=patch) as matmul
        "class_emb": nrm((1, 1, WIDTH)),
        "pos_emb": nrm((1, SEQ, WIDTH)),
        "ln_pre_g": ones((1, WIDTH)), "ln_pre_b": zeros((1, WIDTH)),
        "ln_post_g": ones((1, WIDTH)), "ln_post_b": zeros((1, WIDTH)),
        "proj": nrm((WIDTH, EMBED)),
        # per-layer weights stacked on a leading LAYERS axis (blocked by grid).
        "ln1_g": ones((LAYERS, 1, WIDTH)), "ln1_b": zeros((LAYERS, 1, WIDTH)),
        "qkv_w": nrm((LAYERS, WIDTH, 3 * WIDTH)), "qkv_b": zeros((LAYERS, 1, 3 * WIDTH)),
        "out_w": nrm((LAYERS, WIDTH, WIDTH)), "out_b": zeros((LAYERS, 1, WIDTH)),
        "ln2_g": ones((LAYERS, 1, WIDTH)), "ln2_b": zeros((LAYERS, 1, WIDTH)),
        "fc1_w": nrm((LAYERS, WIDTH, MLP)), "fc1_b": zeros((LAYERS, 1, MLP)),
        "fc2_w": nrm((LAYERS, MLP, WIDTH)), "fc2_b": zeros((LAYERS, 1, WIDTH)),
    }


# ---- model ---------------------------------------------------------------------
def encode_image(params, rgb, batch_tile=8):
    """rgb: [B, 3, H, W] NCHW -> L2-normalized features [B, EMBED]."""
    B = rgb.shape[0]
    TB = max(1, min(batch_tile, B))          # images per grid step
    Bp = ((B + TB - 1) // TB) * TB           # pad batch to a multiple of TB

    # preprocess glue (layout only).
    # TODO(synk): torchvision Resize defaults (antialiased bilinear) not
    # reproduced exactly; plain bilinear jax.image.resize used as glue.
    img = jax.image.resize(rgb, (B, 3, IMG_SIZE, IMG_SIZE), method="bilinear")
    hn = IMG_SIZE // PATCH
    p = img.reshape(B, 3, hn, PATCH, hn, PATCH)
    p = p.transpose(0, 2, 4, 1, 3, 5).reshape(B, N_PATCH, PATCH_DIM)
    # row 0: zero "cls" patch; rows 1..SEQ-1: patches; rows SEQ..SEQ_PAD-1: pad.
    patches = jnp.zeros((Bp, SEQ_PAD, PATCH_DIM), jnp.float32)
    patches = patches.at[:B, 1:1 + N_PATCH, :].set(p)
    patches2d = patches.reshape(Bp * SEQ_PAD, PATCH_DIM)

    # fold CLIP mean/std normalization into the patch-embed matmul (exact, affine):
    #   (x-mean)/std @ W  ==  x @ (W/std)  -  sum(mean/std * W)
    inv_std = 1.0 / CLIP_STD
    w_fold = params["patch_w"] * jnp.repeat(inv_std, PATCH * PATCH)[:, None]
    b_fold = -jnp.sum(jnp.repeat(CLIP_MEAN * inv_std, PATCH * PATCH)[:, None]
                      * params["patch_w"], axis=0, keepdims=True)        # (1, WIDTH)
    # fold the class embedding into row 0 of the positional embedding (the zero
    # cls patch row produces b_fold, so correct it to class_emb exactly).
    cls_fix = params["class_emb"].reshape(1, WIDTH) - b_fold
    pos = params["pos_emb"].reshape(SEQ, WIDTH)
    pos_pad = jnp.zeros((SEQ_PAD, WIDTH), jnp.float32)
    pos_pad = pos_pad.at[:SEQ].set(pos).at[0:1].add(cls_fix)
    pos_tiled = jnp.tile(pos_pad, (TB, 1))                               # (TB*SEQ_PAD, WIDTH)

    # split qkv into three lane-aligned projections and pack all WIDTH-sized
    # per-layer vectors into one (LAYERS, 9, WIDTH) array.
    qkv_w, qkv_b = params["qkv_w"], params["qkv_b"]
    q_w = qkv_w[:, :, :WIDTH]
    k_w = qkv_w[:, :, WIDTH:2 * WIDTH]
    v_w = qkv_w[:, :, 2 * WIDTH:]
    vecs = jnp.stack([
        params["ln1_g"][:, 0], params["ln1_b"][:, 0],
        qkv_b[:, 0, :WIDTH], qkv_b[:, 0, WIDTH:2 * WIDTH], qkv_b[:, 0, 2 * WIDTH:],
        params["out_b"][:, 0],
        params["ln2_g"][:, 0], params["ln2_b"][:, 0],
        params["fc2_b"][:, 0],
    ], axis=1)                                                           # (LAYERS, 9, WIDTH)

    pmap = lambda i, l: (i, 0)         # patches: blocked on batch
    lmap = lambda i, l: (l, 0, 0)      # per-layer weights: blocked on layer
    gmap2 = lambda i, l: (0, 0)        # whole (global) 2-D array
    omap = lambda i, l: (i, 0, 0)      # output: blocked on batch

    # TODO(synk): at real ViT-B scale, move patch_w/pos/proj out of resident
    # global specs (pl.ANY + manual DMA under pl.when) and raise
    # vmem_limit_bytes for the 64 MiB v7x VMEM budget.
    feats = pl.pallas_call(
        _make_encoder_kernel(TB),
        grid=(Bp // TB, LAYERS),
        out_shape=jax.ShapeDtypeStruct((Bp // TB, TB, EMBED), jnp.float32),
        in_specs=[
            pl.BlockSpec((TB * SEQ_PAD, PATCH_DIM), pmap),   # patches (stacked rows)
            pl.BlockSpec((PATCH_DIM, WIDTH), gmap2),         # folded patch weights
            pl.BlockSpec((1, WIDTH), gmap2),                 # folded patch bias
            pl.BlockSpec((TB * SEQ_PAD, WIDTH), gmap2),      # pos (+ cls), tiled
            pl.BlockSpec((1, WIDTH), gmap2),                 # ln_pre_g
            pl.BlockSpec((1, WIDTH), gmap2),                 # ln_pre_b
            pl.BlockSpec((1, 9, WIDTH), lmap),               # packed per-layer vectors
            pl.BlockSpec((1, WIDTH, WIDTH), lmap),           # q_w
            pl.BlockSpec((1, WIDTH, WIDTH), lmap),           # k_w
            pl.BlockSpec((1, WIDTH, WIDTH), lmap),           # v_w
            pl.BlockSpec((1, WIDTH, WIDTH), lmap),           # out_w
            pl.BlockSpec((1, WIDTH, MLP), lmap),             # fc1_w
            pl.BlockSpec((1, 1, MLP), lmap),                 # fc1_b
            pl.BlockSpec((1, MLP, WIDTH), lmap),             # fc2_w
            pl.BlockSpec((1, WIDTH), gmap2),                 # ln_post_g
            pl.BlockSpec((1, WIDTH), gmap2),                 # ln_post_b
            pl.BlockSpec((WIDTH, EMBED), gmap2),             # proj
        ],
        out_specs=pl.BlockSpec((1, TB, EMBED), omap),
        scratch_shapes=[pltpu.VMEM((TB * SEQ_PAD, WIDTH), jnp.float32)],
        compiler_params=pltpu.CompilerParams(
            dimension_semantics=("parallel", "arbitrary"),
            vmem_limit_bytes=32 * 1024 * 1024),
    )(patches2d, w_fold, b_fold, pos_tiled,
      params["ln_pre_g"], params["ln_pre_b"],
      vecs, q_w, k_w, v_w, params["out_w"],
      params["fc1_w"], params["fc1_b"], params["fc2_w"],
      params["ln_post_g"], params["ln_post_b"], params["proj"])
    return feats.reshape(Bp, EMBED)[:B]


def clip_encoding_forward(params, rgb_outputs, text_features,
                          rgb_src=None, text_src=None):
    if rgb_src is not None and text_src is not None:
        B = rgb_outputs.shape[0]
        # encode rendered + source images in ONE encoder call (weights streamed once)
        both = jnp.concatenate([rgb_outputs, rgb_src], axis=0)
        feats = encode_image(params, both)
        image_features, src_features = feats[:B], feats[B:]
        loss = _single_block_call(_directional_loss_kernel, (1, 1),
                                  image_features, src_features,
                                  text_features, text_src)
    else:
        image_features = encode_image(params, rgb_outputs)
        loss = _single_block_call(_cosine_loss_kernel, (1, 1),
                                  image_features, text_features)
    return loss[0, 0]


# ---- demo ----------------------------------------------------------------------
if __name__ == "__main__":
    key = jax.random.PRNGKey(0)
    k1, k2, k3, k4, kp = jax.random.split(key, 5)
    params = init_params(kp)

    rgb_outputs = jax.random.uniform(k1, (2, 3, 16, 16), jnp.float32)
    rgb_src = jax.random.uniform(k2, (2, 3, 16, 16), jnp.float32)

    t = jax.random.normal(k3, (2, EMBED), jnp.float32)
    text_features = t / jnp.linalg.norm(t, axis=-1, keepdims=True)
    ts = jax.random.normal(k4, (2, EMBED), jnp.float32)
    text_src = ts / jnp.linalg.norm(ts, axis=-1, keepdims=True)

    loss_plain = clip_encoding_forward(params, rgb_outputs, text_features)
    loss_directional = clip_encoding_forward(params, rgb_outputs, text_features,
                                             rgb_src=rgb_src, text_src=text_src)
    jax.block_until_ready((loss_plain, loss_directional))
    print("KERNEL_OK")
</pallas_src>

<mosaic_0001>
module attributes {stable_mosaic.version = 11 : i64} {
  func.func @kernel(%arg0: i32, %arg1: i32, %arg2: memref<48x192xf32, #tpu.memory_space<vmem>>, %arg3: memref<192x64xf32, #tpu.memory_space<vmem>>, %arg4: memref<1x64xf32, #tpu.memory_space<vmem>>, %arg5: memref<48x64xf32, #tpu.memory_space<vmem>>, %arg6: memref<1x64xf32, #tpu.memory_space<vmem>>, %arg7: memref<1x64xf32, #tpu.memory_space<vmem>>, %arg8: memref<1x9x64xf32, #tpu.memory_space<vmem>>, %arg9: memref<1x64x64xf32, #tpu.memory_space<vmem>>, %arg10: memref<1x64x64xf32, #tpu.memory_space<vmem>>, %arg11: memref<1x64x64xf32, #tpu.memory_space<vmem>>, %arg12: memref<1x64x64xf32, #tpu.memory_space<vmem>>, %arg13: memref<1x64x256xf32, #tpu.memory_space<vmem>>, %arg14: memref<1x1x256xf32, #tpu.memory_space<vmem>>, %arg15: memref<1x256x64xf32, #tpu.memory_space<vmem>>, %arg16: memref<1x64xf32, #tpu.memory_space<vmem>>, %arg17: memref<1x64xf32, #tpu.memory_space<vmem>>, %arg18: memref<64x32xf32, #tpu.memory_space<vmem>>, %arg19: memref<1x2x32xf32, #tpu.memory_space<vmem>>, %arg20: memref<48x64xf32, #tpu.memory_space<vmem>>) attributes {dimension_semantics = [#tpu.dimension_semantics<parallel>, #tpu.dimension_semantics<arbitrary>], iteration_bounds = array<i64: 1, 2>, scalar_prefetch = 0 : i64, scratch_operands = 1 : i64, tpu.core_type = #tpu.core_type<tc>, window_params = [{transform_indices = @transform_0, window_bounds = array<i64: 48, 192>}, {pipeline_mode = #tpu.pipeline_mode<synchronous>, transform_indices = @transform_1, window_bounds = array<i64: 192, 64>}, {pipeline_mode = #tpu.pipeline_mode<synchronous>, transform_indices = @transform_2, window_bounds = array<i64: 1, 64>}, {pipeline_mode = #tpu.pipeline_mode<synchronous>, transform_indices = @transform_3, window_bounds = array<i64: 48, 64>}, {pipeline_mode = #tpu.pipeline_mode<synchronous>, transform_indices = @transform_4, window_bounds = array<i64: 1, 64>}, {pipeline_mode = #tpu.pipeline_mode<synchronous>, transform_indices = @transform_5, window_bounds = array<i64: 1, 64>}, {transform_indices = @transform_6, window_bounds = array<i64: 1, 9, 64>}, {transform_indices = @transform_7, window_bounds = array<i64: 1, 64, 64>}, {transform_indices = @transform_8, window_bounds = array<i64: 1, 64, 64>}, {transform_indices = @transform_9, window_bounds = array<i64: 1, 64, 64>}, {transform_indices = @transform_10, window_bounds = array<i64: 1, 64, 64>}, {transform_indices = @transform_11, window_bounds = array<i64: 1, 64, 256>}, {transform_indices = @transform_12, window_bounds = array<i64: 1, 1, 256>}, {transform_indices = @transform_13, window_bounds = array<i64: 1, 256, 64>}, {pipeline_mode = #tpu.pipeline_mode<synchronous>, transform_indices = @transform_14, window_bounds = array<i64: 1, 64>}, {pipeline_mode = #tpu.pipeline_mode<synchronous>, transform_indices = @transform_15, window_bounds = array<i64: 1, 64>}, {pipeline_mode = #tpu.pipeline_mode<synchronous>, transform_indices = @transform_16, window_bounds = array<i64: 64, 32>}, {transform_indices = @transform_17, window_bounds = array<i64: 1, 2, 32>}]} {
    %c0_i32 = arith.constant 0 : i32
    %0 = arith.cmpi eq, %arg1, %c0_i32 : i32
    %1 = arith.extui %0 : i1 to i32
    %c0_i32_0 = arith.constant 0 : i32
    %2 = arith.cmpi ne, %1, %c0_i32_0 : i32
    scf.if %2 {
      %c0_72 = arith.constant 0 : index
      %c0_73 = arith.constant 0 : index
      %188 = vector.load %arg2[%c0_72, %c0_73] : memref<48x192xf32, #tpu.memory_space<vmem>>, vector<48x192xf32>
      %c0_74 = arith.constant 0 : index
      %c0_75 = arith.constant 0 : index
      %189 = vector.load %arg3[%c0_74, %c0_75] : memref<192x64xf32, #tpu.memory_space<vmem>>, vector<192x64xf32>
      %cst_76 = arith.constant dense<0.000000e+00> : vector<48x64xf32>
      %190 = tpu.matmul %188, %189, %cst_76 {dimension_numbers = #tpu.dot_dimension_numbers<[1], [0], [0], [1], [0, 0, 1, 1], [], []>} : vector<48x192xf32>, vector<192x64xf32>, vector<48x64xf32> -> vector<48x64xf32>
      %c0_77 = arith.constant 0 : index
      %c0_78 = arith.constant 0 : index
      %191 = vector.load %arg4[%c0_77, %c0_78] : memref<1x64xf32, #tpu.memory_space<vmem>>, vector<1x64xf32>
      %192 = vector.broadcast %191 : vector<1x64xf32> to vector<48x64xf32>
      %193 = arith.addf %190, %192 : vector<48x64xf32>
      %c0_79 = arith.constant 0 : index
      %c0_80 = arith.constant 0 : index
      %194 = vector.load %arg5[%c0_79, %c0_80] : memref<48x64xf32, #tpu.memory_space<vmem>>, vector<48x64xf32>
      %195 = arith.addf %193, %194 : vector<48x64xf32>
      %c0_81 = arith.constant 0 : index
      %c0_82 = arith.constant 0 : index
      %196 = vector.load %arg6[%c0_81, %c0_82] : memref<1x64xf32, #tpu.memory_space<vmem>>, vector<1x64xf32>
      %c0_83 = arith.constant 0 : index
      %c0_84 = arith.constant 0 : index
      %197 = vector.load %arg7[%c0_83, %c0_84] : memref<1x64xf32, #tpu.memory_space<vmem>>, vector<1x64xf32>
      %cst_85 = arith.constant dense<0.000000e+00> : vector<48xf32>
      %198 = vector.multi_reduction <add>, %195, %cst_85 [1] : vector<48x64xf32> to vector<48xf32>
      %199 = vector.shape_cast %198 : vector<48xf32> to vector<48x1xf32>
      %cst_86 = arith.constant 6.400000e+01 : f32
      %200 = vector.broadcast %cst_86 : f32 to vector<48x1xf32>
      %201 = arith.divf %199, %200 : vector<48x1xf32>
      %202 = vector.broadcast %201 : vector<48x1xf32> to vector<48x64xf32>
      %203 = arith.subf %195, %202 : vector<48x64xf32>
      %204 = arith.mulf %203, %203 : vector<48x64xf32>
      %cst_87 = arith.constant dense<0.000000e+00> : vector<48xf32>
      %205 = vector.multi_reduction <add>, %204, %cst_87 [1] : vector<48x64xf32> to vector<48xf32>
      %206 = vector.shape_cast %205 : vector<48xf32> to vector<48x1xf32>
      %cst_88 = arith.constant 6.400000e+01 : f32
      %207 = vector.broadcast %cst_88 : f32 to vector<48x1xf32>
      %208 = arith.divf %206, %207 : vector<48x1xf32>
      %209 = vector.broadcast %201 : vector<48x1xf32> to vector<48x64xf32>
      %210 = arith.subf %195, %209 : vector<48x64xf32>
      %cst_89 = arith.constant 9.99999974E-6 : f32
      %211 = vector.broadcast %cst_89 : f32 to vector<48x1xf32>
      %212 = arith.addf %208, %211 : vector<48x1xf32>
      %213 = math.rsqrt %212 : vector<48x1xf32>
      %214 = vector.broadcast %213 : vector<48x1xf32> to vector<48x64xf32>
      %215 = arith.mulf %210, %214 : vector<48x64xf32>
      %216 = vector.broadcast %196 : vector<1x64xf32> to vector<48x64xf32>
      %217 = arith.mulf %215, %216 : vector<48x64xf32>
      %218 = vector.broadcast %197 : vector<1x64xf32> to vector<48x64xf32>
      %219 = arith.addf %217, %218 : vector<48x64xf32>
      %c0_90 = arith.constant 0 : index
      %c0_91 = arith.constant 0 : index
      %220 = vector.load %arg20[%c0_90, %c0_91] : memref<48x64xf32, #tpu.memory_space<vmem>>, vector<48x64xf32>
      tpu.vector_store %arg20[%c0_90, %c0_91], %219 {strides = array<i32>} : memref<48x64xf32, #tpu.memory_space<vmem>>, vector<48x64xf32>,
    } else {
    }
    %c0 = arith.constant 0 : index
    %c0_1 = arith.constant 0 : index
    %3 = vector.load %arg20[%c0, %c0_1] : memref<48x64xf32, #tpu.memory_space<vmem>>, vector<48x64xf32>
    %c0_2 = arith.constant 0 : index
    %c0_3 = arith.constant 0 : index
    %c0_4 = arith.constant 0 : index
    %4 = vector.load %arg8[%c0_2, %c0_3, %c0_4] : memref<1x9x64xf32, #tpu.memory_space<vmem>>, vector<1x9x64xf32>
    %5 = vector.shape_cast %4 : vector<1x9x64xf32> to vector<9x64xf32>
    %6 = vector.extract_strided_slice %5 {offsets = [0, 0], sizes = [1, 64], strides = [1, 1]} : vector<9x64xf32> to vector<1x64xf32>
    %7 = vector.extract_strided_slice %5 {offsets = [1, 0], sizes = [1, 64], strides = [1, 1]} : vector<9x64xf32> to vector<1x64xf32>
    %8 = vector.extract_strided_slice %5 {offsets = [2, 0], sizes = [1, 64], strides = [1, 1]} : vector<9x64xf32> to vector<1x64xf32>
    %9 = vector.extract_strided_slice %5 {offsets = [3, 0], sizes = [1, 64], strides = [1, 1]} : vector<9x64xf32> to vector<1x64xf32>
    %10 = vector.extract_strided_slice %5 {offsets = [4, 0], sizes = [1, 64], strides = [1, 1]} : vector<9x64xf32> to vector<1x64xf32>
    %11 = vector.extract_strided_slice %5 {offsets = [5, 0], sizes = [1, 64], strides = [1, 1]} : vector<9x64xf32> to vector<1x64xf32>
    %12 = vector.extract_strided_slice %5 {offsets = [6, 0], sizes = [1, 64], strides = [1, 1]} : vector<9x64xf32> to vector<1x64xf32>
    %13 = vector.extract_strided_slice %5 {offsets = [7, 0], sizes = [1, 64], strides = [1, 1]} : vector<9x64xf32> to vector<1x64xf32>
    %14 = vector.extract_strided_slice %5 {offsets = [8, 0], sizes = [1, 64], strides = [1, 1]} : vector<9x64xf32> to vector<1x64xf32>
    %cst = arith.constant dense<0.000000e+00> : vector<48xf32>
    %15 = vector.multi_reduction <add>, %3, %cst [1] : vector<48x64xf32> to vector<48xf32>
    %16 = vector.shape_cast %15 : vector<48xf32> to vector<48x1xf32>
    %cst_5 = arith.constant 6.400000e+01 : f32
    %17 = vector.broadcast %cst_5 : f32 to vector<48x1xf32>
    %18 = arith.divf %16, %17 : vector<48x1xf32>
    %19 = vector.broadcast %18 : vector<48x1xf32> to vector<48x64xf32>
    %20 = arith.subf %3, %19 : vector<48x64xf32>
    %21 = arith.mulf %20, %20 : vector<48x64xf32>
    %cst_6 = arith.constant dense<0.000000e+00> : vector<48xf32>
    %22 = vector.multi_reduction <add>, %21, %cst_6 [1] : vector<48x64xf32> to vector<48xf32>
    %23 = vector.shape_cast %22 : vector<48xf32> to vector<48x1xf32>
    %cst_7 = arith.constant 6.400000e+01 : f32
    %24 = vector.broadcast %cst_7 : f32 to vector<48x1xf32>
    %25 = arith.divf %23, %24 : vector<48x1xf32>
    %26 = vector.broadcast %18 : vector<48x1xf32> to vector<48x64xf32>
    %27 = arith.subf %3, %26 : vector<48x64xf32>
    %cst_8 = arith.constant 9.99999974E-6 : f32
    %28 = vector.broadcast %cst_8 : f32 to vector<48x1xf32>
    %29 = arith.addf %25, %28 : vector<48x1xf32>
    %30 = math.rsqrt %29 : vector<48x1xf32>
    %31 = vector.broadcast %30 : vector<48x1xf32> to vector<48x64xf32>
    %32 = arith.mulf %27, %31 : vector<48x64xf32>
    %33 = vector.broadcast %6 : vector<1x64xf32> to vector<48x64xf32>
    %34 = arith.mulf %32, %33 : vector<48x64xf32>
    %35 = vector.broadcast %7 : vector<1x64xf32> to vector<48x64xf32>
    %36 = arith.addf %34, %35 : vector<48x64xf32>
    %c0_9 = arith.constant 0 : index
    %c0_10 = arith.constant 0 : index
    %c0_11 = arith.constant 0 : index
    %37 = vector.load %arg9[%c0_9, %c0_10, %c0_11] : memref<1x64x64xf32, #tpu.memory_space<vmem>>, vector<1x64x64xf32>
    %38 = vector.shape_cast %37 : vector<1x64x64xf32> to vector<64x64xf32>
    %cst_12 = arith.constant dense<0.000000e+00> : vector<48x64xf32>
    %39 = tpu.matmul %36, %38, %cst_12 {dimension_numbers = #tpu.dot_dimension_numbers<[1], [0], [0], [1], [0, 0, 1, 1], [], []>} : vector<48x64xf32>, vector<64x64xf32>, vector<48x64xf32> -> vector<48x64xf32>
    %40 = vector.broadcast %8 : vector<1x64xf32> to vector<48x64xf32>
    %41 = arith.addf %39, %40 : vector<48x64xf32>
    %c0_13 = arith.constant 0 : index
    %c0_14 = arith.constant 0 : index
    %c0_15 = arith.constant 0 : index
    %42 = vector.load %arg10[%c0_13, %c0_14, %c0_15] : memref<1x64x64xf32, #tpu.memory_space<vmem>>, vector<1x64x64xf32>
    %43 = vector.shape_cast %42 : vector<1x64x64xf32> to vector<64x64xf32>
    %cst_16 = arith.constant dense<0.000000e+00> : vector<48x64xf32>
    %44 = tpu.matmul %36, %43, %cst_16 {dimension_numbers = #tpu.dot_dimension_numbers<[1], [0], [0], [1], [0, 0, 1, 1], [], []>} : vector<48x64xf32>, vector<64x64xf32>, vector<48x64xf32> -> vector<48x64xf32>
    %45 = vector.broadcast %9 : vector<1x64xf32> to vector<48x64xf32>
    %46 = arith.addf %44, %45 : vector<48x64xf32>
    %c0_17 = arith.constant 0 : index
    %c0_18 = arith.constant 0 : index
    %c0_19 = arith.constant 0 : index
    %47 = vector.load %arg11[%c0_17, %c0_18, %c0_19] : memref<1x64x64xf32, #tpu.memory_space<vmem>>, vector<1x64x64xf32>
    %48 = vector.shape_cast %47 : vector<1x64x64xf32> to vector<64x64xf32>
    %cst_20 = arith.constant dense<0.000000e+00> : vector<48x64xf32>
    %49 = tpu.matmul %36, %48, %cst_20 {dimension_numbers = #tpu.dot_dimension_numbers<[1], [0], [0], [1], [0, 0, 1, 1], [], []>} : vector<48x64xf32>, vector<64x64xf32>, vector<48x64xf32> -> vector<48x64xf32>
    %50 = vector.broadcast %10 : vector<1x64xf32> to vector<48x64xf32>
    %51 = arith.addf %49, %50 : vector<48x64xf32>
    %52 = tpu.iota {dimensions = array<i32: 1>} : vector<24x24xi32>
    %c17_i32 = arith.constant 17 : i32
    %53 = vector.broadcast %c17_i32 : i32 to vector<24x24xi32>
    %54 = arith.cmpi slt, %52, %53 : vector<24x24xi32>
    %55 = vector.extract_strided_slice %41 {offsets = [0, 0], sizes = [24, 32], strides = [1, 1]} : vector<48x64xf32> to vector<24x32xf32>
    %56 = vector.extract_strided_slice %46 {offsets = [0, 0], sizes = [24, 32], strides = [1, 1]} : vector<48x64xf32> to vector<24x32xf32>
    %57 = vector.extract_strided_slice %51 {offsets = [0, 0], sizes = [24, 32], strides = [1, 1]} : vector<48x64xf32> to vector<24x32xf32>
    %cst_21 = arith.constant dense<0.000000e+00> : vector<24x24xf32>
    %58 = tpu.matmul %55, %56, %cst_21 {dimension_numbers = #tpu.dot_dimension_numbers<[1], [1], [0], [0], [0, 0, 1, 0], [], []>} : vector<24x32xf32>, vector<24x32xf32>, vector<24x24xf32> -> vector<24x24xf32>
    %cst_22 = arith.constant 0.176776692 : f32
    %59 = vector.broadcast %cst_22 : f32 to vector<24x24xf32>
    %60 = arith.mulf %58, %59 : vector<24x24xf32>
    %cst_23 = arith.constant -1.000000e+30 : f32
    %61 = vector.broadcast %cst_23 : f32 to vector<24x24xf32>
    %62 = arith.select %54, %60, %61 : vector<24x24xi1>, vector<24x24xf32>
    %cst_24 = arith.constant dense<0xFF800000> : vector<24xf32>
    %63 = vector.multi_reduction <maximumf>, %62, %cst_24 [1] : vector<24x24xf32> to vector<24xf32>
    %64 = vector.shape_cast %63 : vector<24xf32> to vector<24x1xf32>
    %65 = vector.broadcast %64 : vector<24x1xf32> to vector<24x24xf32>
    %66 = arith.subf %62, %65 : vector<24x24xf32>
    %67 = math.exp %66 : vector<24x24xf32>
    %cst_25 = arith.constant dense<0.000000e+00> : vector<24xf32>
    %68 = vector.multi_reduction <add>, %67, %cst_25 [1] : vector<24x24xf32> to vector<24xf32>
    %69 = vector.shape_cast %68 : vector<24xf32> to vector<24x1xf32>
    %70 = vector.broadcast %69 : vector<24x1xf32> to vector<24x24xf32>
    %71 = arith.divf %67, %70 : vector<24x24xf32>
    %cst_26 = arith.constant dense<0.000000e+00> : vector<24x32xf32>
    %72 = tpu.matmul %71, %57, %cst_26 {dimension_numbers = #tpu.dot_dimension_numbers<[1], [0], [0], [1], [0, 0, 1, 1], [], []>} : vector<24x24xf32>, vector<24x32xf32>, vector<24x32xf32> -> vector<24x32xf32>
    %73 = vector.extract_strided_slice %41 {offsets = [0, 32], sizes = [24, 32], strides = [1, 1]} : vector<48x64xf32> to vector<24x32xf32>
    %74 = vector.extract_strided_slice %46 {offsets = [0, 32], sizes = [24, 32], strides = [1, 1]} : vector<48x64xf32> to vector<24x32xf32>
    %75 = vector.extract_strided_slice %51 {offsets = [0, 32], sizes = [24, 32], strides = [1, 1]} : vector<48x64xf32> to vector<24x32xf32>
    %cst_27 = arith.constant dense<0.000000e+00> : vector<24x24xf32>
    %76 = tpu.matmul %73, %74, %cst_27 {dimension_numbers = #tpu.dot_dimension_numbers<[1], [1], [0], [0], [0, 0, 1, 0], [], []>} : vector<24x32xf32>, vector<24x32xf32>, vector<24x24xf32> -> vector<24x24xf32>
    %cst_28 = arith.constant 0.176776692 : f32
    %77 = vector.broadcast %cst_28 : f32 to vector<24x24xf32>
    %78 = arith.mulf %76, %77 : vector<24x24xf32>
    %cst_29 = arith.constant -1.000000e+30 : f32
    %79 = vector.broadcast %cst_29 : f32 to vector<24x24xf32>
    %80 = arith.select %54, %78, %79 : vector<24x24xi1>, vector<24x24xf32>
    %cst_30 = arith.constant dense<0xFF800000> : vector<24xf32>
    %81 = vector.multi_reduction <maximumf>, %80, %cst_30 [1] : vector<24x24xf32> to vector<24xf32>
    %82 = vector.shape_cast %81 : vector<24xf32> to vector<24x1xf32>
    %83 = vector.broadcast %82 : vector<24x1xf32> to vector<24x24xf32>
    %84 = arith.subf %80, %83 : vector<24x24xf32>
    %85 = math.exp %84 : vector<24x24xf32>
    %cst_31 = arith.constant dense<0.000000e+00> : vector<24xf32>
    %86 = vector.multi_reduction <add>, %85, %cst_31 [1] : vector<24x24xf32> to vector<24xf32>
    %87 = vector.shape_cast %86 : vector<24xf32> to vector<24x1xf32>
    %88 = vector.broadcast %87 : vector<24x1xf32> to vector<24x24xf32>
    %89 = arith.divf %85, %88 : vector<24x24xf32>
    %cst_32 = arith.constant dense<0.000000e+00> : vector<24x32xf32>
    %90 = tpu.matmul %89, %75, %cst_32 {dimension_numbers = #tpu.dot_dimension_numbers<[1], [0], [0], [1], [0, 0, 1, 1], [], []>} : vector<24x24xf32>, vector<24x32xf32>, vector<24x32xf32> -> vector<24x32xf32>
    %91 = tpu.concatenate %72, %90 in 1 : vector<24x32xf32>, vector<24x32xf32> -> vector<24x64xf32>
    %92 = vector.extract_strided_slice %41 {offsets = [24, 0], sizes = [24, 32], strides = [1, 1]} : vector<48x64xf32> to vector<24x32xf32>
    %93 = vector.extract_strided_slice %46 {offsets = [24, 0], sizes = [24, 32], strides = [1, 1]} : vector<48x64xf32> to vector<24x32xf32>
    %94 = vector.extract_strided_slice %51 {offsets = [24, 0], sizes = [24, 32], strides = [1, 1]} : vector<48x64xf32> to vector<24x32xf32>
    %cst_33 = arith.constant dense<0.000000e+00> : vector<24x24xf32>
    %95 = tpu.matmul %92, %93, %cst_33 {dimension_numbers = #tpu.dot_dimension_numbers<[1], [1], [0], [0], [0, 0, 1, 0], [], []>} : vector<24x32xf32>, vector<24x32xf32>, vector<24x24xf32> -> vector<24x24xf32>
    %cst_34 = arith.constant 0.176776692 : f32
    %96 = vector.broadcast %cst_34 : f32 to vector<24x24xf32>
    %97 = arith.mulf %95, %96 : vector<24x24xf32>
    %cst_35 = arith.constant -1.000000e+30 : f32
    %98 = vector.broadcast %cst_35 : f32 to vector<24x24xf32>
    %99 = arith.select %54, %97, %98 : vector<24x24xi1>, vector<24x24xf32>
    %cst_36 = arith.constant dense<0xFF800000> : vector<24xf32>
    %100 = vector.multi_reduction <maximumf>, %99, %cst_36 [1] : vector<24x24xf32> to vector<24xf32>
    %101 = vector.shape_cast %100 : vector<24xf32> to vector<24x1xf32>
    %102 = vector.broadcast %101 : vector<24x1xf32> to vector<24x24xf32>
    %103 = arith.subf %99, %102 : vector<24x24xf32>
    %104 = math.exp %103 : vector<24x24xf32>
    %cst_37 = arith.constant dense<0.000000e+00> : vector<24xf32>
    %105 = vector.multi_reduction <add>, %104, %cst_37 [1] : vector<24x24xf32> to vector<24xf32>
    %106 = vector.shape_cast %105 : vector<24xf32> to vector<24x1xf32>
    %107 = vector.broadcast %106 : vector<24x1xf32> to vector<24x24xf32>
    %108 = arith.divf %104, %107 : vector<24x24xf32>
    %cst_38 = arith.constant dense<0.000000e+00> : vector<24x32xf32>
    %109 = tpu.matmul %108, %94, %cst_38 {dimension_numbers = #tpu.dot_dimension_numbers<[1], [0], [0], [1], [0, 0, 1, 1], [], []>} : vector<24x24xf32>, vector<24x32xf32>, vector<24x32xf32> -> vector<24x32xf32>
    %110 = vector.extract_strided_slice %41 {offsets = [24, 32], sizes = [24, 32], strides = [1, 1]} : vector<48x64xf32> to vector<24x32xf32>
    %111 = vector.extract_strided_slice %46 {offsets = [24, 32], sizes = [24, 32], strides = [1, 1]} : vector<48x64xf32> to vector<24x32xf32>
    %112 = vector.extract_strided_slice %51 {offsets = [24, 32], sizes = [24, 32], strides = [1, 1]} : vector<48x64xf32> to vector<24x32xf32>
    %cst_39 = arith.constant dense<0.000000e+00> : vector<24x24xf32>
    %113 = tpu.matmul %110, %111, %cst_39 {dimension_numbers = #tpu.dot_dimension_numbers<[1], [1], [0], [0], [0, 0, 1, 0], [], []>} : vector<24x32xf32>, vector<24x32xf32>, vector<24x24xf32> -> vector<24x24xf32>
    %cst_40 = arith.constant 0.176776692 : f32
    %114 = vector.broadcast %cst_40 : f32 to vector<24x24xf32>
    %115 = arith.mulf %113, %114 : vector<24x24xf32>
    %cst_41 = arith.constant -1.000000e+30 : f32
    %116 = vector.broadcast %cst_41 : f32 to vector<24x24xf32>
    %117 = arith.select %54, %115, %116 : vector<24x24xi1>, vector<24x24xf32>
    %cst_42 = arith.constant dense<0xFF800000> : vector<24xf32>
    %118 = vector.multi_reduction <maximumf>, %117, %cst_42 [1] : vector<24x24xf32> to vector<24xf32>
    %119 = vector.shape_cast %118 : vector<24xf32> to vector<24x1xf32>
    %120 = vector.broadcast %119 : vector<24x1xf32> to vector<24x24xf32>
    %121 = arith.subf %117, %120 : vector<24x24xf32>
    %122 = math.exp %121 : vector<24x24xf32>
    %cst_43 = arith.constant dense<0.000000e+00> : vector<24xf32>
    %123 = vector.multi_reduction <add>, %122, %cst_43 [1] : vector<24x24xf32> to vector<24xf32>
    %124 = vector.shape_cast %123 : vector<24xf32> to vector<24x1xf32>
    %125 = vector.broadcast %124 : vector<24x1xf32> to vector<24x24xf32>
    %126 = arith.divf %122, %125 : vector<24x24xf32>
    %cst_44 = arith.constant dense<0.000000e+00> : vector<24x32xf32>
    %127 = tpu.matmul %126, %112, %cst_44 {dimension_numbers = #tpu.dot_dimension_numbers<[1], [0], [0], [1], [0, 0, 1, 1], [], []>} : vector<24x24xf32>, vector<24x32xf32>, vector<24x32xf32> -> vector<24x32xf32>
    %128 = tpu.concatenate %109, %127 in 1 : vector<24x32xf32>, vector<24x32xf32> -> vector<24x64xf32>
    %129 = tpu.concatenate %91, %128 in 0 : vector<24x64xf32>, vector<24x64xf32> -> vector<48x64xf32>
    %c0_45 = arith.constant 0 : index
    %c0_46 = arith.constant 0 : index
    %c0_47 = arith.constant 0 : index
    %130 = vector.load %arg12[%c0_45, %c0_46, %c0_47] : memref<1x64x64xf32, #tpu.memory_space<vmem>>, vector<1x64x64xf32>
    %131 = vector.shape_cast %130 : vector<1x64x64xf32> to vector<64x64xf32>
    %cst_48 = arith.constant dense<0.000000e+00> : vector<48x64xf32>
    %132 = tpu.matmul %129, %131, %cst_48 {dimension_numbers = #tpu.dot_dimension_numbers<[1], [0], [0], [1], [0, 0, 1, 1], [], []>} : vector<48x64xf32>, vector<64x64xf32>, vector<48x64xf32> -> vector<48x64xf32>
    %133 = arith.addf %3, %132 : vector<48x64xf32>
    %134 = vector.broadcast %11 : vector<1x64xf32> to vector<48x64xf32>
    %135 = arith.addf %133, %134 : vector<48x64xf32>
    %cst_49 = arith.constant dense<0.000000e+00> : vector<48xf32>
    %136 = vector.multi_reduction <add>, %135, %cst_49 [1] : vector<48x64xf32> to vector<48xf32>
    %137 = vector.shape_cast %136 : vector<48xf32> to vector<48x1xf32>
    %cst_50 = arith.constant 6.400000e+01 : f32
    %138 = vector.broadcast %cst_50 : f32 to vector<48x1xf32>
    %139 = arith.divf %137, %138 : vector<48x1xf32>
    %140 = vector.broadcast %139 : vector<48x1xf32> to vector<48x64xf32>
    %141 = arith.subf %135, %140 : vector<48x64xf32>
    %142 = arith.mulf %141, %141 : vector<48x64xf32>
    %cst_51 = arith.constant dense<0.000000e+00> : vector<48xf32>
    %143 = vector.multi_reduction <add>, %142, %cst_51 [1] : vector<48x64xf32> to vector<48xf32>
    %144 = vector.shape_cast %143 : vector<48xf32> to vector<48x1xf32>
    %cst_52 = arith.constant 6.400000e+01 : f32
    %145 = vector.broadcast %cst_52 : f32 to vector<48x1xf32>
    %146 = arith.divf %144, %145 : vector<48x1xf32>
    %147 = vector.broadcast %139 : vector<48x1xf32> to vector<48x64xf32>
    %148 = arith.subf %135, %147 : vector<48x64xf32>
    %cst_53 = arith.constant 9.99999974E-6 : f32
    %149 = vector.broadcast %cst_53 : f32 to vector<48x1xf32>
    %150 = arith.addf %146, %149 : vector<48x1xf32>
    %151 = math.rsqrt %150 : vector<48x1xf32>
    %152 = vector.broadcast %151 : vector<48x1xf32> to vector<48x64xf32>
    %153 = arith.mulf %148, %152 : vector<48x64xf32>
    %154 = vector.broadcast %12 : vector<1x64xf32> to vector<48x64xf32>
    %155 = arith.mulf %153, %154 : vector<48x64xf32>
    %156 = vector.broadcast %13 : vector<1x64xf32> to vector<48x64xf32>
    %157 = arith.addf %155, %156 : vector<48x64xf32>
    %c0_54 = arith.constant 0 : index
    %c0_55 = arith.constant 0 : index
    %c0_56 = arith.constant 0 : index
    %158 = vector.load %arg13[%c0_54, %c0_55, %c0_56] : memref<1x64x256xf32, #tpu.memory_space<vmem>>, vector<1x64x256xf32>
    %159 = vector.shape_cast %158 : vector<1x64x256xf32> to vector<64x256xf32>
    %cst_57 = arith.constant dense<0.000000e+00> : vector<48x256xf32>
    %160 = tpu.matmul %157, %159, %cst_57 {dimension_numbers = #tpu.dot_dimension_numbers<[1], [0], [0], [1], [0, 0, 1, 1], [], []>} : vector<48x64xf32>, vector<64x256xf32>, vector<48x256xf32> -> vector<48x256xf32>
    %c0_58 = arith.constant 0 : index
    %c0_59 = arith.constant 0 : index
    %c0_60 = arith.constant 0 : index
    %161 = vector.load %arg14[%c0_58, %c0_59, %c0_60] : memref<1x1x256xf32, #tpu.memory_space<vmem>>, vector<1x1x256xf32>
    %162 = vector.shape_cast %161 : vector<1x1x256xf32> to vector<1x256xf32>
    %163 = vector.broadcast %162 : vector<1x256xf32> to vector<48x256xf32>
    %164 = arith.addf %160, %163 : vector<48x256xf32>
    %165 = arith.mulf %164, %164 : vector<48x256xf32>
    %166 = arith.mulf %164, %165 : vector<48x256xf32>
    %cst_61 = arith.constant 4.471500e-02 : f32
    %167 = vector.broadcast %cst_61 : f32 to vector<48x256xf32>
    %168 = arith.mulf %167, %166 : vector<48x256xf32>
    %169 = arith.addf %164, %168 : vector<48x256xf32>
    %cst_62 = arith.constant 0.797884583 : f32
    %170 = vector.broadcast %cst_62 : f32 to vector<48x256xf32>
    %171 = arith.mulf %170, %169 : vector<48x256xf32>
    %172 = math.tanh %171 : vector<48x256xf32>
    %cst_63 = arith.constant 1.000000e+00 : f32
    %173 = vector.broadcast %cst_63 : f32 to vector<48x256xf32>
    %174 = arith.addf %173, %172 : vector<48x256xf32>
    %cst_64 = arith.constant 5.000000e-01 : f32
    %175 = vector.broadcast %cst_64 : f32 to vector<48x256xf32>
    %176 = arith.mulf %175, %174 : vector<48x256xf32>
    %177 = arith.mulf %164, %176 : vector<48x256xf32>
    %c0_65 = arith.constant 0 : index
    %c0_66 = arith.constant 0 : index
    %c0_67 = arith.constant 0 : index
    %178 = vector.load %arg15[%c0_65, %c0_66, %c0_67] : memref<1x256x64xf32, #tpu.memory_space<vmem>>, vector<1x256x64xf32>
    %179 = vector.shape_cast %178 : vector<1x256x64xf32> to vector<256x64xf32>
    %cst_68 = arith.constant dense<0.000000e+00> : vector<48x64xf32>
    %180 = tpu.matmul %177, %179, %cst_68 {dimension_numbers = #tpu.dot_dimension_numbers<[1], [0], [0], [1], [0, 0, 1, 1], [], []>} : vector<48x256xf32>, vector<256x64xf32>, vector<48x64xf32> -> vector<48x64xf32>
    %181 = arith.addf %135, %180 : vector<48x64xf32>
    %182 = vector.broadcast %14 : vector<1x64xf32> to vector<48x64xf32>
    %183 = arith.addf %181, %182 : vector<48x64xf32>
    %c0_69 = arith.constant 0 : index
    %c0_70 = arith.constant 0 : index
    %184 = vector.load %arg20[%c0_69, %c0_70] : memref<48x64xf32, #tpu.memory_space<vmem>>, vector<48x64xf32>
    tpu.vector_store %arg20[%c0_69, %c0_70], %183 {strides = array<i32>} : memref<48x64xf32, #tpu.memory_space<vmem>>, vector<48x64xf32>,
    %c1_i32 = arith.constant 1 : i32
    %185 = arith.cmpi eq, %arg1, %c1_i32 : i32
    %186 = arith.extui %185 : i1 to i32
    %c0_i32_71 = arith.constant 0 : i32
    %187 = arith.cmpi ne, %186, %c0_i32_71 : i32
    scf.if %187 {
      %188 = vector.extract_strided_slice %183 {offsets = [0, 0], sizes = [1, 64], strides = [1, 1]} : vector<48x64xf32> to vector<1x64xf32>
      %189 = vector.extract_strided_slice %183 {offsets = [24, 0], sizes = [1, 64], strides = [1, 1]} : vector<48x64xf32> to vector<1x64xf32>
      %190 = tpu.concatenate %188, %189 in 0 : vector<1x64xf32>, vector<1x64xf32> -> vector<2x64xf32>
      %c0_72 = arith.constant 0 : index
      %c0_73 = arith.constant 0 : index
      %191 = vector.load %arg16[%c0_72, %c0_73] : memref<1x64xf32, #tpu.memory_space<vmem>>, vector<1x64xf32>
      %c0_74 = arith.constant 0 : index
      %c0_75 = arith.constant 0 : index
      %192 = vector.load %arg17[%c0_74, %c0_75] : memref<1x64xf32, #tpu.memory_space<vmem>>, vector<1x64xf32>
      %cst_76 = arith.constant dense<0.000000e+00> : vector<2xf32>
      %193 = vector.multi_reduction <add>, %190, %cst_76 [1] : vector<2x64xf32> to vector<2xf32>
      %194 = vector.shape_cast %193 : vector<2xf32> to vector<2x1xf32>
      %cst_77 = arith.constant 6.400000e+01 : f32
      %195 = vector.broadcast %cst_77 : f32 to vector<2x1xf32>
      %196 = arith.divf %194, %195 : vector<2x1xf32>
      %197 = vector.broadcast %196 : vector<2x1xf32> to vector<2x64xf32>
      %198 = arith.subf %190, %197 : vector<2x64xf32>
      %199 = arith.mulf %198, %198 : vector<2x64xf32>
      %cst_78 = arith.constant dense<0.000000e+00> : vector<2xf32>
      %200 = vector.multi_reduction <add>, %199, %cst_78 [1] : vector<2x64xf32> to vector<2xf32>
      %201 = vector.shape_cast %200 : vector<2xf32> to vector<2x1xf32>
      %cst_79 = arith.constant 6.400000e+01 : f32
      %202 = vector.broadcast %cst_79 : f32 to vector<2x1xf32>
      %203 = arith.divf %201, %202 : vector<2x1xf32>
      %204 = vector.broadcast %196 : vector<2x1xf32> to vector<2x64xf32>
      %205 = arith.subf %190, %204 : vector<2x64xf32>
      %cst_80 = arith.constant 9.99999974E-6 : f32
      %206 = vector.broadcast %cst_80 : f32 to vector<2x1xf32>
      %207 = arith.addf %203, %206 : vector<2x1xf32>
      %208 = math.rsqrt %207 : vector<2x1xf32>
      %209 = vector.broadcast %208 : vector<2x1xf32> to vector<2x64xf32>
      %210 = arith.mulf %205, %209 : vector<2x64xf32>
      %211 = vector.broadcast %191 : vector<1x64xf32> to vector<2x64xf32>
      %212 = arith.mulf %210, %211 : vector<2x64xf32>
      %213 = vector.broadcast %192 : vector<1x64xf32> to vector<2x64xf32>
      %214 = arith.addf %212, %213 : vector<2x64xf32>
      %c0_81 = arith.constant 0 : index
      %c0_82 = arith.constant 0 : index
      %215 = vector.load %arg18[%c0_81, %c0_82] : memref<64x32xf32, #tpu.memory_space<vmem>>, vector<64x32xf32>
      %cst_83 = arith.constant dense<0.000000e+00> : vector<2x32xf32>
      %216 = tpu.matmul %214, %215, %cst_83 {dimension_numbers = #tpu.dot_dimension_numbers<[1], [0], [0], [1], [0, 0, 1, 1], [], []>} : vector<2x64xf32>, vector<64x32xf32>, vector<2x32xf32> -> vector<2x32xf32>
      %217 = arith.mulf %216, %216 : vector<2x32xf32>
      %cst_84 = arith.constant dense<0.000000e+00> : vector<2xf32>
      %218 = vector.multi_reduction <add>, %217, %cst_84 [1] : vector<2x32xf32> to vector<2xf32>
      %219 = vector.shape_cast %218 : vector<2xf32> to vector<2x1xf32>
      %220 = math.rsqrt %219 : vector<2x1xf32>
      %221 = vector.broadcast %220 : vector<2x1xf32> to vector<2x32xf32>
      %222 = arith.mulf %216, %221 : vector<2x32xf32>
      %c0_85 = arith.constant 0 : index
      %c0_86 = arith.constant 0 : index
      %c0_87 = arith.constant 0 : index
      %223 = vector.load %arg19[%c0_85, %c0_86, %c0_87] : memref<1x2x32xf32, #tpu.memory_space<vmem>>, vector<1x2x32xf32>
      %224 = vector.shape_cast %223 : vector<1x2x32xf32> to vector<2x32xf32>
      %225 = vector.shape_cast %222 : vector<2x32xf32> to vector<1x2x32xf32>
      tpu.vector_store %arg19[%c0_85, %c0_86, %c0_87], %225 {strides = array<i32>} : memref<1x2x32xf32, #tpu.memory_space<vmem>>, vector<1x2x32xf32>,
    } else {
    }
    return
  }
  func.func @transform_0(%arg0: i32, %arg1: i32) -> (i32, i32) {
    %c0_i32 = arith.constant 0 : i32
    %c0_i32_0 = arith.constant 0 : i32
    return %arg0, %c0_i32 : i32, i32
  }
  func.func @transform_1(%arg0: i32, %arg1: i32) -> (i32, i32) {
    %c0_i32 = arith.constant 0 : i32
    %c0_i32_0 = arith.constant 0 : i32
    %c0_i32_1 = arith.constant 0 : i32
    return %c0_i32, %c0_i32_0 : i32, i32
  }
  func.func @transform_2(%arg0: i32, %arg1: i32) -> (i32, i32) {
    %c0_i32 = arith.constant 0 : i32
    %c0_i32_0 = arith.constant 0 : i32
    %c0_i32_1 = arith.constant 0 : i32
    return %c0_i32, %c0_i32_0 : i32, i32
  }
  func.func @transform_3(%arg0: i32, %arg1: i32) -> (i32, i32) {
    %c0_i32 = arith.constant 0 : i32
    %c0_i32_0 = arith.constant 0 : i32
    %c0_i32_1 = arith.constant 0 : i32
    return %c0_i32, %c0_i32_0 : i32, i32
  }
  func.func @transform_4(%arg0: i32, %arg1: i32) -> (i32, i32) {
    %c0_i32 = arith.constant 0 : i32
    %c0_i32_0 = arith.constant 0 : i32
    %c0_i32_1 = arith.constant 0 : i32
    return %c0_i32, %c0_i32_0 : i32, i32
  }
  func.func @transform_5(%arg0: i32, %arg1: i32) -> (i32, i32) {
    %c0_i32 = arith.constant 0 : i32
    %c0_i32_0 = arith.constant 0 : i32
    %c0_i32_1 = arith.constant 0 : i32
    return %c0_i32, %c0_i32_0 : i32, i32
  }
  func.func @transform_6(%arg0: i32, %arg1: i32) -> (i32, i32, i32) {
    %c0_i32 = arith.constant 0 : i32
    %c0_i32_0 = arith.constant 0 : i32
    %c0_i32_1 = arith.constant 0 : i32
    return %arg1, %c0_i32, %c0_i32_0 : i32, i32, i32
  }
  func.func @transform_7(%arg0: i32, %arg1: i32) -> (i32, i32, i32) {
    %c0_i32 = arith.constant 0 : i32
    %c0_i32_0 = arith.constant 0 : i32
    %c0_i32_1 = arith.constant 0 : i32
    return %arg1, %c0_i32, %c0_i32_0 : i32, i32, i32
  }
  func.func @transform_8(%arg0: i32, %arg1: i32) -> (i32, i32, i32) {
    %c0_i32 = arith.constant 0 : i32
    %c0_i32_0 = arith.constant 0 : i32
    %c0_i32_1 = arith.constant 0 : i32
    return %arg1, %c0_i32, %c0_i32_0 : i32, i32, i32
  }
  func.func @transform_9(%arg0: i32, %arg1: i32) -> (i32, i32, i32) {
    %c0_i32 = arith.constant 0 : i32
    %c0_i32_0 = arith.constant 0 : i32
    %c0_i32_1 = arith.constant 0 : i32
    return %arg1, %c0_i32, %c0_i32_0 : i32, i32, i32
  }
  func.func @transform_10(%arg0: i32, %arg1: i32) -> (i32, i32, i32) {
    %c0_i32 = arith.constant 0 : i32
    %c0_i32_0 = arith.constant 0 : i32
    %c0_i32_1 = arith.constant 0 : i32
    return %arg1, %c0_i32, %c0_i32_0 : i32, i32, i32
  }
  func.func @transform_11(%arg0: i32, %arg1: i32) -> (i32, i32, i32) {
    %c0_i32 = arith.constant 0 : i32
    %c0_i32_0 = arith.constant 0 : i32
    %c0_i32_1 = arith.constant 0 : i32
    return %arg1, %c0_i32, %c0_i32_0 : i32, i32, i32
  }
  func.func @transform_12(%arg0: i32, %arg1: i32) -> (i32, i32, i32) {
    %c0_i32 = arith.constant 0 : i32
    %c0_i32_0 = arith.constant 0 : i32
    %c0_i32_1 = arith.constant 0 : i32
    return %arg1, %c0_i32, %c0_i32_0 : i32, i32, i32
  }
  func.func @transform_13(%arg0: i32, %arg1: i32) -> (i32, i32, i32) {
    %c0_i32 = arith.constant 0 : i32
    %c0_i32_0 = arith.constant 0 : i32
    %c0_i32_1 = arith.constant 0 : i32
    return %arg1, %c0_i32, %c0_i32_0 : i32, i32, i32
  }
  func.func @transform_14(%arg0: i32, %arg1: i32) -> (i32, i32) {
    %c0_i32 = arith.constant 0 : i32
    %c0_i32_0 = arith.constant 0 : i32
    %c0_i32_1 = arith.constant 0 : i32
    return %c0_i32, %c0_i32_0 : i32, i32
  }
  func.func @transform_15(%arg0: i32, %arg1: i32) -> (i32, i32) {
    %c0_i32 = arith.constant 0 : i32
    %c0_i32_0 = arith.constant 0 : i32
    %c0_i32_1 = arith.constant 0 : i32
    return %c0_i32, %c0_i32_0 : i32, i32
  }
  func.func @transform_16(%arg0: i32, %arg1: i32) -> (i32, i32) {
    %c0_i32 = arith.constant 0 : i32
    %c0_i32_0 = arith.constant 0 : i32
    %c0_i32_1 = arith.constant 0 : i32
    return %c0_i32, %c0_i32_0 : i32, i32
  }
  func.func @transform_17(%arg0: i32, %arg1: i32) -> (i32, i32, i32) {
    %c0_i32 = arith.constant 0 : i32
    %c0_i32_0 = arith.constant 0 : i32
    %c0_i32_1 = arith.constant 0 : i32
    return %arg0, %c0_i32, %c0_i32_0 : i32, i32, i32
  }
}

</mosaic_0001>

<bundles_post_ra>
// kernel: tpu_custom_call.1
= control target key start
LH: loop header
LB: loop body
LE: loop exit
PB: predicated region body
PF: predicated region fallthrough
CT: control target
= control target key end

     0   :  { %s5216_s0 = inlined_call_operand.vmem [shape: f32[48,192], index: 0, kind: input, shape index: {}]   ;;  %s5217_s1 = inlined_call_operand.vmem [shape: f32[192,64], index: 1, kind: input, shape index: {}]   ;;  %s5218_s2 = inlined_call_operand.vmem [shape: f32[1,64], index: 2, kind: input, shape index: {}]   ;;  %s5219_s3 = inlined_call_operand.vmem [shape: f32[48,64], index: 3, kind: input, shape index: {}]   ;;  %s5220_s4 = inlined_call_operand.vmem [shape: f32[1,64], index: 4, kind: input, shape index: {}]   ;;  %s5221_s5 = inlined_call_operand.vmem [shape: f32[1,64], index: 5, kind: input, shape index: {}]   ;;  %s5222_s6 = inlined_call_operand.vmem [shape: f32[2,9,64], index: 6, kind: input, shape index: {}]   ;;  %s5223_s7 = inlined_call_operand.vmem [shape: f32[2,64,64], index: 7, kind: input, shape index: {}]   ;;  %s5224_s8 = inlined_call_operand.vmem [shape: f32[2,64,64], index: 8, kind: input, shape index: {}]   ;;  %s5225_s9 = inlined_call_operand.vmem [shape: f32[2,64,64], index: 9, kind: input, shape index: {}]   ;;  %s5226_s10 = inlined_call_operand.vmem [shape: f32[2,64,64], index: 10, kind: input, shape index: {}]   ;;  %s5227_s11 = inlined_call_operand.vmem [shape: f32[2,64,256], index: 11, kind: input, shape index: {}]   ;;  %s5228_s12 = inlined_call_operand.vmem [shape: f32[2,1,256], index: 12, kind: input, shape index: {}]   ;;  %s5229_s13 = inlined_call_operand.vmem [shape: f32[2,256,64], index: 13, kind: input, shape index: {}]   ;;  %s5230_s14 = inlined_call_operand.vmem [shape: f32[1,64], index: 14, kind: input, shape index: {}]   ;;  %s5231_s15 = inlined_call_operand.vmem [shape: f32[1,64], index: 15, kind: input, shape index: {}]   ;;  %s5232_s16 = inlined_call_operand.vmem [shape: f32[64,32], index: 16, kind: input, shape index: {}]   ;;  %s5233_s17 = inlined_call_operand.hbm [shape: f32[1,2,32], index: 17, kind: output, shape index: {}]  }
   0x1   :  { %5238 = sst [smem:[#allocation9_spill]] %s5216_s0 }
   0x2   :  { %5239 = sst [smem:[#allocation10_spill]] %s5217_s1 }
   0x3   :  { %5240 = sst [smem:[#allocation11_spill]] %s5222_s6 }
   0x4   :  { %5241 = sst [smem:[#allocation12_spill]] %s5223_s7 }
   0x5   :  { %5242 = sst [smem:[#allocation13_spill]] %s5224_s8 }
   0x6   :  { %5243 = sst [smem:[#allocation14_spill]] %s5225_s9 }
   0x7   :  { %5244 = sst [smem:[#allocation15_spill]] %s5230_s14 }
   0x8   :  { %5245 = sst [smem:[#allocation16_spill]] %s5231_s15 }
   0x9   :  { %5246 = sst [smem:[#allocation17_spill]] %s5233_s17 }
   0xa   :  { %22 = vsyncpa [#allocation4], 0  ;;  %s4214_s24 = smov 0   ;;  %s4216_s25 = smov 0  }
   0xb   :  { %s4218_s26 = smov 0  }
   0xc LB: > { %5247 = sst [smem:[#allocation6_spill]] %s4110_s25  ;;  %s37_s28 = sadd.s32 1, %s4110_s25  ;;  %s4114_s26 = sphi %s4218_s26, %s28_s26   ;;  %s4110_s25 = sphi %s4216_s25, %s5264_s25   ;;  %s4106_s24 = sphi %s4214_s24, %s5263_s24  }
   0xd   : > { %5248 = sst [smem:[#allocation7_spill]] %s4114_s26  ;;  %p38_p0 = scmp.ge.s32.totalorder %s37_s28, 2 }
   0xe   : > { %p3349_p1 = scmp.ge.s32.totalorder %s4114_s26, 1  ;;  %p581_p2 = scmp.lt.s32.totalorder %s4114_s26, 3 }
   0xf   : > { %s5266_s28 = smov (%p38_p0, %s37_s28), 0 }
  0x10   : > { %5249 = sst [smem:[#allocation8_spill]] %s5266_s28  ;;  %p582_p3 = pnand %p3349_p1, %p581_p2 }
  0x11   : > { %p675_p4 = scmp.lt.s32.totalorder (!%p582_p3), %s4106_s24, 1  ;;  %s5250_s6 = sld [smem:[#allocation11_spill]] (!%p582_p3) }
  0x12   : > { %585 = sbr.rel (%p582_p3) target bundleno = 4292 (0x10c4), region = 88  ;;  %s5251_s7 = sld [smem:[#allocation12_spill]] (!%p582_p3) }
  0x13   : > { %s5252_s8 = sld [smem:[#allocation13_spill]] (!%p582_p3)  ;;  %p3365_p5 = scmp.ne.s32.totalorder (!%p582_p3), %s4106_s24, 0 }
  0x14   : > { %s5253_s9 = sld [smem:[#allocation14_spill]] (!%p582_p3) }
  0x17   : > { %s676_s29 = scalar_select %p675_p4, %s4106_s24, 1 }
  0x19   : > { %s3450_s0 = sshll.u32 %s676_s29, 4  ;;  %s3451_s30 = sshll.u32 %s676_s29, 6 }
  0x1a   : > { %s4240_s1 = scalar_lea.vmem %s5250_s6, %s3450_s0  ;;  %s4245_s22 = scalar_lea.vmem %s5251_s7, %s3451_s30 }
  0x1b   : > { %s4250_s28 = scalar_lea.vmem %s5252_s8, %s3451_s30  ;;  %s4255_s26 = scalar_lea.vmem %s5253_s9, %s3451_s30 }
  0x1c   : > { %s4260_s0 = scalar_lea.vmem %s5226_s10, %s3451_s30  ;;  %s3455_s18 = sshll.u32 %s676_s29, 7 }
  0x1d   : > { %s4265_s21 = scalar_lea.vmem %s5227_s11, %s3455_s18  ;;  %s3362_s6 = sshll.u32 %s676_s29, 1 }
  0x1e   : > { %s4270_s7 = scalar_lea.vmem %s5228_s12, %s3362_s6  ;;  %s3456_s17 = sshll.u32 %s676_s29, 8 }
  0x1f   : > { %s4275_s9 = scalar_lea.vmem %s5229_s13, %s3456_s17  ;;  %717 = sbr.rel (%p3365_p5) target bundleno = 606 (0x25e), region = 92 }
  0x20   : > { %s5254_s30 = sld [smem:[#allocation10_spill]] (!%p3365_p5) }
  0x21   : > { %s5255_s6 = sld [smem:[#allocation9_spill]] (!%p3365_p5) }
  0x24   : > { %v4116_v1 = vmov 0.0   ;;  %vm761_vm0 = vcmask 523264   ;;  %v3366_v37 = vld [vmem:[%s5218_s2] ss:$0 sm:$0xff]  ;;  %v878_v40 = vld [vmem:[%s5219_s3 + $0x18] sm:$0xff]  ;;  %v876_v50 = vld [vmem:[%s5219_s3 + $0x8] sm:$0xff] }
  0x25   : > { %780 = vmatprep.subr.mxu0 %v4116_v1  ;;  %3859 = vmatprep.subr.mxu1 %v4116_v1  ;;  %v875_v41 = vld [vmem:[%s5219_s3] sm:$0xff]  ;;  %v877_v62 = vld [vmem:[%s5219_s3 + $0x10] sm:$0xff]  ;;  %v880_v63 = vld [vmem:[%s5219_s3 + $0x28] sm:$0xff] }
  0x26   : > { %v745_v0 = vld [vmem:[%s5254_s30 + $0x78] sm:$0xff]  ;;  %v744_v2 = vld [vmem:[%s5254_s30 + $0x70] sm:$0xff]  ;;  %v743_v3 = vld [vmem:[%s5254_s30 + $0x68] sm:$0xff] }
  0x27   : > { %781 = vmatpush1.msra.mxu0 %v745_v0  ;;  %3883 = vmatpush1.msra.mxu1 %v745_v0  ;;  %v742_v4 = vld [vmem:[%s5254_s30 + $0x60] sm:$0xff]  ;;  %v741_v5 = vld [vmem:[%s5254_s30 + $0x58] sm:$0xff]  ;;  %v740_v6 = vld [vmem:[%s5254_s30 + $0x50] sm:$0xff] }
  0x28   : > { %782 = vmatprep.subr.mxu0 %v4116_v1  ;;  %3860 = vmatprep.subr.mxu1 %v4116_v1  ;;  %v739_v7 = vld [vmem:[%s5254_s30 + $0x48] sm:$0xff]  ;;  %v738_v8 = vld [vmem:[%s5254_s30 + $0x40] sm:$0xff]  ;;  %v737_v9 = vld [vmem:[%s5254_s30 + $0x38] sm:$0xff] }
  0x29   : > { %783 = vmatpush1.msra.mxu0 %v744_v2  ;;  %3884 = vmatpush1.msra.mxu1 %v744_v2  ;;  %v736_v10 = vld [vmem:[%s5254_s30 + $0x30] sm:$0xff]  ;;  %v735_v11 = vld [vmem:[%s5254_s30 + $0x28] sm:$0xff]  ;;  %v734_v12 = vld [vmem:[%s5254_s30 + $0x20] sm:$0xff] }
  0x2a   : > { %784 = vmatprep.subr.mxu0 %v4116_v1  ;;  %3861 = vmatprep.subr.mxu1 %v4116_v1  ;;  %v733_v13 = vld [vmem:[%s5254_s30 + $0x18] sm:$0xff]  ;;  %v732_v14 = vld [vmem:[%s5254_s30 + $0x10] sm:$0xff]  ;;  %v731_v15 = vld [vmem:[%s5254_s30 + $0x8] sm:$0xff] }
  0x2b   : > { %785 = vmatpush1.msra.mxu0 %v743_v3  ;;  %3885 = vmatpush1.msra.mxu1 %v743_v3  ;;  %v730_v16 = vld [vmem:[%s5254_s30] sm:$0xff]  ;;  %v753_v17 = vld [vmem:[%s5254_s30 + $0xb8] sm:$0xff]  ;;  %v752_v18 = vld [vmem:[%s5254_s30 + $0xb0] sm:$0xff] }
  0x2c   : > { %786 = vmatprep.subr.mxu0 %v4116_v1  ;;  %3862 = vmatprep.subr.mxu1 %v4116_v1  ;;  %v751_v19 = vld [vmem:[%s5254_s30 + $0xa8] sm:$0xff]  ;;  %v750_v20 = vld [vmem:[%s5254_s30 + $0xa0] sm:$0xff]  ;;  %v749_v21 = vld [vmem:[%s5254_s30 + $0x98] sm:$0xff] }
  0x2d   : > { %787 = vmatpush1.msra.mxu0 %v742_v4  ;;  %3886 = vmatpush1.msra.mxu1 %v742_v4  ;;  %v748_v22 = vld [vmem:[%s5254_s30 + $0x90] sm:$0xff]  ;;  %v747_v23 = vld [vmem:[%s5254_s30 + $0x88] sm:$0xff]  ;;  %v746_v24 = vld [vmem:[%s5254_s30 + $0x80] sm:$0xff] }
  0x2e   : > { %788 = vmatprep.subr.mxu0 %v4116_v1  ;;  %3863 = vmatprep.subr.mxu1 %v4116_v1  ;;  %v719_v25 = vld [vmem:[%s5255_s6 + $0x8] sm:$0xff]  ;;  %v725_v26 = vld [vmem:[%s5255_s6 + $0x38] sm:$0xff]  ;;  %v718_v27 = vld [vmem:[%s5255_s6] sm:$0xff] }
  0x2f   : > { %789 = vmatpush1.msra.mxu0 %v741_v5  ;;  %3887 = vmatpush1.msra.mxu1 %v741_v5  ;;  %v724_v28 = vld [vmem:[%s5255_s6 + $0x30] sm:$0xff]  ;;  %v721_v29 = vld [vmem:[%s5255_s6 + $0x18] sm:$0xff]  ;;  %v727_v30 = vld [vmem:[%s5255_s6 + $0x48] sm:$0xff] }
  0x30   : > { %790 = vmatprep.subr.mxu0 %v4116_v1  ;;  %3864 = vmatprep.subr.mxu1 %v4116_v1  ;;  %v720_v31 = vld [vmem:[%s5255_s6 + $0x10] sm:$0xff]  ;;  %v726_v32 = vld [vmem:[%s5255_s6 + $0x40] sm:$0xff]  ;;  %v723_v33 = vld [vmem:[%s5255_s6 + $0x28] sm:$0xff] }
  0x31   : > { %791 = vmatpush1.msra.mxu0 %v740_v6  ;;  %3888 = vmatpush1.msra.mxu1 %v740_v6  ;;  %v729_v34 = vld [vmem:[%s5255_s6 + $0x58] sm:$0xff]  ;;  %v722_v35 = vld [vmem:[%s5255_s6 + $0x20] sm:$0xff]  ;;  %v728_v36 = vld [vmem:[%s5255_s6 + $0x50] sm:$0xff] }
  0x32   : > { %792 = vmatprep.subr.mxu0 %v4116_v1  ;;  %3865 = vmatprep.subr.mxu1 %v4116_v1  ;;  %v879_v51 = vld [vmem:[%s5219_s3 + $0x20] sm:$0xff] }
  0x33   : > { %793 = vmatpush1.msra.mxu0 %v739_v7  ;;  %3889 = vmatpush1.msra.mxu1 %v739_v7 }
  0x34   : > { %794 = vmatprep.subr.mxu0 %v4116_v1  ;;  %3866 = vmatprep.subr.mxu1 %v4116_v1 }
  0x35   : > { %795 = vmatpush1.msra.mxu0 %v738_v8  ;;  %3890 = vmatpush1.msra.mxu1 %v738_v8 }
  0x36   : > { %796 = vmatprep.subr.mxu0 %v4116_v1  ;;  %3867 = vmatprep.subr.mxu1 %v4116_v1 }
  0x37   : > { %797 = vmatpush1.msra.mxu0 %v737_v9  ;;  %3891 = vmatpush1.msra.mxu1 %v737_v9 }
  0x38   : > { %798 = vmatprep.subr.mxu0 %v4116_v1  ;;  %3868 = vmatprep.subr.mxu1 %v4116_v1 }
  0x39   : > { %799 = vmatpush1.msra.mxu0 %v736_v10  ;;  %3892 = vmatpush1.msra.mxu1 %v736_v10 }
  0x3a   : > { %800 = vmatprep.subr.mxu0 %v4116_v1  ;;  %3869 = vmatprep.subr.mxu1 %v4116_v1 }
  0x3b   : > { %801 = vmatpush1.msra.mxu0 %v735_v11  ;;  %3893 = vmatpush1.msra.mxu1 %v735_v11 }
  0x3c   : > { %802 = vmatprep.subr.mxu0 %v4116_v1  ;;  %3870 = vmatprep.subr.mxu1 %v4116_v1 }
  0x3d   : > { %803 = vmatpush1.msra.mxu0 %v734_v12  ;;  %3894 = vmatpush1.msra.mxu1 %v734_v12 }
  0x3e   : > { %804 = vmatprep.subr.mxu0 %v4116_v1  ;;  %3871 = vmatprep.subr.mxu1 %v4116_v1 }
  0x3f   : > { %805 = vmatpush1.msra.mxu0 %v733_v13  ;;  %3895 = vmatpush1.msra.mxu1 %v733_v13 }
  0x40   : > { %806 = vmatprep.subr.mxu0 %v4116_v1  ;;  %3872 = vmatprep.subr.mxu1 %v4116_v1 }
  0x41   : > { %807 = vmatpush1.msra.mxu0 %v732_v14  ;;  %3896 = vmatpush1.msra.mxu1 %v732_v14 }
  0x42   : > { %808 = vmatprep.subr.mxu0 %v4116_v1  ;;  %3873 = vmatprep.subr.mxu1 %v4116_v1 }
  0x43   : > { %809 = vmatpush1.msra.mxu0 %v731_v15  ;;  %3897 = vmatpush1.msra.mxu1 %v731_v15 }
  0x44   : > { %810 = vmatprep.subr.mxu0 %v4116_v1  ;;  %3874 = vmatprep.subr.mxu1 %v4116_v1 }
  0x45   : > { %811 = vmatpush1.msra.mxu0 %v730_v16  ;;  %3898 = vmatpush1.msra.mxu1 %v730_v16 }
  0x46   : > { %828 = vmatprep.subr.mxu0 %v4116_v1  ;;  %3875 = vmatprep.subr.mxu1 %v4116_v1 }
  0x47   : > { %829 = vmatpush2.msra.mxu0 %v753_v17  ;;  %3899 = vmatpush2.msra.mxu1 %v753_v17 }
  0x48   : > { %830 = vmatprep.subr.mxu0 %v4116_v1  ;;  %3876 = vmatprep.subr.mxu1 %v4116_v1 }
  0x49   : > { %831 = vmatpush2.msra.mxu0 %v752_v18  ;;  %3900 = vmatpush2.msra.mxu1 %v752_v18 }
  0x4a   : > { %832 = vmatprep.subr.mxu0 %v4116_v1  ;;  %3877 = vmatprep.subr.mxu1 %v4116_v1 }
  0x4b   : > { %833 = vmatpush2.msra.mxu0 %v751_v19  ;;  %3901 = vmatpush2.msra.mxu1 %v751_v19 }
  0x4c   : > { %834 = vmatprep.subr.mxu0 %v4116_v1  ;;  %3878 = vmatprep.subr.mxu1 %v4116_v1 }
  0x4d   : > { %835 = vmatpush2.msra.mxu0 %v750_v20  ;;  %3902 = vmatpush2.msra.mxu1 %v750_v20 }
  0x4e   : > { %836 = vmatprep.subr.mxu0 %v4116_v1  ;;  %3879 = vmatprep.subr.mxu1 %v4116_v1 }
  0x4f   : > { %837 = vmatpush2.msra.mxu0 %v749_v21  ;;  %3903 = vmatpush2.msra.mxu1 %v749_v21 }
  0x50   : > { %838 = vmatprep.subr.mxu0 %v4116_v1  ;;  %3880 = vmatprep.subr.mxu1 %v4116_v1 }
  0x51   : > { %839 = vmatpush2.msra.mxu0 %v748_v22  ;;  %3904 = vmatpush2.msra.mxu1 %v748_v22 }
  0x52   : > { %840 = vmatprep.subr.mxu0 %v4116_v1  ;;  %3881 = vmatprep.subr.mxu1 %v4116_v1 }
  0x53   : > { %841 = vmatpush2.msra.mxu0 %v747_v23  ;;  %3905 = vmatpush2.msra.mxu1 %v747_v23 }
  0x54   : > { %842 = vmatprep.subr.mxu0 %v4116_v1  ;;  %3882 = vmatprep.subr.mxu1 %v4116_v1 }
  0x55   : > { %843 = vmatpush2.msra.mxu0 %v746_v24  ;;  %3906 = vmatpush2.msra.mxu1 %v746_v24 }
  0x56   : > { %3367 = vmatprep.mubr.msk.f32.mxu0 %vm761_vm0, %v719_v25  ;;  %3370 = vmatprep.mubr.msk.f32.mxu1 %vm761_vm0, %v725_v26 }
  0x57   : > { %845 = vmatmul.mubr.f32.vlgmr.msra.gmra.mxu0 %v718_v27  ;;  %860 = vmatmul.mubr.f32.vlgmr.msra.gmra.mxu1 %v724_v28 }
  0x58   : > { %3368 = vmatprep.mubr.msk.f32.mxu0 %vm761_vm0, %v721_v29  ;;  %3371 = vmatprep.mubr.msk.f32.mxu1 %vm761_vm0, %v727_v30 }
  0x5b   : > { %850 = vmatmul.mubr.f32.gmra.mxu0 %v720_v31  ;;  %865 = vmatmul.mubr.f32.gmra.mxu1 %v726_v32 }
  0x5c   : > { %3369 = vmatprep.mubr.msk.f32.mxu0 %vm761_vm0, %v723_v33  ;;  %3372 = vmatprep.mubr.msk.f32.mxu1 %vm761_vm0, %v729_v34 }
  0x5f   : > { %855 = vmatmul.mubr.f32.gmra.mxu0 %v722_v35  ;;  %870 = vmatmul.mubr.f32.gmra.mxu1 %v728_v36 }
 0x117   : > { %v846_v38 = vpop.f32.mrf.mxu0  ;;  %v861_v39 = vpop.f32.mrf.mxu1 }
 0x118   : > { %v847_v42 = vadd.f32 %v3366_v37, %v846_v38  ;;  %v862_v43 = vadd.f32 %v3366_v37, %v861_v39 }
 0x119   : > { %v848_v44 = vpop.f32.mrf.mxu0  ;;  %v863_v45 = vpop.f32.mrf.mxu1 }
 0x11a   : > { %v884_v46 = vadd.f32 %v878_v40, %v862_v43  ;;  %v881_v47 = vadd.f32 %v875_v41, %v847_v42 }
 0x11b   : > { %v851_v48 = vpop.f32.mrf.mxu0  ;;  %v866_v49 = vpop.f32.mrf.mxu1 }
 0x11c   : > { %v852_v52 = vadd.f32 %v3366_v37, %v851_v48  ;;  %v867_v53 = vadd.f32 %v3366_v37, %v866_v49  ;;  %v898_v54 = vsel %vm761_vm0, %v884_v46, 0.0  ;;  %v889_v55 = vsel %vm761_vm0, %v881_v47, 0.0 }
 0x11d   : > { %899 = vadd.xlane.f32.xlu1 %v898_v54  ;;  %v853_v56 = vpop.f32.mrf.mxu0  ;;  %890 = vadd.xlane.f32.xlu0 %v889_v55  ;;  %v868_v57 = vpop.f32.mrf.mxu1 }
 0x11e   : > { %v882_v58 = vadd.f32 %v876_v50, %v852_v52  ;;  %v885_v59 = vadd.f32 %v879_v51, %v867_v53 }
 0x11f   : > { %v856_v60 = vpop.f32.mrf.mxu0  ;;  %v871_v61 = vpop.f32.mrf.mxu1 }
 0x120   : > { %v857_v0 = vadd.f32 %v3366_v37, %v856_v60  ;;  %v872_v1 = vadd.f32 %v3366_v37, %v871_v61  ;;  %v892_v2 = vsel %vm761_vm0, %v882_v58, 0.0  ;;  %v901_v6 = vsel %vm761_vm0, %v885_v59, 0.0 }
 0x121   : > { %v858_v3 = vpop.f32.mrf.mxu0  ;;  %893 = vadd.xlane.f32.xlu0 %v892_v2  ;;  %v873_v4 = vpop.f32.mrf.mxu1 }
 0x122   : > { %v883_v5 = vadd.f32 %v877_v62, %v857_v0  ;;  %v886_v7 = vadd.f32 %v880_v63, %v872_v1  ;;  %v3374_v62 = vld [vmem:[%s5221_s5] ss:$0 sm:$0xff] }
 0x124   : > { %v895_v8 = vsel %vm761_vm0, %v883_v5, 0.0  ;;  %v904_v9 = vsel %vm761_vm0, %v886_v7, 0.0 }
 0x125   : > { %896 = vadd.xlane.f32.xlu1 %v895_v8  ;;  %902 = vadd.xlane.f32.xlu0 %v901_v6 }
 0x129   : > { %905 = vadd.xlane.f32.xlu1 %v904_v9 }
 0x1a6   : > { %v900_v10 = vpop.xlane.xlu1 %899  ;;  %v891_v11 = vpop.xlane.xlu0 %890 }
 0x1a7   : > { %v911_v12 = vmul.f32 0.015625, %v900_v10  ;;  %v908_v13 = vmul.f32 0.015625, %v891_v11 }
 0x1a9   : > { %v917_v14 = vsub.f32 %v884_v46, %v911_v12  ;;  %v914_v15 = vsub.f32 %v881_v47, %v908_v13 }
 0x1aa   : > { %v894_v16 = vpop.xlane.xlu0 %893 }
 0x1ab   : > { %v909_v17 = vmul.f32 0.015625, %v894_v16  ;;  %v923_v18 = vmul.f32 %v917_v14, %v917_v14  ;;  %v920_v19 = vmul.f32 %v914_v15, %v914_v15 }
 0x1ad   : > { %v915_v20 = vsub.f32 %v882_v58, %v909_v17  ;;  %v935_v21 = vsel %vm761_vm0, %v923_v18, 0.0  ;;  %v926_v22 = vsel %vm761_vm0, %v920_v19, 0.0 }
 0x1ae   : > { %936 = vadd.xlane.f32.xlu1 %v935_v21  ;;  %v897_v23 = vpop.xlane.xlu1 %896  ;;  %927 = vadd.xlane.f32.xlu0 %v926_v22  ;;  %v903_v24 = vpop.xlane.xlu0 %902 }
 0x1af   : > { %v910_v25 = vmul.f32 0.015625, %v897_v23  ;;  %v912_v26 = vmul.f32 0.015625, %v903_v24  ;;  %v921_v27 = vmul.f32 %v915_v20, %v915_v20 }
 0x1b1   : > { %v916_v28 = vsub.f32 %v883_v5, %v910_v25  ;;  %v4469_v29 = vsub.f32 %v885_v59, %v912_v26  ;;  %v929_v30 = vsel %vm761_vm0, %v921_v27, 0.0  ;;  %v3373_v59 = vld [vmem:[%s5220_s4] ss:$0 sm:$0xff] }
 0x1b2   : > { %v906_v31 = vpop.xlane.xlu1 %905  ;;  %930 = vadd.xlane.f32.xlu1 %v929_v30 }
 0x1b3   : > { %v913_v32 = vmul.f32 0.015625, %v906_v31  ;;  %v922_v33 = vmul.f32 %v916_v28, %v916_v28  ;;  %v924_v36 = vmul.f32 %v4469_v29, %v4469_v29 }
 0x1b5   : > { %v919_v34 = vsub.f32 %v886_v7, %v913_v32  ;;  %v932_v35 = vsel %vm761_vm0, %v922_v33, 0.0  ;;  %v938_v39 = vsel %vm761_vm0, %v924_v36, 0.0 }
 0x1b6   : > { %933 = vadd.xlane.f32.xlu0 %v932_v35 }
 0x1b7   : > { %v925_v37 = vmul.f32 %v919_v34, %v919_v34 }
 0x1b9   : > { %v941_v38 = vsel %vm761_vm0, %v925_v37, 0.0 }
 0x1ba   : > { %942 = vadd.xlane.f32.xlu1 %v941_v38  ;;  %939 = vadd.xlane.f32.xlu0 %v938_v39 }
 0x237   : > { %v937_v40 = vpop.xlane.xlu1 %936  ;;  %v928_v41 = vpop.xlane.xlu0 %927 }
 0x238   : > { %v947_v42 = vmul.f32 0.015625, %v937_v40  ;;  %v944_v43 = vmul.f32 0.015625, %v928_v41 }
 0x23a   : > { %v953_v44 = vadd.f32 1e-05, %v947_v42  ;;  %v950_v45 = vadd.f32 1e-05, %v944_v43 }
 0x23b   : > { %v931_v46 = vpop.xlane.xlu1 %930 }
 0x23c   : > { %3945 = vrsqrt.f32 %v953_v44  ;;  %v945_v47 = vmul.f32 0.015625, %v931_v46 }
 0x23d   : > { %3947 = vrsqrt.f32 %v950_v45 }
 0x23e   : > { %v951_v48 = vadd.f32 1e-05, %v945_v47 }
 0x23f   : > { %v934_v49 = vpop.xlane.xlu0 %933 }
 0x240   : > { %3949 = vrsqrt.f32 %v951_v48  ;;  %v946_v50 = vmul.f32 0.015625, %v934_v49 }
 0x242   : > { %v952_v51 = vadd.f32 1e-05, %v946_v50 }
 0x243   : > { %v943_v52 = vpop.xlane.xlu1 %942  ;;  %v940_v53 = vpop.xlane.xlu0 %939 }
 0x244   : > { %3951 = vrsqrt.f32 %v952_v51  ;;  %v949_v54 = vmul.f32 0.015625, %v943_v52  ;;  %v948_v55 = vmul.f32 0.015625, %v940_v53 }
 0x246   : > { %v955_v56 = vadd.f32 1e-05, %v949_v54  ;;  %v954_v57 = vadd.f32 1e-05, %v948_v55 }
 0x248   : > { %3953 = vrsqrt.f32 %v955_v56 }
 0x249   : > { %v3946_v58 = vpop.eup %3945  ;;  %3955 = vrsqrt.f32 %v954_v57 }
 0x24a   : > { %v3948_v60 = vpop.eup %3947  ;;  %v965_v61 = vmul.f32 %v3946_v58, %v917_v14 }
 0x24b   : > { %v962_v63 = vmul.f32 %v3948_v60, %v914_v15 }
 0x24c   : > { %v977_v0 = vmul.f32 %v3373_v59, %v965_v61 }
 0x24d   : > { %v3950_v1 = vpop.eup %3949  ;;  %v974_v2 = vmul.f32 %v3373_v59, %v962_v63 }
 0x24e   : > { %v989_v3 = vadd.f32 %v3374_v62, %v977_v0  ;;  %v963_v4 = vmul.f32 %v3950_v1, %v915_v20 }
 0x24f   : > { %v986_v5 = vadd.f32 %v3374_v62, %v974_v2 }
 0x250   : > { %995 = vst.msk [vmem:[#allocation2 + $0x18] sm:$0xff] %vm761_vm0, %v989_v3  ;;  %v975_v6 = vmul.f32 %v3373_v59, %v963_v4 }
 0x251   : > { %v3952_v7 = vpop.eup %3951  ;;  %992 = vst.msk [vmem:[#allocation2] sm:$0xff] %vm761_vm0, %v986_v5 }
 0x252   : > { %v987_v8 = vadd.f32 %v3374_v62, %v975_v6  ;;  %v964_v9 = vmul.f32 %v3952_v7, %v916_v28 }
 0x254   : > { %993 = vst.msk [vmem:[#allocation2 + $0x8] sm:$0xff] %vm761_vm0, %v987_v8  ;;  %v976_v10 = vmul.f32 %v3373_v59, %v964_v9 }
 0x255   : > { %v3954_v11 = vpop.eup %3953 }
 0x256   : > { %v3956_v12 = vpop.eup %3955  ;;  %v988_v13 = vadd.f32 %v3374_v62, %v976_v10  ;;  %v967_v14 = vmul.f32 %v3954_v11, %v919_v34 }
 0x257   : > { %v966_v15 = vmul.f32 %v3956_v12, %v4469_v29 }
 0x258   : > { %994 = vst.msk [vmem:[#allocation2 + $0x10] sm:$0xff] %vm761_vm0, %v988_v13  ;;  %v979_v16 = vmul.f32 %v3373_v59, %v967_v14 }
 0x259   : > { %v978_v17 = vmul.f32 %v3373_v59, %v966_v15 }
 0x25a   : > { %v991_v18 = vadd.f32 %v3374_v62, %v979_v16 }
 0x25b   : > { %v990_v19 = vadd.f32 %v3374_v62, %v978_v17 }
 0x25c   : > { %997 = vst.msk [vmem:[#allocation2 + $0x28] sm:$0xff] %vm761_vm0, %v991_v18 }
 0x25d   : > { %996 = vst.msk [vmem:[#allocation2 + $0x20] sm:$0xff] %vm761_vm0, %v990_v19 }
 0x25e PF: > { %v998_v20 = vld [vmem:[#allocation2] sm:$0xff]  ;;  %vm1006_vm1 = vcmask 523264   ;;  %v999_v22 = vld [vmem:[#allocation2 + $0x8] sm:$0xff]  ;;  %v1001_v25 = vld [vmem:[#allocation2 + $0x18] sm:$0xff]  ;;  %v1086_v11 = vlaneseq  ;;  %vm4118_vm2 = vmmov 0   ;;  %vm1448_vm3 = vcmask 261120  }
 0x25f   : > { %v1000_v21 = vld [vmem:[#allocation2 + $0x10] sm:$0xff]  ;;  %v1007_v23 = vsel %vm1006_vm1, %v998_v20, 0.0  ;;  %v1010_v26 = vsel %vm1006_vm1, %v999_v22, 0.0  ;;  %v1016_v27 = vsel %vm1006_vm1, %v1001_v25, 0.0  ;;  %v1113_v52 = vld [vmem:[%s4245_s22 + $0x38] sm:$0xff]  ;;  %v1111_v56 = vld [vmem:[%s4245_s22 + $0x28] sm:$0xff] }
 0x260   : > { %v1013_v24 = vsel %vm1006_vm1, %v1000_v21, 0.0  ;;  %1008 = vadd.xlane.f32.xlu0 %v1007_v23  ;;  %v1238_v53 = vld [vmem:[%s4250_s28 + $0x38] sm:$0xff]  ;;  %3620 = vmatprep.subr.mxu0 %v1113_v52  ;;  %v1112_v54 = vld [vmem:[%s4245_s22 + $0x30] sm:$0xff]  ;;  %v1236_v57 = vld [vmem:[%s4250_s28 + $0x28] sm:$0xff]  ;;  %v4539_v18 = vshrl.u32 %v1086_v11, 7  ;;  %vm1553_vm5 = vcmask 195584  }
 0x261   : > { %1014 = vadd.xlane.f32.xlu1 %v1013_v24  ;;  %3645 = vmatprep.subr.mxu1 %v1238_v53  ;;  %v1237_v55 = vld [vmem:[%s4250_s28 + $0x30] sm:$0xff]  ;;  %v1110_v58 = vld [vmem:[%s4245_s22 + $0x20] sm:$0xff]  ;;  %v1109_v60 = vld [vmem:[%s4245_s22 + $0x18] sm:$0xff]  ;;  %p3442_p6 = scmp.ne.s32.totalorder %s4106_s24, 1 }
 0x262   : > { %3621 = vmatpush3.msra.mxu0 %v1113_v52  ;;  %3646 = vmatpush3.msra.mxu1 %v1238_v53  ;;  %v1235_v59 = vld [vmem:[%s4250_s28 + $0x20] sm:$0xff]  ;;  %v1234_v61 = vld [vmem:[%s4250_s28 + $0x18] sm:$0xff]  ;;  %v1108_v62 = vld [vmem:[%s4245_s22 + $0x10] sm:$0xff]  ;;  %v1088_v24 = vsub.s32 0, %v4539_v18 }
 0x263   : > { %v4518_v50 = vld [vmem:[#allocation2 + $0x28] sm:$0xff]  ;;  %3622 = vmatprep.subr.mxu0 %v1112_v54  ;;  %3647 = vmatprep.subr.mxu1 %v1237_v55  ;;  %v1233_v63 = vld [vmem:[%s4250_s28 + $0x10] sm:$0xff]  ;;  %v1106_v2 = vld [vmem:[%s4245_s22] sm:$0xff] }
 0x264   : > { %1011 = vadd.xlane.f32.xlu0 %v1010_v26  ;;  %v4512_v46 = vld [vmem:[#allocation2 + $0x20] sm:$0xff]  ;;  %v1022_v51 = vsel %vm1006_vm1, %v4518_v50, 0.0  ;;  %3623 = vmatpush3.msra.mxu0 %v1112_v54  ;;  %v1107_v0 = vld [vmem:[%s4245_s22 + $0x8] sm:$0xff]  ;;  %v1341_v53 = vld [vmem:[%s4255_s26 + $0x18] sm:$0xff] }
 0x265   : > { %1017 = vadd.xlane.f32.xlu1 %v1016_v27  ;;  %v1019_v48 = vsel %vm1006_vm1, %v4512_v46, 0.0  ;;  %3648 = vmatpush3.msra.mxu1 %v1237_v55  ;;  %v1232_v1 = vld [vmem:[%s4250_s28 + $0x8] sm:$0xff]  ;;  %v1231_v3 = vld [vmem:[%s4250_s28] sm:$0xff]  ;;  %v1340_v54 = vld [vmem:[%s4255_s26 + $0x10] sm:$0xff]  ;;  %s4120_s28 = smov 32  }
 0x266   : > { %3624 = vmatprep.subr.mxu0 %v1111_v56  ;;  %3649 = vmatprep.subr.mxu1 %v1236_v57  ;;  %v1342_v52 = vld [vmem:[%s4255_s26 + $0x20] sm:$0xff]  ;;  %v1339_v55 = vld [vmem:[%s4255_s26 + $0x8] sm:$0xff] }
 0x267   : > { %3625 = vmatpush3.msra.mxu0 %v1111_v56  ;;  %3650 = vmatpush3.msra.mxu1 %v1236_v57  ;;  %v1338_v56 = vld [vmem:[%s4255_s26] sm:$0xff]  ;;  %v4117_v57 = vmov 0.0  }
 0x268   : > { %3626 = vmatprep.subr.mxu0 %v1110_v58  ;;  %3651 = vmatprep.subr.mxu1 %v1235_v59 }
 0x269   : > { %3627 = vmatpush3.msra.mxu0 %v1110_v58  ;;  %3652 = vmatpush3.msra.mxu1 %v1235_v59 }
 0x26a   : > { %3628 = vmatprep.subr.mxu0 %v1109_v60  ;;  %3653 = vmatprep.subr.mxu1 %v1234_v61 }
 0x26b   : > { %3629 = vmatpush3.msra.mxu0 %v1109_v60  ;;  %3654 = vmatpush3.msra.mxu1 %v1234_v61 }
 0x26c   : > { %3630 = vmatprep.subr.mxu0 %v1108_v62  ;;  %3655 = vmatprep.subr.mxu1 %v1233_v63 }
 0x26d   : > { %3631 = vmatpush3.msra.mxu0 %v1108_v62  ;;  %3656 = vmatpush3.msra.mxu1 %v1233_v63 }
 0x26e   : > { %3632 = vmatprep.subr.mxu0 %v1107_v0  ;;  %3657 = vmatprep.subr.mxu1 %v1232_v1 }
 0x26f   : > { %3633 = vmatpush3.msra.mxu0 %v1107_v0  ;;  %3658 = vmatpush3.msra.mxu1 %v1232_v1 }
 0x270   : > { %3634 = vmatprep.subr.mxu0 %v1106_v2  ;;  %3659 = vmatprep.subr.mxu1 %v1231_v3 }
 0x271   : > { %3635 = vmatpush3.msra.mxu0 %v1106_v2  ;;  %3660 = vmatpush3.msra.mxu1 %v1231_v3 }
 0x272   : > { %3695 = vmatprep.subr.mxu1 %v4117_v57 }
 0x2e9   : > { %v1009_v28 = vpop.xlane.xlu0 %1008 }
 0x2ea   : > { %v1015_v29 = vpop.xlane.xlu1 %1014  ;;  %v1026_v30 = vmul.f32 0.015625, %v1009_v28  ;;  %v1098_v28 = vsub.s32 1, %v4539_v18 }
 0x2eb   : > { %v1028_v31 = vmul.f32 0.015625, %v1015_v29 }
 0x2ec   : > { %v4494_v32 = vsub.f32 %v998_v20, %v1026_v30 }
 0x2ed   : > { %v4496_v33 = vsub.f32 %v1000_v21, %v1028_v31  ;;  %v1012_v34 = vpop.xlane.xlu0 %1011 }
 0x2ee   : > { %v1018_v35 = vpop.xlane.xlu1 %1017  ;;  %v1027_v36 = vmul.f32 0.015625, %v1012_v34  ;;  %v1038_v38 = vmul.f32 %v4494_v32, %v4494_v32 }
 0x2ef   : > { %v1029_v37 = vmul.f32 0.015625, %v1018_v35  ;;  %v1040_v39 = vmul.f32 %v4496_v33, %v4496_v33 }
 0x2f0   : > { %v4502_v40 = vsub.f32 %v999_v22, %v1027_v36  ;;  %v1044_v42 = vsel %vm1006_vm1, %v1038_v38, 0.0 }
 0x2f1   : > { %v4504_v41 = vsub.f32 %v1001_v25, %v1029_v37  ;;  %1045 = vadd.xlane.f32.xlu0 %v1044_v42  ;;  %v1050_v43 = vsel %vm1006_vm1, %v1040_v39, 0.0  ;;  %v4548_v25 = vld [vmem:[%s4240_s1] sm:$0xff] }
 0x2f2   : > { %v1039_v44 = vmul.f32 %v4502_v40, %v4502_v40  ;;  %v4560_v30 = vrot.slane %v4548_v25, %v1088_v24  ;;  %v4567_v36 = vrot.slane %v4548_v25, %v1098_v28 }
 0x2f3   : > { %v1041_v45 = vmul.f32 %v4504_v41, %v4504_v41 }
 0x2f4   : > { %v1047_v47 = vsel %vm1006_vm1, %v1039_v44, 0.0 }
 0x2f5   : > { %1051 = vadd.xlane.f32.xlu0 %v1050_v43  ;;  %1048 = vadd.xlane.f32.xlu1 %v1047_v47  ;;  %v1053_v49 = vsel %vm1006_vm1, %v1041_v45, 0.0 }
 0x2f9   : > { %1020 = vadd.xlane.f32.xlu0 %v1019_v48  ;;  %1054 = vadd.xlane.f32.xlu1 %v1053_v49 }
 0x2fd   : > { %1023 = vadd.xlane.f32.xlu1 %v1022_v51  ;;  %v1343_v51 = vld [vmem:[%s4255_s26 + $0x28] sm:$0xff] }
 0x37a   : > { %v1046_v4 = vpop.xlane.xlu0 %1045 }
 0x37b   : > { %v1062_v5 = vmul.f32 0.015625, %v1046_v4 }
 0x37d   : > { %v1068_v6 = vadd.f32 1e-05, %v1062_v5 }
 0x37e   : > { %v1049_v7 = vpop.xlane.xlu1 %1048  ;;  %v1052_v8 = vpop.xlane.xlu0 %1051 }
 0x37f   : > { %3957 = vrsqrt.f32 %v1068_v6  ;;  %v1063_v9 = vmul.f32 0.015625, %v1049_v7  ;;  %v1064_v10 = vmul.f32 0.015625, %v1052_v8 }
 0x381   : > { %v1069_v12 = vadd.f32 1e-05, %v1063_v9  ;;  %v1070_v13 = vadd.f32 1e-05, %v1064_v10  ;;  %v1241_v9 = vsub.s32 3, %v4539_v18 }
 0x382   : > { %v1055_v14 = vpop.xlane.xlu1 %1054  ;;  %v1021_v15 = vpop.xlane.xlu0 %1020 }
 0x383   : > { %3959 = vrsqrt.f32 %v1069_v12  ;;  %v1065_v16 = vmul.f32 0.015625, %v1055_v14  ;;  %v1030_v17 = vmul.f32 0.015625, %v1021_v15 }
 0x384   : > { %3961 = vrsqrt.f32 %v1070_v13  ;;  %v1242_v13 = vrot.slane %v4548_v25, %v1241_v9 }
 0x385   : > { %v1071_v19 = vadd.f32 1e-05, %v1065_v16  ;;  %v4542_v20 = vsub.f32 %v4512_v46, %v1030_v17 }
 0x386   : > { %v1024_v21 = vpop.xlane.xlu1 %1023 }
 0x387   : > { %3963 = vrsqrt.f32 %v1071_v19  ;;  %v1031_v22 = vmul.f32 0.015625, %v1024_v21  ;;  %v1042_v23 = vmul.f32 %v4542_v20, %v4542_v20  ;;  %v1116_v19 = vsub.s32 2, %v4539_v18 }
 0x389   : > { %v4551_v26 = vsub.f32 %v4518_v50, %v1031_v22  ;;  %v1056_v27 = vsel %vm1006_vm1, %v1042_v23, 0.0  ;;  %v1344_v50 = vld [vmem:[%s4255_s26 + $0x30] sm:$0xff]  ;;  %v1117_v22 = vrot.slane %v4548_v25, %v1116_v19 }
 0x38a   : > { %1057 = vadd.xlane.f32.xlu0 %v1056_v27 }
 0x38b   : > { %v1043_v29 = vmul.f32 %v4551_v26, %v4551_v26 }
 0x38c   : > { %v3958_v31 = vpop.eup %3957 }
 0x38d   : > { %v1059_v34 = vsel %vm1006_vm1, %v1043_v29, 0.0  ;;  %v1080_v35 = vmul.f32 %v3958_v31, %v4494_v32 }
 0x38e   : > { %1060 = vadd.xlane.f32.xlu1 %v1059_v34 }
 0x38f   : > { %v1090_v37 = vmul.f32 %v4560_v30, %v1080_v35 }
 0x390   : > { %v3960_v38 = vpop.eup %3959 }
 0x391   : > { %v3962_v39 = vpop.eup %3961  ;;  %v4571_v42 = vadd.f32 %v4567_v36, %v1090_v37  ;;  %v1081_v43 = vmul.f32 %v3960_v38, %v4502_v40  ;;  %v1348_v38 = vsub.s32 4, %v4539_v18 }
 0x392   : > { %v1082_v44 = vmul.f32 %v3962_v39, %v4496_v33 }
 0x393   : > { %3636 = vmatprep.mubr.msk.f32.mxu0 %vm1006_vm1, %v4571_v42  ;;  %3661 = vmatprep.mubr.msk.f32.mxu1 %vm1006_vm1, %v4571_v42  ;;  %v1091_v32 = vmul.f32 %v4560_v30, %v1081_v43 }
 0x394   : > { %v3964_v45 = vpop.eup %3963  ;;  %v1092_v46 = vmul.f32 %v4560_v30, %v1082_v44  ;;  %v4669_v44 = vrot.slane %v4548_v25, %v1348_v38 }
 0x395   : > { %v1101_v47 = vadd.f32 %v4567_v36, %v1091_v32  ;;  %v1083_v40 = vmul.f32 %v3964_v45, %v4504_v41  ;;  %v1345_v41 = vld [vmem:[%s4255_s26 + $0x38] sm:$0xff]  ;;  %s4119_s26 = smov 96  }
 0x396   : > { %v1102_v33 = vadd.f32 %v4567_v36, %v1092_v46  ;;  %3670 = vmatprep.subr.mxu0 %v1345_v41 }
 0x397   : > { %3637 = vmatmul.mubr.msk.f32.vlgmr.msra.gmra.mxu0 %vm1006_vm1, %v1101_v47  ;;  %3662 = vmatmul.mubr.msk.f32.vlgmr.msra.gmra.mxu1 %vm1006_vm1, %v1101_v47  ;;  %v1093_v48 = vmul.f32 %v4560_v30, %v1083_v40 }
 0x398   : > { %3639 = vmatprep.mubr.msk.f32.mxu0 %vm1006_vm1, %v1102_v33  ;;  %3664 = vmatprep.mubr.msk.f32.mxu1 %vm1006_vm1, %v1102_v33 }
 0x399   : > { %v1103_v49 = vadd.f32 %v4567_v36, %v1093_v48  ;;  %3671 = vmatpush3.msra.mxu0 %v1345_v41 }
 0x39a   : > { %3672 = vmatprep.subr.mxu0 %v1344_v50 }
 0x39b   : > { %3640 = vmatmul.mubr.msk.f32.gmra.mxu0 %vm1006_vm1, %v1103_v49  ;;  %3665 = vmatmul.mubr.msk.f32.gmra.mxu1 %vm1006_vm1, %v1103_v49 }
 0x39c   : > { %3673 = vmatpush3.msra.mxu0 %v1344_v50 }
 0x39d   : > { %3674 = vmatprep.subr.mxu0 %v1343_v51 }
 0x39e   : > { %3675 = vmatpush3.msra.mxu0 %v1343_v51 }
 0x39f   : > { %3676 = vmatprep.subr.mxu0 %v1342_v52 }
 0x3a0   : > { %3677 = vmatpush3.msra.mxu0 %v1342_v52  ;;  %v4716_v52 = vand.u32 127, %v1086_v11 }
 0x3a1   : > { %3678 = vmatprep.subr.mxu0 %v1341_v53 }
 0x3a2   : > { %3679 = vmatpush3.msra.mxu0 %v1341_v53  ;;  %vm1447_vm4 = vcmp.lt.s32.totalorder %v4716_v52, 17 }
 0x3a3   : > { %3680 = vmatprep.subr.mxu0 %v1340_v54 }
 0x3a4   : > { %3681 = vmatpush3.msra.mxu0 %v1340_v54 }
 0x3a5   : > { %3682 = vmatprep.subr.mxu0 %v1339_v55 }
 0x3a6   : > { %3683 = vmatpush3.msra.mxu0 %v1339_v55 }
 0x3a7   : > { %3684 = vmatprep.subr.mxu0 %v1338_v56 }
 0x3a8   : > { %3685 = vmatpush3.msra.mxu0 %v1338_v56 }
 0x3a9   : > { %3755 = vmatprep.subr.mxu0 %v4117_v57 }
 0x413   : > { %v1058_v58 = vpop.xlane.xlu0 %1057 }
 0x414   : > { %v1066_v59 = vmul.f32 0.015625, %v1058_v58 }
 0x416   : > { %v1072_v60 = vadd.f32 1e-05, %v1066_v59 }
 0x417   : > { %v1061_v61 = vpop.xlane.xlu1 %1060 }
 0x418   : > { %3965 = vrsqrt.f32 %v1072_v60  ;;  %v1067_v62 = vmul.f32 0.015625, %v1061_v61 }
 0x41a   : > { %v1073_v63 = vadd.f32 1e-05, %v1067_v62 }
 0x41c   : > { %3967 = vrsqrt.f32 %v1073_v63 }
 0x425   : > { %v3966_v0 = vpop.eup %3965 }
 0x426   : > { %v1084_v1 = vmul.f32 %v3966_v0, %v4542_v20 }
 0x428   : > { %v1094_v2 = vmul.f32 %v4560_v30, %v1084_v1 }
 0x429   : > { %v3968_v3 = vpop.eup %3967 }
 0x42a   : > { %v1104_v4 = vadd.f32 %v4567_v36, %v1094_v2  ;;  %v1085_v5 = vmul.f32 %v3968_v3, %v4551_v26 }
 0x42c   : > { %3642 = vmatprep.mubr.msk.f32.mxu0 %vm1006_vm1, %v1104_v4  ;;  %3667 = vmatprep.mubr.msk.f32.mxu1 %vm1006_vm1, %v1104_v4  ;;  %v1095_v6 = vmul.f32 %v4560_v30, %v1085_v5 }
 0x42e   : > { %v1105_v7 = vadd.f32 %v4567_v36, %v1095_v6 }
 0x430   : > { %3643 = vmatmul.mubr.msk.f32.gmra.mxu0 %vm1006_vm1, %v1105_v7  ;;  %3668 = vmatmul.mubr.msk.f32.gmra.mxu1 %vm1006_vm1, %v1105_v7 }
 0x431   : > { %3686 = vmatprep.mubr.msk.f32.mxu0 %vm1006_vm1, %v4571_v42  ;;  %3701 = vmatprep.mubr.msk.f32.mxu1 %vm4118_vm2, %v4117_v57 }
 0x434   : > { %3687 = vmatmul.mubr.msk.f32.vlgmr.msra.gmra.mxu0 %vm1006_vm1, %v1101_v47 }
 0x435   : > { %3689 = vmatprep.mubr.msk.f32.mxu0 %vm1006_vm1, %v1102_v33 }
 0x438   : > { %3690 = vmatmul.mubr.msk.f32.gmra.mxu0 %vm1006_vm1, %v1103_v49 }
 0x439   : > { %3692 = vmatprep.mubr.msk.f32.mxu0 %vm1006_vm1, %v1104_v4 }
 0x43c   : > { %3693 = vmatmul.mubr.msk.f32.gmra.mxu0 %vm1006_vm1, %v1105_v7 }
 0x43d   : > { %3761 = vmatprep.mubr.msk.f32.mxu0 %vm4118_vm2, %v4117_v57 }
 0x457   : > { %v3663_v8 = vpop.f32.mrf.mxu1  ;;  %v3638_v16 = vpop.f32.mrf.mxu0 }
 0x458   : > { %v4630_v17 = vadd.f32 %v3663_v8, %v1242_v13  ;;  %v4648_v27 = vadd.f32 %v3638_v16, %v1117_v22 }
 0x459   : > { %v1309_v10 = vpop.f32.mrf.mxu1  ;;  %v1202_v20 = vpop.f32.mrf.mxu0 }
 0x45a   : > { %v4636_v21 = vadd.f32 %v1309_v10, %v1242_v13  ;;  %v4641_v23 = vadd.f32 %v1202_v20, %v1117_v22 }
 0x45b   : > { %v3666_v12 = vpop.f32.mrf.mxu1  ;;  %v3641_v26 = vpop.f32.mrf.mxu0 }
 0x45c   : > { %v4674_v45 = vadd.f32 %v3666_v12, %v1242_v13  ;;  %v4684_v25 = vadd.f32 %v3641_v26, %v1117_v22 }
 0x45d   : > { %v1319_v14 = vpop.f32.mrf.mxu1  ;;  %v1212_v29 = vpop.f32.mrf.mxu0 }
 0x45e   : > { %v4625_v15 = vadd.f32 %v1319_v14, %v1242_v13  ;;  %v4654_v30 = vadd.f32 %v1212_v29, %v1117_v22 }
 0x460   : > { %3696 = vmatpush3.xpose.msk.msra.mxu1 %vm1448_vm3, %v4625_v15 }
 0x461   : > { %3697 = vmatprep.subr.mxu1 %v4117_v57 }
 0x464   : > { %3698 = vmatpush3.xpose.msk.msra.mxu1 %vm1448_vm3, %v4630_v17 }
 0x465   : > { %3699 = vmatprep.subr.mxu1 %v4117_v57 }
 0x468   : > { %3700 = vmatpush3.xpose.msk.msra.mxu1 %vm1448_vm3, %v4636_v21 }
 0x469   : > { %3710 = vmatprep.subr.mxu1 %v4117_v57 }
 0x46b   : > { %3702 = vmatmul.mubr.msk.f32.vlgmr.msra.gmra.mxu1 %vm1448_vm3, %v4641_v23 }
 0x46c   : > { %3704 = vmatprep.mubr.msk.f32.mxu1 %vm4118_vm2, %v4117_v57 }
 0x46f   : > { %3705 = vmatmul.mubr.msk.f32.gmra.mxu1 %vm1448_vm3, %v4648_v27 }
 0x470   : > { %3707 = vmatprep.mubr.msk.f32.mxu1 %vm4118_vm2, %v4117_v57 }
 0x473   : > { %3708 = vmatmul.mubr.msk.f32.gmra.mxu1 %vm1448_vm3, %v4654_v30 }
 0x474   : > { %3716 = vmatprep.mubr.msk.f32.mxu1 %vm4118_vm2, %v4117_v57 }
 0x4f0   : > { %v3644_v31 = vpop.f32.mrf.mxu0  ;;  %v3669_v34 = vpop.f32.mrf.mxu1 }
 0x4f1   : > { %v4660_v35 = vadd.f32 %v3669_v34, %v1242_v13  ;;  %v4709_v51 = vadd.f32 %v3644_v31, %v1117_v22 }
 0x4f2   : > { %v1222_v36 = vpop.f32.mrf.mxu0  ;;  %v1329_v37 = vpop.f32.mrf.mxu1 }
 0x4f3   : > { %3756 = vmatpush3.xpose.msk.msra.mxu0 %vm1448_vm3, %v4660_v35  ;;  %v4666_v42 = vadd.f32 %v1329_v37, %v1242_v13  ;;  %v1223_v50 = vadd.f32 %v1222_v36, %v1117_v22 }
 0x4f4   : > { %v3688_v39 = vpop.f32.mrf.mxu0  ;;  %3757 = vmatprep.subr.mxu0 %v4117_v57 }
 0x4f5   : > { %v4688_v48 = vadd.f32 %v3688_v39, %v4669_v44 }
 0x4f6   : > { %v1416_v43 = vpop.f32.mrf.mxu0 }
 0x4f7   : > { %3758 = vmatpush3.xpose.msk.msra.mxu0 %vm1448_vm3, %v4666_v42  ;;  %v4698_v41 = vadd.f32 %v1416_v43, %v4669_v44 }
 0x4f8   : > { %v3691_v32 = vpop.f32.mrf.mxu0  ;;  %3759 = vmatprep.subr.mxu0 %v4117_v57 }
 0x4f9   : > { %v4677_v46 = vadd.f32 %v3691_v32, %v4669_v44 }
 0x4fa   : > { %v1426_v47 = vpop.f32.mrf.mxu0 }
 0x4fb   : > { %v4680_v40 = vadd.f32 %v1426_v47, %v4669_v44  ;;  %3760 = vmatpush3.xpose.msk.msra.mxu0 %vm1448_vm3, %v4674_v45 }
 0x4fc   : > { %v3694_v33 = vpop.f32.mrf.mxu0  ;;  %3785 = vmatprep.subr.mxu0 %v4117_v57 }
 0x4fd   : > { %v4691_v49 = vadd.f32 %v3694_v33, %v4669_v44  ;;  %3711 = vmatpush3.msra.mxu1 %v4680_v40 }
 0x4fe   : > { %3712 = vmatprep.subr.mxu1 %v4117_v57  ;;  %3762 = vmatmul.mubr.msk.f32.vlgmr.msra.gmra.mxu0 %vm1448_vm3, %v4684_v25  ;;  %v4728_v6 = vpop.f32.mrf.mxu0 }
 0x4ff   : > { %3713 = vmatpush3.msra.mxu1 %v4688_v48  ;;  %3764 = vmatprep.mubr.msk.f32.mxu0 %vm4118_vm2, %v4117_v57 }
 0x500   : > { %3714 = vmatprep.subr.mxu1 %v4117_v57 }
 0x501   : > { %3715 = vmatpush3.msra.mxu1 %v4698_v41 }
 0x502   : > { %3765 = vmatmul.mubr.msk.f32.gmra.mxu0 %vm1448_vm3, %v1223_v50  ;;  %3725 = vmatprep.subr.mxu1 %v4117_v57 }
 0x503   : > { %3767 = vmatprep.mubr.msk.f32.mxu0 %vm4118_vm2, %v4117_v57 }
 0x506   : > { %3768 = vmatmul.mubr.msk.f32.gmra.mxu0 %vm1448_vm3, %v4709_v51 }
 0x507   : > { %3791 = vmatprep.mubr.msk.f32.mxu0 %vm4118_vm2, %v4117_v57 }
 0x52b   : > { %v1533_v53 = vpop.f32.mrf.mxu1 }
 0x52c   : > { %v1547_v54 = vmul.f32 0.17677669, %v1533_v53 }
 0x52d   : > { %v3703_v55 = vpop.f32.mrf.mxu1 }
 0x52e   : > { %v1550_v56 = vsel %vm1447_vm4, %v1547_v54, -1e+30 }
 0x52f   : > { %v1538_v58 = vpop.f32.mrf.mxu1  ;;  %v1554_v59 = vsel %vm1553_vm5, %v1550_v56, -inf }
 0x530   : > { %v1548_v60 = vmul.f32 0.17677669, %v1538_v58  ;;  %1555 = vmax.xlane.f32.xlu0 %v1554_v59 }
 0x531   : > { %v3706_v61 = vpop.f32.mrf.mxu1 }
 0x532   : > { %v1551_v62 = vsel %vm1447_vm4, %v1548_v60, -1e+30 }
 0x533   : > { %v1543_v11 = vpop.f32.mrf.mxu1  ;;  %v1557_v63 = vsel %vm1553_vm5, %v1551_v62, -inf }
 0x534   : > { %v1549_v0 = vmul.f32 0.17677669, %v1543_v11  ;;  %1558 = vmax.xlane.f32.xlu1 %v1557_v63 }
 0x535   : > { %v3709_v1 = vpop.f32.mrf.mxu1 }
 0x536   : > { %v1552_v2 = vsel %vm1447_vm4, %v1549_v0, -1e+30 }
 0x537   : > { %v1560_v3 = vsel %vm1553_vm5, %v1552_v2, -inf }
 0x538   : > { %1561 = vmax.xlane.f32.xlu0 %v1560_v3 }
 0x5b9   : > { %v1556_v4 = vpop.xlane.xlu0 %1555 }
 0x5ba   : > { %v1563_v5 = vsub.f32 %v1550_v56, %v1556_v4 }
 0x5bc   : > { %v1566_v7 = vmul.f32 1.442695, %v1563_v5 }
 0x5bd   : > { %v1559_v8 = vpop.xlane.xlu1 %1558 }
 0x5be   : > { %3969 = vpow2.f32 %v1566_v7  ;;  %v1564_v9 = vsub.f32 %v1551_v62, %v1559_v8  ;;  %v4730_v10 = vpop.f32.mrf.mxu0 }
 0x5c0   : > { %v1568_v12 = vmul.f32 1.442695, %v1564_v9  ;;  %v3763_v13 = vpop.f32.mrf.mxu0 }
 0x5c1   : > { %v1562_v34 = vpop.xlane.xlu0 %1561 }
 0x5c2   : > { %3971 = vpow2.f32 %v1568_v12  ;;  %v4732_v14 = vpop.f32.mrf.mxu0  ;;  %v1565_v36 = vsub.f32 %v1552_v2, %v1562_v34 }
 0x5c4   : > { %v3766_v16 = vpop.f32.mrf.mxu0  ;;  %v1570_v37 = vmul.f32 1.442695, %v1565_v36 }
 0x5c6   : > { %v4734_v19 = vpop.f32.mrf.mxu0  ;;  %3973 = vpow2.f32 %v1570_v37 }
 0x5c7   : > { %v2035_v12 = vmul.f32 0.17677669, %v4734_v19 }
 0x5c8   : > { %v3769_v20 = vpop.f32.mrf.mxu0 }
 0x5c9   : > { %v2038_v19 = vsel %vm1447_vm4, %v2035_v12, -1e+30 }
 0x5cb   : > { %v3970_v22 = vpop.eup %3969 }
 0x5cc   : > { %v1572_v26 = vsel %vm1553_vm5, %v3970_v22, 0.0 }
 0x5cd   : > { %1573 = vadd.xlane.f32.xlu1 %v1572_v26 }
 0x5cf   : > { %v3972_v29 = vpop.eup %3971 }
 0x5d0   : > { %v1575_v31 = vsel %vm1553_vm5, %v3972_v29, 0.0 }
 0x5d1   : > { %1576 = vadd.xlane.f32.xlu0 %v1575_v31 }
 0x5de   : > { %1684 = vrot.lane.b32.xlu1 %v4630_v17, %s4119_s26  ;;  %v3974_v17 = vpop.eup %3973 }
 0x5e2   : > { %1682 = vrot.lane.b32.xlu1 %v4636_v21, %s4119_s26  ;;  %v1578_v21 = vsel %vm1553_vm5, %v3974_v17, 0.0 }
 0x5e7   : > { %1686 = vrot.lane.b32.xlu0 %v4625_v15, %s4119_s26 }
 0x5eb   : > { %1678 = vrot.lane.b32.xlu0 %v4648_v27, %s4119_s26 }
 0x5ef   : > { %2171 = vrot.lane.b32.xlu0 %v4660_v35, %s4119_s26 }
 0x5f3   : > { %2167 = vrot.lane.b32.xlu0 %v4674_v45, %s4119_s26 }
 0x5f7   : > { %2163 = vrot.lane.b32.xlu0 %v1223_v50, %s4119_s26 }
 0x606   : > { %1579 = vadd.xlane.f32.xlu1 %v1578_v21 }
 0x617   : > { %1676 = vrot.lane.b32.xlu1 %v4641_v23, %s4119_s26 }
 0x61b   : > { %1680 = vrot.lane.b32.xlu1 %v4654_v30, %s4119_s26 }
 0x61f   : > { %2169 = vrot.lane.b32.xlu1 %v4666_v42, %s4119_s26 }
 0x623   : > { %2161 = vrot.lane.b32.xlu1 %v4684_v25, %s4119_s26 }
 0x627   : > { %2165 = vrot.lane.b32.xlu1 %v4709_v51, %s4119_s26 }
 0x656   : > { %v1574_v15 = vpop.xlane.xlu1 %1573 }
 0x657   : > { %3975 = vrcp.f32 %v1574_v15 }
 0x65a   : > { %v1577_v27 = vpop.xlane.xlu0 %1576  ;;  %v1685_v42 = vpop.permute.xlu1 %1684 }
 0x65b   : > { %3977 = vrcp.f32 %v1577_v27 }
 0x65e   : > { %v1687_v35 = vpop.permute.xlu0 %1686  ;;  %v1683_v45 = vpop.permute.xlu1 %1682 }
 0x662   : > { %v1679_v38 = vpop.permute.xlu0 %1678 }
 0x664   : > { %v3976_v39 = vpop.eup %3975 }
 0x665   : > { %v1582_v23 = vmul.f32 %v3976_v39, %v3970_v22 }
 0x666   : > { %v2172_v43 = vpop.permute.xlu0 %2171 }
 0x667   : > { %3717 = vmatmul.mubr.msk.f32.vlgmr.msra.gmra.mxu1 %vm1553_vm5, %v1582_v23  ;;  %3786 = vmatpush3.xpose.msk.msra.mxu0 %vm1448_vm3, %v2172_v43 }
 0x668   : > { %v3978_v30 = vpop.eup %3977  ;;  %3726 = vmatpush3.xpose.msk.msra.mxu1 %vm1448_vm3, %v1687_v35  ;;  %3719 = vmatprep.mubr.msk.f32.mxu1 %vm4118_vm2, %v4117_v57  ;;  %v2034_v35 = vmul.f32 0.17677669, %v4732_v14 }
 0x669   : > { %3727 = vmatprep.subr.mxu1 %v4117_v57  ;;  %v1584_v32 = vmul.f32 %v3978_v30, %v3972_v29  ;;  %3787 = vmatprep.subr.mxu0 %v4117_v57  ;;  %v2033_v29 = vmul.f32 0.17677669, %v4730_v10  ;;  %v2045_v10 = vsel %vm1553_vm5, %v2038_v19, -inf }
 0x66a   : > { %v2168_v54 = vpop.permute.xlu0 %2167  ;;  %v2037_v14 = vsel %vm1447_vm4, %v2034_v35, -1e+30 }
 0x66b   : > { %3720 = vmatmul.mubr.msk.f32.gmra.mxu1 %vm1553_vm5, %v1584_v32 }
 0x66c   : > { %3728 = vmatpush3.xpose.msk.msra.mxu1 %vm1448_vm3, %v1685_v42  ;;  %3722 = vmatprep.mubr.msk.f32.mxu1 %vm4118_vm2, %v4117_v57  ;;  %v2042_v42 = vsel %vm1553_vm5, %v2037_v14, -inf }
 0x66d   : > { %3729 = vmatprep.subr.mxu1 %v4117_v57 }
 0x66e   : > { %v2164_v56 = vpop.permute.xlu0 %2163 }
 0x670   : > { %3730 = vmatpush3.xpose.msk.msra.mxu1 %vm1448_vm3, %v1683_v45 }
 0x671   : > { %3740 = vmatprep.subr.mxu1 %v4117_v57 }
 0x68f   : > { %v1580_v47 = vpop.xlane.xlu1 %1579 }
 0x690   : > { %3979 = vrcp.f32 %v1580_v47 }
 0x693   : > { %v1677_v25 = vpop.permute.xlu1 %1676 }
 0x697   : > { %v1681_v33 = vpop.permute.xlu1 %1680 }
 0x69b   : > { %v2170_v50 = vpop.permute.xlu1 %2169 }
 0x69c   : > { %3788 = vmatpush3.xpose.msk.msra.mxu0 %vm1448_vm3, %v2170_v50 }
 0x69d   : > { %v3980_v51 = vpop.eup %3979  ;;  %3789 = vmatprep.subr.mxu0 %v4117_v57 }
 0x69e   : > { %v1586_v53 = vmul.f32 %v3980_v51, %v3974_v17 }
 0x69f   : > { %v2162_v55 = vpop.permute.xlu1 %2161 }
 0x6a0   : > { %3723 = vmatmul.mubr.msk.f32.gmra.mxu1 %vm1553_vm5, %v1586_v53  ;;  %3790 = vmatpush3.xpose.msk.msra.mxu0 %vm1448_vm3, %v2168_v54 }
 0x6a1   : > { %3731 = vmatprep.mubr.msk.f32.mxu1 %vm4118_vm2, %v4117_v57 }
 0x6a3   : > { %3792 = vmatmul.mubr.msk.f32.vlgmr.msra.gmra.mxu0 %vm1448_vm3, %v2162_v55  ;;  %v2166_v58 = vpop.permute.xlu1 %2165 }
 0x6a4   : > { %3732 = vmatmul.mubr.msk.f32.vlgmr.msra.gmra.mxu1 %vm1448_vm3, %v1677_v25  ;;  %3794 = vmatprep.mubr.msk.f32.mxu0 %vm4118_vm2, %v4117_v57 }
 0x6a5   : > { %3734 = vmatprep.mubr.msk.f32.mxu1 %vm4118_vm2, %v4117_v57 }
 0x6a7   : > { %3795 = vmatmul.mubr.msk.f32.gmra.mxu0 %vm1448_vm3, %v2164_v56 }
 0x6a8   : > { %3735 = vmatmul.mubr.msk.f32.gmra.mxu1 %vm1448_vm3, %v1679_v38  ;;  %3797 = vmatprep.mubr.msk.f32.mxu0 %vm4118_vm2, %v4117_v57  ;;  %v2036_v38 = vsel %vm1447_vm4, %v2033_v29, -1e+30 }
 0x6a9   : > { %3737 = vmatprep.mubr.msk.f32.mxu1 %vm4118_vm2, %v4117_v57  ;;  %v2039_v23 = vsel %vm1553_vm5, %v2036_v38, -inf }
 0x6ab   : > { %3798 = vmatmul.mubr.msk.f32.gmra.mxu0 %vm1448_vm3, %v2166_v58 }
 0x6ac   : > { %3738 = vmatmul.mubr.msk.f32.gmra.mxu1 %vm1448_vm3, %v1681_v33 }
 0x6ad   : > { %3746 = vmatprep.mubr.msk.f32.mxu1 %vm4118_vm2, %v4117_v57 }
 0x727   : > { %v4798_v59 = vpop.f32.mrf.mxu1 }
 0x729   : > { %v3718_v60 = vpop.f32.mrf.mxu1 }
 0x72b   : > { %v4800_v61 = vpop.f32.mrf.mxu1 }
 0x72d   : > { %v3721_v62 = vpop.f32.mrf.mxu1 }
 0x760   : > { %v4802_v11 = vpop.f32.mrf.mxu1 }
 0x762   : > { %v3724_v63 = vpop.f32.mrf.mxu1 }
 0x763   : > { %v2251_v0 = vpop.f32.mrf.mxu0 }
 0x764   : > { %v1766_v1 = vpop.f32.mrf.mxu1  ;;  %v2265_v30 = vmul.f32 0.17677669, %v2251_v0 }
 0x765   : > { %v1780_v2 = vmul.f32 0.17677669, %v1766_v1  ;;  %v3793_v3 = vpop.f32.mrf.mxu0 }
 0x766   : > { %v3733_v4 = vpop.f32.mrf.mxu1  ;;  %v2268_v45 = vsel %vm1447_vm4, %v2265_v30, -1e+30 }
 0x767   : > { %v2256_v5 = vpop.f32.mrf.mxu0  ;;  %v4806_v7 = vsel %vm1447_vm4, %v1780_v2, -1e+30  ;;  %v2271_v47 = vsel %vm1553_vm5, %v2268_v45, -inf }
 0x768   : > { %v1771_v8 = vpop.f32.mrf.mxu1  ;;  %v1786_v9 = vsel %vm1553_vm5, %v4806_v7, -inf  ;;  %v2266_v36 = vmul.f32 0.17677669, %v2256_v5 }
 0x769   : > { %v1781_v13 = vmul.f32 0.17677669, %v1771_v8  ;;  %1787 = vmax.xlane.f32.xlu0 %v1786_v9  ;;  %v3796_v16 = vpop.f32.mrf.mxu0 }
 0x76a   : > { %v3736_v20 = vpop.f32.mrf.mxu1  ;;  %v4829_v39 = vsel %vm1447_vm4, %v2266_v36, -1e+30 }
 0x76b   : > { %v2261_v22 = vpop.f32.mrf.mxu0  ;;  %v1784_v26 = vsel %vm1447_vm4, %v1781_v13, -1e+30  ;;  %v2274_v43 = vsel %vm1553_vm5, %v4829_v39, -inf }
 0x76c   : > { %v1776_v31 = vpop.f32.mrf.mxu1  ;;  %v1789_v34 = vsel %vm1553_vm5, %v1784_v26, -inf  ;;  %v2267_v32 = vmul.f32 0.17677669, %v2261_v22 }
 0x76d   : > { %v1782_v37 = vmul.f32 0.17677669, %v1776_v31  ;;  %1790 = vmax.xlane.f32.xlu1 %v1789_v34  ;;  %v3799_v17 = vpop.f32.mrf.mxu0 }
 0x76e   : > { %v3739_v21 = vpop.f32.mrf.mxu1  ;;  %v2270_v25 = vsel %vm1447_vm4, %v2267_v32, -1e+30 }
 0x76f   : > { %v4819_v15 = vsel %vm1447_vm4, %v1782_v37, -1e+30  ;;  %v2277_v33 = vsel %vm1553_vm5, %v2270_v25, -inf }
 0x770   : > { %v1792_v27 = vsel %vm1553_vm5, %v4819_v15, -inf }
 0x771   : > { %1793 = vmax.xlane.f32.xlu0 %v1792_v27  ;;  %2046 = vmax.xlane.f32.xlu1 %v2045_v10 }
 0x775   : > { %2040 = vmax.xlane.f32.xlu0 %v2039_v23  ;;  %2275 = vmax.xlane.f32.xlu1 %v2274_v43 }
 0x779   : > { %2043 = vmax.xlane.f32.xlu0 %v2042_v42 }
 0x77d   : > { %2272 = vmax.xlane.f32.xlu0 %v2271_v47 }
 0x781   : > { %2278 = vmax.xlane.f32.xlu0 %v2277_v33 }
 0x7f2   : > { %v1788_v50 = vpop.xlane.xlu0 %1787 }
 0x7f3   : > { %v1795_v34 = vsub.f32 %v4806_v7, %v1788_v50 }
 0x7f5   : > { %v1798_v36 = vmul.f32 1.442695, %v1795_v34  ;;  %v2422_v34 = vld [vmem:[%s4260_s0 + $0x10] sm:$0xff] }
 0x7f6   : > { %v1791_v51 = vpop.xlane.xlu1 %1790 }
 0x7f7   : > { %v1796_v1 = vsub.f32 %v1784_v26, %v1791_v51 }
 0x7f9   : > { %v1800_v4 = vmul.f32 1.442695, %v1796_v1 }
 0x7fa   : > { %v1794_v53 = vpop.xlane.xlu0 %1793  ;;  %v2047_v54 = vpop.xlane.xlu1 %2046 }
 0x7fb   : > { %v2050_v55 = vsub.f32 %v2038_v19, %v2047_v54  ;;  %v1797_v7 = vsub.f32 %v4819_v15, %v1794_v53 }
 0x7fd   : > { %v2055_v60 = vmul.f32 1.442695, %v2050_v55 }
 0x7fe   : > { %v2041_v56 = vpop.xlane.xlu0 %2040  ;;  %v2276_v35 = vpop.xlane.xlu1 %2275 }
 0x7ff   : > { %v2048_v58 = vsub.f32 %v2036_v38, %v2041_v56  ;;  %v1802_v38 = vmul.f32 1.442695, %v1797_v7  ;;  %v2281_v23 = vsub.f32 %v4829_v39, %v2276_v35 }
 0x801   : > { %v2051_v62 = vmul.f32 1.442695, %v2048_v58  ;;  %v2285_v43 = vmul.f32 1.442695, %v2281_v23 }
 0x802   : > { %v2044_v63 = vpop.xlane.xlu0 %2043 }
 0x803   : > { %3981 = vpow2.f32 %v2051_v62  ;;  %v2049_v0 = vsub.f32 %v2037_v14, %v2044_v63 }
 0x804   : > { %3983 = vpow2.f32 %v2055_v60 }
 0x805   : > { %v2053_v2 = vmul.f32 1.442695, %v2049_v0 }
 0x806   : > { %v2273_v52 = vpop.xlane.xlu0 %2272 }
 0x807   : > { %3985 = vpow2.f32 %v2053_v2  ;;  %v2280_v3 = vsub.f32 %v2268_v45, %v2273_v52 }
 0x809   : > { %v2283_v5 = vmul.f32 1.442695, %v2280_v3 }
 0x80a   : > { %v2279_v37 = vpop.xlane.xlu0 %2278 }
 0x80b   : > { %3987 = vpow2.f32 %v2283_v5  ;;  %v2282_v17 = vsub.f32 %v2270_v25, %v2279_v37  ;;  %v2420_v37 = vld [vmem:[%s4260_s0] sm:$0xff] }
 0x80c   : > { %3989 = vpow2.f32 %v1800_v4 }
 0x80d   : > { %3991 = vpow2.f32 %v1798_v36  ;;  %v2287_v19 = vmul.f32 1.442695, %v2282_v17  ;;  %v2421_v36 = vld [vmem:[%s4260_s0 + $0x8] sm:$0xff] }
 0x80f   : > { %3993 = vpow2.f32 %v2287_v19 }
 0x810   : > { %v4843_v8 = vpop.eup %3981  ;;  %3995 = vpow2.f32 %v1802_v38 }
 0x811   : > { %v2057_v9 = vsel %vm1553_vm5, %v4843_v8, 0.0  ;;  %v4847_v12 = vpop.eup %3983  ;;  %3997 = vpow2.f32 %v2285_v43 }
 0x812   : > { %2058 = vadd.xlane.f32.xlu0 %v2057_v9  ;;  %v2063_v20 = vsel %vm1553_vm5, %v4847_v12, 0.0 }
 0x814   : > { %v4849_v13 = vpop.eup %3985 }
 0x815   : > { %v2060_v16 = vsel %vm1553_vm5, %v4849_v13, 0.0 }
 0x816   : > { %2061 = vadd.xlane.f32.xlu1 %v2060_v16  ;;  %2064 = vadd.xlane.f32.xlu0 %v2063_v20  ;;  %v2427_v20 = vld [vmem:[%s4260_s0 + $0x38] sm:$0xff] }
 0x817   : > { %3815 = vmatprep.subr.mxu0 %v2427_v20 }
 0x818   : > { %v4855_v22 = vpop.eup %3987  ;;  %3816 = vmatpush3.msra.mxu0 %v2427_v20 }
 0x819   : > { %v2289_v26 = vsel %vm1553_vm5, %v4855_v22, 0.0  ;;  %v3990_v29 = vpop.eup %3989 }
 0x81a   : > { %2290 = vadd.xlane.f32.xlu0 %v2289_v26  ;;  %v1807_v31 = vsel %vm1553_vm5, %v3990_v29, 0.0  ;;  %v3992_v21 = vpop.eup %3991  ;;  %v2425_v26 = vld [vmem:[%s4260_s0 + $0x28] sm:$0xff] }
 0x81b   : > { %v1804_v27 = vsel %vm1553_vm5, %v3992_v21, 0.0 }
 0x81c   : > { %v4866_v10 = vpop.eup %3993 }
 0x81d   : > { %v3996_v30 = vpop.eup %3995 }
 0x81e   : > { %1808 = vadd.xlane.f32.xlu0 %v1807_v31  ;;  %v1810_v14 = vsel %vm1553_vm5, %v3996_v30, 0.0  ;;  %v4878_v42 = vpop.eup %3997  ;;  %v2423_v31 = vld [vmem:[%s4260_s0 + $0x18] sm:$0xff] }
 0x827   : > { %1826 = vrot.lane.b32.xlu1 %v4680_v40, %s4119_s26  ;;  %v2295_v40 = vsel %vm1553_vm5, %v4866_v10, 0.0 }
 0x834   : > { %1824 = vrot.lane.b32.xlu0 %v4688_v48, %s4119_s26  ;;  %v1437_v48 = vadd.f32 %v4728_v6, %v4669_v44  ;;  %v2292_v44 = vsel %vm1553_vm5, %v4878_v42, 0.0 }
 0x84b   : > { %1805 = vadd.xlane.f32.xlu1 %v1804_v27 }
 0x853   : > { %2296 = vadd.xlane.f32.xlu0 %v2295_v40 }
 0x85c   : > { %1822 = vrot.lane.b32.xlu1 %v4698_v41, %s4119_s26 }
 0x869   : > { %2309 = vrot.lane.b32.xlu0 %v1437_v48, %s4119_s26 }
 0x880   : > { %1811 = vadd.xlane.f32.xlu1 %v1810_v14 }
 0x884   : > { %2293 = vadd.xlane.f32.xlu1 %v2292_v44 }
 0x895   : > { %2311 = vrot.lane.b32.xlu1 %v4691_v49, %s4119_s26 }
 0x899   : > { %2307 = vrot.lane.b32.xlu1 %v4677_v46, %s4119_s26  ;;  %s5256_s26 = sld [smem:[#allocation15_spill]] (!%p3442_p6) }
 0x89b   : > { %v2059_v41 = vpop.xlane.xlu0 %2058 }
 0x89f   : > { %v2062_v6 = vpop.xlane.xlu1 %2061  ;;  %v2065_v15 = vpop.xlane.xlu0 %2064 }
 0x8a3   : > { %v1827_v39 = vpop.permute.xlu1 %1826  ;;  %v2291_v32 = vpop.xlane.xlu0 %2290 }
 0x8a4   : > { %3741 = vmatpush3.msra.mxu1 %v1827_v39 }
 0x8a5   : > { %3742 = vmatprep.subr.mxu1 %v4117_v57 }
 0x8a7   : > { %v1809_v45 = vpop.xlane.xlu0 %1808 }
 0x8ab   : > { %v1825_v47 = vpop.permute.xlu0 %1824 }
 0x8ac   : > { %3743 = vmatpush3.msra.mxu1 %v1825_v47 }
 0x8ad   : > { %3744 = vmatprep.subr.mxu1 %v4117_v57 }
 0x8d4   : > { %v1806_v25 = vpop.xlane.xlu1 %1805 }
 0x8d5   : > { %3999 = vrcp.f32 %v1806_v25 }
 0x8d6   : > { %4001 = vrcp.f32 %v1809_v45 }
 0x8d8   : > { %v1823_v33 = vpop.permute.xlu1 %1822 }
 0x8d9   : > { %3745 = vmatpush3.msra.mxu1 %v1823_v33 }
 0x8da   : > { %3770 = vmatprep.subr.mxu1 %v4117_v57 }
 0x8dc   : > { %v2297_v62 = vpop.xlane.xlu0 %2296 }
 0x8e0   : > { %v2310_v1 = vpop.permute.xlu0 %2309 }
 0x8e2   : > { %v4000_v50 = vpop.eup %3999 }
 0x8e3   : > { %v1814_v51 = vmul.f32 %v4000_v50, %v3992_v21  ;;  %v4002_v53 = vpop.eup %4001 }
 0x8e4   : > { %v1816_v54 = vmul.f32 %v4002_v53, %v3990_v29  ;;  %v2424_v29 = vld [vmem:[%s4260_s0 + $0x20] sm:$0xff] }
 0x8e5   : > { %3747 = vmatmul.mubr.msk.f32.vlgmr.msra.gmra.mxu1 %vm1553_vm5, %v1814_v51 }
 0x8e6   : > { %3771 = vmatpush3.msra.mxu1 %v4691_v49  ;;  %3749 = vmatprep.mubr.msk.f32.mxu1 %vm4118_vm2, %v4117_v57 }
 0x8e7   : > { %3772 = vmatprep.subr.mxu1 %v4117_v57 }
 0x8e8   : > { %3773 = vmatpush3.msra.mxu1 %v1437_v48 }
 0x8e9   : > { %3774 = vmatprep.subr.mxu1 %v4117_v57  ;;  %3750 = vmatmul.mubr.msk.f32.gmra.mxu1 %vm1553_vm5, %v1816_v54  ;;  %v2549_v54 = vsub.s32 5, %v4539_v18 }
 0x8ea   : > { %3775 = vmatpush3.msra.mxu1 %v4677_v46  ;;  %3752 = vmatprep.mubr.msk.f32.mxu1 %vm4118_vm2, %v4117_v57 }
 0x8eb   : > { %3800 = vmatprep.subr.mxu1 %v4117_v57 }
 0x909   : > { %v1812_v55 = vpop.xlane.xlu1 %1811 }
 0x90a   : > { %4003 = vrcp.f32 %v1812_v55 }
 0x90b   : > { %4005 = vrcp.f32 %v2059_v41 }
 0x90c   : > { %4007 = vrcp.f32 %v2062_v6 }
 0x90d   : > { %4009 = vrcp.f32 %v2065_v15  ;;  %v2294_v49 = vpop.xlane.xlu1 %2293 }
 0x90e   : > { %4011 = vrcp.f32 %v2291_v32 }
 0x90f   : > { %4013 = vrcp.f32 %v2294_v49 }
 0x910   : > { %4015 = vrcp.f32 %v2297_v62 }
 0x911   : > { %v2312_v63 = vpop.permute.xlu1 %2311 }
 0x915   : > { %v2308_v3 = vpop.permute.xlu1 %2307 }
 0x917   : > { %v4004_v56 = vpop.eup %4003 }
 0x918   : > { %v1818_v58 = vmul.f32 %v4004_v56, %v3996_v30  ;;  %v4006_v60 = vpop.eup %4005  ;;  %v4054_v56 = vld [vmem:[#allocation2 + $0x8] sm:$0xff] }
 0x919   : > { %v2067_v46 = vmul.f32 %v4006_v60, %v4843_v8  ;;  %v4008_v0 = vpop.eup %4007 }
 0x91a   : > { %3753 = vmatmul.mubr.msk.f32.gmra.mxu1 %vm1553_vm5, %v1818_v58  ;;  %v2069_v2 = vmul.f32 %v4008_v0, %v4849_v13  ;;  %v4010_v52 = vpop.eup %4009 }
 0x91b   : > { %3776 = vmatprep.mubr.msk.f32.mxu1 %vm4118_vm2, %v4117_v57  ;;  %v2071_v4 = vmul.f32 %v4010_v52, %v4847_v12  ;;  %v4012_v5 = vpop.eup %4011 }
 0x91c   : > { %v2299_v8 = vmul.f32 %v4012_v5, %v4855_v22  ;;  %v4014_v9 = vpop.eup %4013  ;;  %v2426_v22 = vld [vmem:[%s4260_s0 + $0x30] sm:$0xff] }
 0x91d   : > { %v2301_v13 = vmul.f32 %v4014_v9, %v4878_v42  ;;  %v4016_v12 = vpop.eup %4015  ;;  %3817 = vmatprep.subr.mxu0 %v2426_v22 }
 0x91e   : > { %3777 = vmatmul.mubr.msk.f32.vlgmr.msra.gmra.mxu1 %vm1553_vm5, %v2067_v46  ;;  %v2303_v16 = vmul.f32 %v4016_v12, %v4866_v10  ;;  %3818 = vmatpush3.msra.mxu0 %v2426_v22  ;;  %v4055_v46 = vld [vmem:[#allocation2] sm:$0xff]  ;;  %v4058_v22 = vld [vmem:[#allocation2 + $0x28] sm:$0xff] }
 0x91f   : > { %3801 = vmatpush3.msra.mxu1 %v2312_v63  ;;  %3779 = vmatprep.mubr.msk.f32.mxu1 %vm4118_vm2, %v4117_v57 }
 0x920   : > { %3802 = vmatprep.subr.mxu1 %v4117_v57  ;;  %3819 = vmatprep.subr.mxu0 %v2425_v26 }
 0x921   : > { %3803 = vmatpush3.msra.mxu1 %v2310_v1  ;;  %3820 = vmatpush3.msra.mxu0 %v2425_v26 }
 0x922   : > { %3804 = vmatprep.subr.mxu1 %v4117_v57  ;;  %3780 = vmatmul.mubr.msk.f32.gmra.mxu1 %vm1553_vm5, %v2069_v2 }
 0x923   : > { %3805 = vmatpush3.msra.mxu1 %v2308_v3  ;;  %3782 = vmatprep.mubr.msk.f32.mxu1 %vm4118_vm2, %v4117_v57 }
 0x924   : > { %3821 = vmatprep.subr.mxu0 %v2424_v29 }
 0x925   : > { %3822 = vmatpush3.msra.mxu0 %v2424_v29 }
 0x926   : > { %3783 = vmatmul.mubr.msk.f32.gmra.mxu1 %vm1553_vm5, %v2071_v4  ;;  %3823 = vmatprep.subr.mxu0 %v2423_v31  ;;  %v4056_v4 = vld [vmem:[#allocation2 + $0x18] sm:$0xff] }
 0x927   : > { %3806 = vmatprep.mubr.msk.f32.mxu1 %vm4118_vm2, %v4117_v57  ;;  %3824 = vmatpush3.msra.mxu0 %v2423_v31 }
 0x928   : > { %3825 = vmatprep.subr.mxu0 %v2422_v34 }
 0x929   : > { %3826 = vmatpush3.msra.mxu0 %v2422_v34  ;;  %v4059_v34 = vld [vmem:[#allocation2 + $0x20] sm:$0xff] }
 0x92a   : > { %3807 = vmatmul.mubr.msk.f32.vlgmr.msra.gmra.mxu1 %vm1553_vm5, %v2299_v8  ;;  %3827 = vmatprep.subr.mxu0 %v2421_v36  ;;  %v4057_v8 = vld [vmem:[#allocation2 + $0x10] sm:$0xff] }
 0x92b   : > { %3809 = vmatprep.mubr.msk.f32.mxu1 %vm4118_vm2, %v4117_v57  ;;  %3828 = vmatpush3.msra.mxu0 %v2421_v36 }
 0x92c   : > { %3829 = vmatprep.subr.mxu0 %v2420_v37 }
 0x92d   : > { %3830 = vmatpush3.msra.mxu0 %v2420_v37 }
 0x92e   : > { %3810 = vmatmul.mubr.msk.f32.gmra.mxu1 %vm1553_vm5, %v2301_v13 }
 0x92f   : > { %3812 = vmatprep.mubr.msk.f32.mxu1 %vm4118_vm2, %v4117_v57 }
 0x932   : > { %3813 = vmatmul.mubr.msk.f32.gmra.mxu1 %vm1553_vm5, %v2303_v16 }
 0x933   : > { %2765 = vmatprep.mubr.f32.mxu1 %v4117_v57 }
 0x9a5   : > { %v1906_v17 = vpop.f32.mrf.mxu1 }
 0x9a6   : > { %1923 = vrot.lane.b32.xlu1 %v1906_v17, %s4120_s28 }
 0x9a7   : > { %v3748_v19 = vpop.f32.mrf.mxu1 }
 0x9a9   : > { %v1911_v21 = vpop.f32.mrf.mxu1 }
 0x9aa   : > { %1925 = vrot.lane.b32.xlu1 %v1911_v21, %s4120_s28 }
 0x9ab   : > { %v3751_v27 = vpop.f32.mrf.mxu1 }
 0x9da   : > { %v1916_v10 = vpop.f32.mrf.mxu1 }
 0x9db   : > { %1927 = vrot.lane.b32.xlu0 %v1916_v10, %s4120_s28 }
 0x9dc   : > { %v3754_v40 = vpop.f32.mrf.mxu1 }
 0x9de   : > { %v2147_v48 = vpop.f32.mrf.mxu1 }
 0x9e0   : > { %v3778_v7 = vpop.f32.mrf.mxu1 }
 0x9e2   : > { %v2152_v35 = vpop.f32.mrf.mxu1 }
 0x9e4   : > { %v3781_v38 = vpop.f32.mrf.mxu1 }
 0x9e6   : > { %v2157_v23 = vpop.f32.mrf.mxu1 }
 0x9e8   : > { %v3784_v43 = vpop.f32.mrf.mxu1 }
 0x9ea   : > { %v2391_v30 = vpop.f32.mrf.mxu1 }
 0x9eb   : > { %2408 = vrot.lane.b32.xlu1 %v2391_v30, %s4120_s28 }
 0x9ec   : > { %v3808_v14 = vpop.f32.mrf.mxu1 }
 0x9ed   : > { %v2670_v14 = vld [vmem:[%s4265_s21 + $0x78] sm:$0xff] }
 0x9ee   : > { %v2396_v42 = vpop.f32.mrf.mxu1  ;;  %2717 = vmatprep.subr.mxu1 %v2670_v14 }
 0x9ef   : > { %2410 = vrot.lane.b32.xlu0 %v2396_v42, %s4120_s28  ;;  %v2669_v42 = vld [vmem:[%s4265_s21 + $0x70] sm:$0xff] }
 0x9f0   : > { %v3811_v44 = vpop.f32.mrf.mxu1  ;;  %2718 = vmatpush1.msra.mxu1 %v2669_v42 }
 0x9f1   : > { %v2668_v44 = vld [vmem:[%s4265_s21 + $0x68] sm:$0xff] }
 0x9f2   : > { %v2401_v41 = vpop.f32.mrf.mxu1  ;;  %2719 = vmatprep.subr.mxu1 %v2668_v44 }
 0x9f3   : > { %2412 = vrot.lane.b32.xlu1 %v2401_v41, %s4120_s28  ;;  %v2667_v41 = vld [vmem:[%s4265_s21 + $0x60] sm:$0xff] }
 0x9f4   : > { %v3814_v6 = vpop.f32.mrf.mxu1  ;;  %2720 = vmatpush1.msra.mxu1 %v2667_v41 }
 0x9f5   : > { %v2666_v6 = vld [vmem:[%s4265_s21 + $0x58] sm:$0xff] }
 0x9f6   : > { %2721 = vmatprep.subr.mxu1 %v2666_v6 }
 0xa18   : > { %v1924_v15 = vpop.permute.xlu1 %1923 }
 0xa19   : > { %v1932_v39 = vsel %vm1448_vm3, %v4798_v59, %v1924_v15  ;;  %v2665_v15 = vld [vmem:[%s4265_s21 + $0x50] sm:$0xff] }
 0xa1a   : > { %3831 = vmatprep.mubr.msk.f32.mxu0 %vm1006_vm1, %v1932_v39  ;;  %2722 = vmatpush1.msra.mxu1 %v2665_v15  ;;  %v2664_v39 = vld [vmem:[%s4265_s21 + $0x48] sm:$0xff] }
 0xa1b   : > { %2723 = vmatprep.subr.mxu1 %v2664_v39 }
 0xa1c   : > { %v1926_v32 = vpop.permute.xlu1 %1925 }
 0xa1d   : > { %v1933_v45 = vsel %vm1448_vm3, %v4800_v61, %v1926_v32  ;;  %v2663_v32 = vld [vmem:[%s4265_s21 + $0x40] sm:$0xff] }
 0xa1e   : > { %3832 = vmatmul.mubr.msk.f32.vlgmr.msra.gmra.mxu0 %vm1006_vm1, %v1933_v45  ;;  %2724 = vmatpush1.msra.mxu1 %v2663_v32  ;;  %v2662_v45 = vld [vmem:[%s4265_s21 + $0x38] sm:$0xff] }
 0xa1f   : > { %2725 = vmatprep.subr.mxu1 %v2662_v45 }
 0xa4d   : > { %v1928_v47 = vpop.permute.xlu0 %1927 }
 0xa4e   : > { %v1934_v25 = vsel %vm1448_vm3, %v4802_v11, %v1928_v47  ;;  %v4953_v11 = vld [vmem:[%s4240_s1] sm:$0xff]  ;;  %v2661_v47 = vld [vmem:[%s4265_s21 + $0x30] sm:$0xff] }
 0xa4f   : > { %3834 = vmatprep.mubr.msk.f32.mxu0 %vm1006_vm1, %v1934_v25  ;;  %v2550_v55 = vrot.slane %v4953_v11, %v2549_v54  ;;  %2726 = vmatpush1.msra.mxu1 %v2661_v47  ;;  %v2660_v25 = vld [vmem:[%s4265_s21 + $0x28] sm:$0xff] }
 0xa50   : > { %2727 = vmatprep.subr.mxu1 %v2660_v25 }
 0xa5d   : > { %v2409_v33 = vpop.permute.xlu1 %2408 }
 0xa5e   : > { %v2417_v50 = vsel %vm1448_vm3, %v2147_v48, %v2409_v33  ;;  %v2659_v33 = vld [vmem:[%s4265_s21 + $0x20] sm:$0xff] }
 0xa5f   : > { %3835 = vmatmul.mubr.msk.f32.gmra.mxu0 %vm1006_vm1, %v2417_v50  ;;  %2728 = vmatpush1.msra.mxu1 %v2659_v33  ;;  %v2658_v50 = vld [vmem:[%s4265_s21 + $0x18] sm:$0xff] }
 0xa60   : > { %2729 = vmatprep.subr.mxu1 %v2658_v50 }
 0xa61   : > { %v2411_v59 = vpop.permute.xlu0 %2410 }
 0xa62   : > { %v2418_v51 = vsel %vm1448_vm3, %v2152_v35, %v2411_v59  ;;  %v2657_v59 = vld [vmem:[%s4265_s21 + $0x10] sm:$0xff] }
 0xa63   : > { %3837 = vmatprep.mubr.msk.f32.mxu0 %vm1006_vm1, %v2418_v51  ;;  %v2656_v51 = vld [vmem:[%s4265_s21 + $0x8] sm:$0xff]  ;;  %2730 = vmatpush1.msra.mxu1 %v2657_v59 }
 0xa64   : > { %2731 = vmatprep.subr.mxu1 %v2656_v51 }
 0xa65   : > { %v2413_v53 = vpop.permute.xlu1 %2412 }
 0xa66   : > { %v2419_v61 = vsel %vm1448_vm3, %v2157_v23, %v2413_v53  ;;  %v2655_v53 = vld [vmem:[%s4265_s21] sm:$0xff] }
 0xa67   : > { %3838 = vmatmul.mubr.msk.f32.gmra.mxu0 %vm1006_vm1, %v2419_v61  ;;  %2732 = vmatpush1.msra.mxu1 %v2655_v53 }
 0xade   : > { %v3833_v49 = vpop.f32.mrf.mxu0 }
 0xadf   : > { %v2542_v58 = vadd.f32 %v4054_v56, %v3833_v49 }
 0xae0   : > { %v2512_v60 = vpop.f32.mrf.mxu0 }
 0xae1   : > { %v4956_v62 = vadd.f32 %v2550_v55, %v2542_v58  ;;  %v2541_v63 = vadd.f32 %v4055_v46, %v2512_v60 }
 0xae3   : > { %v4958_v0 = vadd.f32 %v2550_v55, %v2541_v63  ;;  %v2560_v1 = vsel %vm1006_vm1, %v4956_v62, 0.0 }
 0xae4   : > { %2561 = vadd.xlane.f32.xlu1 %v2560_v1 }
 0xae5   : > { %v2557_v2 = vsel %vm1006_vm1, %v4958_v0, 0.0 }
 0xae6   : > { %2558 = vadd.xlane.f32.xlu0 %v2557_v2 }
 0xb1f   : > { %v3836_v52 = vpop.f32.mrf.mxu0 }
 0xb20   : > { %v2544_v5 = vadd.f32 %v4056_v4, %v3836_v52 }
 0xb21   : > { %v2522_v3 = vpop.f32.mrf.mxu0 }
 0xb22   : > { %v2543_v9 = vadd.f32 %v4057_v8, %v2522_v3  ;;  %v4966_v12 = vadd.f32 %v2550_v55, %v2544_v5 }
 0xb24   : > { %v4964_v13 = vadd.f32 %v2550_v55, %v2543_v9  ;;  %v2566_v37 = vsel %vm1006_vm1, %v4966_v12, 0.0 }
 0xb26   : > { %v2563_v16 = vsel %vm1006_vm1, %v4964_v13, 0.0 }
 0xb27   : > { %2564 = vadd.xlane.f32.xlu0 %v2563_v16  ;;  %v3839_v20 = vpop.f32.mrf.mxu0 }
 0xb28   : > { %v2546_v26 = vadd.f32 %v4058_v22, %v3839_v20 }
 0xb29   : > { %v2532_v29 = vpop.f32.mrf.mxu0 }
 0xb2a   : > { %v4970_v31 = vadd.f32 %v2550_v55, %v2546_v26  ;;  %v2545_v36 = vadd.f32 %v4059_v34, %v2532_v29 }
 0xb2b   : > { %2567 = vadd.xlane.f32.xlu0 %v2566_v37 }
 0xb2c   : > { %v4974_v17 = vadd.f32 %v2550_v55, %v2545_v36  ;;  %v2572_v19 = vsel %vm1006_vm1, %v4970_v31, 0.0 }
 0xb2d   : > { %2573 = vadd.xlane.f32.xlu1 %v2572_v19 }
 0xb2e   : > { %v2569_v21 = vsel %vm1006_vm1, %v4974_v17, 0.0 }
 0xb2f   : > { %2570 = vadd.xlane.f32.xlu0 %v2569_v21  ;;  %v2637_v21 = vsub.s32 6, %v4539_v18 }
 0xb6d   : > { %v2562_v27 = vpop.xlane.xlu1 %2561 }
 0xb6e   : > { %v2576_v10 = vmul.f32 0.015625, %v2562_v27 }
 0xb6f   : > { %v2559_v40 = vpop.xlane.xlu0 %2558 }
 0xb70   : > { %v4981_v48 = vsub.f32 %v4956_v62, %v2576_v10  ;;  %v2575_v7 = vmul.f32 0.015625, %v2559_v40  ;;  %v2647_v10 = vsub.s32 7, %v4539_v18 }
 0xb72   : > { %v4984_v35 = vsub.f32 %v4958_v0, %v2575_v7  ;;  %v2588_v38 = vmul.f32 %v4981_v48, %v4981_v48  ;;  %v2638_v7 = vrot.slane %v4953_v11, %v2637_v21  ;;  %v2918_v21 = vld [vmem:[%s4275_s9 + $0x40] sm:$0xff] }
 0xb74   : > { %v2596_v23 = vsel %vm1006_vm1, %v2588_v38, 0.0  ;;  %v2587_v43 = vmul.f32 %v4984_v35, %v4984_v35 }
 0xb75   : > { %2597 = vadd.xlane.f32.xlu1 %v2596_v23 }
 0xb76   : > { %v2593_v30 = vsel %vm1006_vm1, %v2587_v43, 0.0 }
 0xb77   : > { %2594 = vadd.xlane.f32.xlu0 %v2593_v30  ;;  %v2648_v30 = vrot.slane %v4953_v11, %v2647_v10  ;;  %v2917_v10 = vld [vmem:[%s4275_s9 + $0x38] sm:$0xff] }
 0xbb0   : > { %v2565_v61 = vpop.xlane.xlu0 %2564 }
 0xbb1   : > { %v2577_v54 = vmul.f32 0.015625, %v2565_v61 }
 0xbb3   : > { %v5009_v55 = vsub.f32 %v4964_v13, %v2577_v54 }
 0xbb4   : > { %v2568_v49 = vpop.xlane.xlu0 %2567 }
 0xbb5   : > { %v2578_v56 = vmul.f32 0.015625, %v2568_v49  ;;  %v2589_v58 = vmul.f32 %v5009_v55, %v5009_v55 }
 0xbb6   : > { %v2574_v60 = vpop.xlane.xlu1 %2573 }
 0xbb7   : > { %v2584_v46 = vsub.f32 %v4966_v12, %v2578_v56  ;;  %v2580_v63 = vmul.f32 0.015625, %v2574_v60  ;;  %v2599_v1 = vsel %vm1006_vm1, %v2589_v58, 0.0 }
 0xbb8   : > { %2600 = vadd.xlane.f32.xlu0 %v2599_v1  ;;  %v2571_v2 = vpop.xlane.xlu0 %2570 }
 0xbb9   : > { %v5016_v52 = vsub.f32 %v4970_v31, %v2580_v63  ;;  %v2579_v3 = vmul.f32 0.015625, %v2571_v2  ;;  %v2590_v4 = vmul.f32 %v2584_v46, %v2584_v46 }
 0xbbb   : > { %v2585_v5 = vsub.f32 %v4974_v17, %v2579_v3  ;;  %v2602_v8 = vsel %vm1006_vm1, %v2590_v4, 0.0  ;;  %v2592_v9 = vmul.f32 %v5016_v52, %v5016_v52  ;;  %v2940_v3 = vld [vmem:[%s4275_s9 + $0xf0] sm:$0xff] }
 0xbbc   : > { %2603 = vadd.xlane.f32.xlu1 %v2602_v8  ;;  %v2924_v4 = vld [vmem:[%s4275_s9 + $0x70] sm:$0xff] }
 0xbbd   : > { %v2591_v16 = vmul.f32 %v2585_v5, %v2585_v5  ;;  %v2608_v20 = vsel %vm1006_vm1, %v2592_v9, 0.0  ;;  %v2923_v9 = vld [vmem:[%s4275_s9 + $0x68] sm:$0xff] }
 0xbbf   : > { %v2605_v22 = vsel %vm1006_vm1, %v2591_v16, 0.0  ;;  %v2938_v16 = vld [vmem:[%s4275_s9 + $0xe0] sm:$0xff] }
 0xbc0   : > { %2609 = vadd.xlane.f32.xlu1 %v2608_v20  ;;  %2606 = vadd.xlane.f32.xlu0 %v2605_v22  ;;  %v2922_v20 = vld [vmem:[%s4275_s9 + $0x60] sm:$0xff] }
 0xbfe   : > { %v2598_v26 = vpop.xlane.xlu1 %2597 }
 0xbff   : > { %v2612_v29 = vmul.f32 0.015625, %v2598_v26  ;;  %v2937_v26 = vld [vmem:[%s4275_s9 + $0xd8] sm:$0xff] }
 0xc00   : > { %v2595_v34 = vpop.xlane.xlu0 %2594 }
 0xc01   : > { %v2618_v36 = vadd.f32 1e-05, %v2612_v29  ;;  %v2611_v37 = vmul.f32 0.015625, %v2595_v34  ;;  %v2921_v29 = vld [vmem:[%s4275_s9 + $0x58] sm:$0xff]  ;;  %v2936_v34 = vld [vmem:[%s4275_s9 + $0xd0] sm:$0xff] }
 0xc03   : > { %4017 = vrsqrt.f32 %v2618_v36  ;;  %v2617_v19 = vadd.f32 1e-05, %v2611_v37  ;;  %v2920_v36 = vld [vmem:[%s4275_s9 + $0x50] sm:$0xff]  ;;  %v2919_v37 = vld [vmem:[%s4275_s9 + $0x48] sm:$0xff] }
 0xc05   : > { %4019 = vrsqrt.f32 %v2617_v19  ;;  %v2934_v19 = vld [vmem:[%s4275_s9 + $0xc0] sm:$0xff] }
 0xc10   : > { %v4018_v27 = vpop.eup %4017 }
 0xc11   : > { %v2630_v23 = vmul.f32 %v4018_v27, %v4981_v48  ;;  %v2933_v27 = vld [vmem:[%s4275_s9 + $0xb8] sm:$0xff] }
 0xc12   : > { %v4020_v40 = vpop.eup %4019 }
 0xc13   : > { %v2629_v38 = vmul.f32 %v4020_v40, %v4984_v35  ;;  %v2640_v42 = vmul.f32 %v2638_v7, %v2630_v23  ;;  %v2932_v40 = vld [vmem:[%s4275_s9 + $0xb0] sm:$0xff]  ;;  %v2915_v23 = vld [vmem:[%s4275_s9 + $0x28] sm:$0xff] }
 0xc15   : > { %v2639_v43 = vmul.f32 %v2638_v7, %v2629_v38  ;;  %v2650_v44 = vadd.f32 %v2648_v30, %v2640_v42  ;;  %v2931_v38 = vld [vmem:[%s4275_s9 + $0xa8] sm:$0xff]  ;;  %v2913_v42 = vld [vmem:[%s4275_s9 + $0x18] sm:$0xff] }
 0xc17   : > { %v2649_v14 = vadd.f32 %v2648_v30, %v2639_v43  ;;  %v2930_v43 = vld [vmem:[%s4275_s9 + $0xa0] sm:$0xff] }
 0xc19   : > { %3435 = vmatmul.mubr.msk.f32.vlgmr.msra.gmra.mxu1 %vm1006_vm1, %v2649_v14  ;;  %v2929_v14 = vld [vmem:[%s4275_s9 + $0x98] sm:$0xff] }
 0xc1a   : > { %2771 = vmatprep.mubr.f32.mxu1 %v4117_v57 }
 0xc1d   : > { %3436 = vmatmul.mubr.msk.f32.gmra.mxu1 %vm1006_vm1, %v2650_v44  ;;  %v2928_v44 = vld [vmem:[%s4275_s9 + $0x90] sm:$0xff] }
 0xc1e   : > { %2777 = vmatprep.mubr.f32.mxu1 %v4117_v57 }
 0xc41   : > { %v2601_v41 = vpop.xlane.xlu0 %2600 }
 0xc42   : > { %v2613_v6 = vmul.f32 0.015625, %v2601_v41  ;;  %v2912_v41 = vld [vmem:[%s4275_s9 + $0x10] sm:$0xff] }
 0xc44   : > { %v2619_v15 = vadd.f32 1e-05, %v2613_v6  ;;  %v2927_v6 = vld [vmem:[%s4275_s9 + $0x88] sm:$0xff] }
 0xc45   : > { %v2604_v35 = vpop.xlane.xlu1 %2603 }
 0xc46   : > { %4021 = vrsqrt.f32 %v2619_v15  ;;  %v2614_v48 = vmul.f32 0.015625, %v2604_v35  ;;  %v2911_v15 = vld [vmem:[%s4275_s9 + $0x8] sm:$0xff]  ;;  %v2926_v35 = vld [vmem:[%s4275_s9 + $0x80] sm:$0xff] }
 0xc48   : > { %v2620_v39 = vadd.f32 1e-05, %v2614_v48  ;;  %v2910_v48 = vld [vmem:[%s4275_s9] sm:$0xff] }
 0xc49   : > { %v2610_v32 = vpop.xlane.xlu1 %2609  ;;  %v2607_v11 = vpop.xlane.xlu0 %2606 }
 0xc4a   : > { %4023 = vrsqrt.f32 %v2620_v39  ;;  %v2616_v45 = vmul.f32 0.015625, %v2610_v32  ;;  %v2615_v47 = vmul.f32 0.015625, %v2607_v11  ;;  %v2671_v39 = vld [vmem:[%s4270_s7] sm:$0x3] }
 0xc4b   : > { %v5078_v32 = vrot.slane %v2671_v39, %v1088_v24  ;;  %v5082_v11 = vrot.slane %v2671_v39, %v1098_v28 }
 0xc4c   : > { %v2622_v25 = vadd.f32 1e-05, %v2616_v45  ;;  %v2621_v33 = vadd.f32 1e-05, %v2615_v47 }
 0xc4e   : > { %4025 = vrsqrt.f32 %v2622_v25 }
 0xc4f   : > { %4027 = vrsqrt.f32 %v2621_v33 }
 0xc53   : > { %v4022_v50 = vpop.eup %4021 }
 0xc54   : > { %v2631_v59 = vmul.f32 %v4022_v50, %v5009_v55  ;;  %v2941_v55 = vld [vmem:[%s4275_s9 + $0xf8] sm:$0xff] }
 0xc55   : > { %3561 = vmatprep.subr.mxu0 %v2941_v55 }
 0xc56   : > { %v2641_v51 = vmul.f32 %v2638_v7, %v2631_v59 }
 0xc57   : > { %v4024_v53 = vpop.eup %4023 }
 0xc58   : > { %v2651_v61 = vadd.f32 %v2648_v30, %v2641_v51  ;;  %v2632_v54 = vmul.f32 %v4024_v53, %v2584_v46  ;;  %v2925_v46 = vld [vmem:[%s4275_s9 + $0x78] sm:$0xff] }
 0xc59   : > { %3562 = vmatpush3.msra.mxu0 %v2925_v46 }
 0xc5a   : > { %3437 = vmatmul.mubr.msk.f32.gmra.mxu1 %vm1006_vm1, %v2651_v61  ;;  %v2642_v49 = vmul.f32 %v2638_v7, %v2632_v54  ;;  %3563 = vmatprep.subr.mxu0 %v2940_v3 }
 0xc5b   : > { %v4026_v56 = vpop.eup %4025  ;;  %2783 = vmatprep.mubr.f32.mxu1 %v4117_v57  ;;  %3564 = vmatpush3.msra.mxu0 %v2924_v4 }
 0xc5c   : > { %v4028_v58 = vpop.eup %4027  ;;  %v2652_v60 = vadd.f32 %v2648_v30, %v2642_v49  ;;  %v2634_v1 = vmul.f32 %v4026_v56, %v5016_v52  ;;  %v2939_v52 = vld [vmem:[%s4275_s9 + $0xe8] sm:$0xff] }
 0xc5d   : > { %v2633_v63 = vmul.f32 %v4028_v58, %v2585_v5  ;;  %3565 = vmatprep.subr.mxu0 %v2939_v52 }
 0xc5e   : > { %3438 = vmatmul.mubr.msk.f32.gmra.mxu1 %vm1006_vm1, %v2652_v60  ;;  %v2644_v5 = vmul.f32 %v2638_v7, %v2634_v1  ;;  %3566 = vmatpush3.msra.mxu0 %v2923_v9 }
 0xc5f   : > { %2789 = vmatprep.mubr.f32.mxu1 %v4117_v57  ;;  %v2643_v2 = vmul.f32 %v2638_v7, %v2633_v63  ;;  %3567 = vmatprep.subr.mxu0 %v2938_v16  ;;  %v2916_v7 = vld [vmem:[%s4275_s9 + $0x30] sm:$0xff] }
 0xc60   : > { %v2654_v22 = vadd.f32 %v2648_v30, %v2644_v5  ;;  %3568 = vmatpush3.msra.mxu0 %v2922_v20 }
 0xc61   : > { %v2653_v8 = vadd.f32 %v2648_v30, %v2643_v2  ;;  %3569 = vmatprep.subr.mxu0 %v2937_v26  ;;  %v2914_v30 = vld [vmem:[%s4275_s9 + $0x20] sm:$0xff] }
 0xc62   : > { %3570 = vmatpush3.msra.mxu0 %v2921_v29 }
 0xc63   : > { %3439 = vmatmul.mubr.msk.f32.gmra.mxu1 %vm1006_vm1, %v2653_v8  ;;  %3571 = vmatprep.subr.mxu0 %v2936_v34 }
 0xc64   : > { %2795 = vmatprep.mubr.f32.mxu1 %v4117_v57  ;;  %3572 = vmatpush3.msra.mxu0 %v2920_v36  ;;  %v2935_v57 = vld [vmem:[%s4275_s9 + $0xc8] sm:$0xff]  ;;  %s5257_s9 = sld [smem:[#allocation16_spill]] (!%p3442_p6) }
 0xc65   : > { %3573 = vmatprep.subr.mxu0 %v2935_v57 }
 0xc66   : > { %3574 = vmatpush3.msra.mxu0 %v2919_v37 }
 0xc67   : > { %3440 = vmatmul.mubr.msk.f32.gmra.mxu1 %vm1006_vm1, %v2654_v22  ;;  %3575 = vmatprep.subr.mxu0 %v2934_v19 }
 0xc68   : > { %3576 = vmatpush3.msra.mxu0 %v2918_v21 }
 0xc69   : > { %3577 = vmatprep.subr.mxu0 %v2933_v27 }
 0xc6a   : > { %3578 = vmatpush3.msra.mxu0 %v2917_v10 }
 0xc6b   : > { %3579 = vmatprep.subr.mxu0 %v2932_v40 }
 0xc6c   : > { %3580 = vmatpush3.msra.mxu0 %v2916_v7 }
 0xc6d   : > { %3581 = vmatprep.subr.mxu0 %v2931_v38 }
 0xc6e   : > { %3582 = vmatpush3.msra.mxu0 %v2915_v23 }
 0xc6f   : > { %3583 = vmatprep.subr.mxu0 %v2930_v43 }
 0xc70   : > { %3584 = vmatpush3.msra.mxu0 %v2914_v30 }
 0xc71   : > { %3585 = vmatprep.subr.mxu0 %v2929_v14 }
 0xc72   : > { %3586 = vmatpush3.msra.mxu0 %v2913_v42 }
 0xc73   : > { %3587 = vmatprep.subr.mxu0 %v2928_v44 }
 0xc74   : > { %3588 = vmatpush3.msra.mxu0 %v2912_v41 }
 0xc75   : > { %3589 = vmatprep.subr.mxu0 %v2927_v6 }
 0xc76   : > { %3590 = vmatpush3.msra.mxu0 %v2911_v15 }
 0xc77   : > { %3591 = vmatprep.subr.mxu0 %v2926_v35 }
 0xc78   : > { %3592 = vmatpush3.msra.mxu0 %v2910_v48 }
 0xcd9   : > { %v2767_v45 = vpop.f32.mrf.mxu1 }
 0xcda   : > { %v2768_v47 = vadd.f32 %v2767_v45, %v5078_v32 }
 0xcdb   : > { %v2769_v25 = vpop.f32.mrf.mxu1 }
 0xcdc   : > { %v2802_v33 = vmul.f32 %v2768_v47, %v2768_v47  ;;  %v2770_v50 = vadd.f32 %v2769_v25, %v5082_v11 }
 0xcdd   : > { %v2773_v59 = vpop.f32.mrf.mxu1 }
 0xcde   : > { %v2814_v51 = vmul.f32 %v2802_v33, %v2768_v47  ;;  %v2803_v53 = vmul.f32 %v2770_v50, %v2770_v50  ;;  %v2774_v61 = vadd.f32 %v2773_v59, %v5078_v32 }
 0xcdf   : > { %v2775_v54 = vpop.f32.mrf.mxu1 }
 0xce0   : > { %v2826_v49 = vmul.f32 0.044715, %v2814_v51  ;;  %v2815_v24 = vmul.f32 %v2803_v53, %v2770_v50  ;;  %v2804_v56 = vmul.f32 %v2774_v61, %v2774_v61  ;;  %v2776_v18 = vadd.f32 %v2775_v54, %v5082_v11 }
 0xce2   : > { %v2838_v28 = vadd.f32 %v2826_v49, %v2768_v47  ;;  %v2827_v58 = vmul.f32 0.044715, %v2815_v24  ;;  %v2816_v60 = vmul.f32 %v2804_v56, %v2774_v61  ;;  %v2805_v63 = vmul.f32 %v2776_v18, %v2776_v18 }
 0xce4   : > { %v2850_v1 = vmul.f32 0.7978846, %v2838_v28  ;;  %v2839_v55 = vadd.f32 %v2827_v58, %v2770_v50  ;;  %v2828_v46 = vmul.f32 0.044715, %v2816_v60  ;;  %v2817_v2 = vmul.f32 %v2805_v63, %v2776_v18 }
 0xce6   : > { %4029 = vtanh.f32 %v2850_v1  ;;  %v2851_v3 = vmul.f32 0.7978846, %v2839_v55  ;;  %v2840_v4 = vadd.f32 %v2828_v46, %v2774_v61  ;;  %v2829_v8 = vmul.f32 0.044715, %v2817_v2 }
 0xce8   : > { %4031 = vtanh.f32 %v2851_v3  ;;  %v2852_v5 = vmul.f32 0.7978846, %v2840_v4  ;;  %v2841_v52 = vadd.f32 %v2829_v8, %v2776_v18 }
 0xcea   : > { %4033 = vtanh.f32 %v2852_v5  ;;  %v2853_v9 = vmul.f32 0.7978846, %v2841_v52 }
 0xcec   : > { %4035 = vtanh.f32 %v2853_v9 }
 0xcf3   : > { %v4030_v16 = vpop.eup %4029 }
 0xcf4   : > { %v2874_v20 = vadd.f32 1.0, %v4030_v16 }
 0xcf5   : > { %v4032_v22 = vpop.eup %4031 }
 0xcf6   : > { %v2875_v26 = vadd.f32 1.0, %v4032_v22  ;;  %v2886_v34 = vmul.f32 0.5, %v2874_v20 }
 0xcf7   : > { %v4034_v29 = vpop.eup %4033 }
 0xcf8   : > { %v2887_v36 = vmul.f32 0.5, %v2875_v26  ;;  %v2876_v57 = vadd.f32 1.0, %v4034_v29  ;;  %v2898_v27 = vmul.f32 %v2886_v34, %v2768_v47 }
 0xcf9   : > { %v4036_v37 = vpop.eup %4035 }
 0xcfa   : > { %v2899_v19 = vmul.f32 %v2887_v36, %v2770_v50  ;;  %v2877_v21 = vadd.f32 1.0, %v4036_v37  ;;  %v2888_v10 = vmul.f32 0.5, %v2876_v57 }
 0xcfc   : > { %3006 = vmatprep.mubr.f32.mxu0 %v2899_v19  ;;  %v2889_v40 = vmul.f32 0.5, %v2877_v21  ;;  %v2900_v38 = vmul.f32 %v2888_v10, %v2774_v61 }
 0xcfd   : > { %3007 = vmatmul.mubr.f32.vlgmr.msra.gmra.mxu0 %v2898_v27 }
 0xcfe   : > { %v2901_v7 = vmul.f32 %v2889_v40, %v2776_v18 }
 0xd00   : > { %3011 = vmatprep.mubr.f32.mxu0 %v2901_v7 }
 0xd01   : > { %3012 = vmatmul.mubr.f32.gmra.mxu0 %v2900_v38 }
 0xd1a   : > { %v2779_v23 = vpop.f32.mrf.mxu1 }
 0xd1b   : > { %v5089_v43 = vadd.f32 %v2779_v23, %v5078_v32 }
 0xd1c   : > { %v2781_v30 = vpop.f32.mrf.mxu1 }
 0xd1d   : > { %v2806_v14 = vmul.f32 %v5089_v43, %v5089_v43  ;;  %v5094_v42 = vadd.f32 %v2781_v30, %v5082_v11 }
 0xd1e   : > { %v2785_v44 = vpop.f32.mrf.mxu1 }
 0xd1f   : > { %v2818_v41 = vmul.f32 %v2806_v14, %v5089_v43  ;;  %v2807_v6 = vmul.f32 %v5094_v42, %v5094_v42  ;;  %v5100_v15 = vadd.f32 %v2785_v44, %v5078_v32 }
 0xd20   : > { %v2787_v35 = vpop.f32.mrf.mxu1 }
 0xd21   : > { %v2830_v48 = vmul.f32 0.044715, %v2818_v41  ;;  %v2819_v39 = vmul.f32 %v2807_v6, %v5094_v42  ;;  %v2808_v45 = vmul.f32 %v5100_v15, %v5100_v15  ;;  %v5106_v47 = vadd.f32 %v2787_v35, %v5082_v11 }
 0xd23   : > { %v2842_v25 = vadd.f32 %v2830_v48, %v5089_v43  ;;  %v2831_v33 = vmul.f32 0.044715, %v2819_v39  ;;  %v2820_v50 = vmul.f32 %v2808_v45, %v5100_v15  ;;  %v2809_v59 = vmul.f32 %v5106_v47, %v5106_v47  ;;  %v2791_v51 = vpop.f32.mrf.mxu1 }
 0xd24   : > { %v5113_v53 = vadd.f32 %v2791_v51, %v5078_v32 }
 0xd25   : > { %v2854_v61 = vmul.f32 0.7978846, %v2842_v25  ;;  %v2843_v54 = vadd.f32 %v2831_v33, %v5094_v42  ;;  %v2832_v49 = vmul.f32 0.044715, %v2820_v50  ;;  %v2821_v24 = vmul.f32 %v2809_v59, %v5106_v47  ;;  %v2793_v56 = vpop.f32.mrf.mxu1 }
 0xd26   : > { %v2810_v18 = vmul.f32 %v5113_v53, %v5113_v53  ;;  %v5120_v28 = vadd.f32 %v2793_v56, %v5082_v11 }
 0xd27   : > { %4037 = vtanh.f32 %v2854_v61  ;;  %v2855_v58 = vmul.f32 0.7978846, %v2843_v54  ;;  %v2844_v60 = vadd.f32 %v2832_v49, %v5100_v15  ;;  %v2833_v63 = vmul.f32 0.044715, %v2821_v24  ;;  %v2797_v1 = vpop.f32.mrf.mxu1 }
 0xd28   : > { %v2822_v55 = vmul.f32 %v2810_v18, %v5113_v53  ;;  %v2811_v46 = vmul.f32 %v5120_v28, %v5120_v28  ;;  %v5127_v2 = vadd.f32 %v2797_v1, %v5078_v32 }
 0xd29   : > { %4039 = vtanh.f32 %v2855_v58  ;;  %v2856_v3 = vmul.f32 0.7978846, %v2844_v60  ;;  %v2845_v4 = vadd.f32 %v2833_v63, %v5106_v47  ;;  %v2799_v8 = vpop.f32.mrf.mxu1 }
 0xd2a   : > { %v2834_v5 = vmul.f32 0.044715, %v2822_v55  ;;  %v2823_v52 = vmul.f32 %v2811_v46, %v5120_v28  ;;  %v2812_v9 = vmul.f32 %v5127_v2, %v5127_v2  ;;  %v2800_v16 = vadd.f32 %v2799_v8, %v5082_v11  ;;  %v3441_v8 = vld [vmem:[%s4240_s1 + $0x8] ss:$0 sm:$0xff] }
 0xd2b   : > { %4041 = vtanh.f32 %v2856_v3  ;;  %v2857_v20 = vmul.f32 0.7978846, %v2845_v4 }
 0xd2c   : > { %v2846_v22 = vadd.f32 %v2834_v5, %v5113_v53  ;;  %v2835_v26 = vmul.f32 0.044715, %v2823_v52  ;;  %v2824_v32 = vmul.f32 %v2812_v9, %v5127_v2  ;;  %v2813_v29 = vmul.f32 %v2800_v16, %v2800_v16 }
 0xd2d   : > { %4043 = vtanh.f32 %v2857_v20 }
 0xd2e   : > { %v2858_v34 = vmul.f32 0.7978846, %v2846_v22  ;;  %v2847_v36 = vadd.f32 %v2835_v26, %v5120_v28  ;;  %v2836_v57 = vmul.f32 0.044715, %v2824_v32  ;;  %v2825_v37 = vmul.f32 %v2813_v29, %v2800_v16 }
 0xd30   : > { %4045 = vtanh.f32 %v2858_v34  ;;  %v2859_v19 = vmul.f32 0.7978846, %v2847_v36  ;;  %v2848_v21 = vadd.f32 %v2836_v57, %v5127_v2  ;;  %v2837_v27 = vmul.f32 0.044715, %v2825_v37 }
 0xd32   : > { %4047 = vtanh.f32 %v2859_v19  ;;  %v2860_v11 = vmul.f32 0.7978846, %v2848_v21  ;;  %v2849_v10 = vadd.f32 %v2837_v27, %v2800_v16 }
 0xd34   : > { %v4038_v40 = vpop.eup %4037  ;;  %4049 = vtanh.f32 %v2860_v11  ;;  %v2861_v7 = vmul.f32 0.7978846, %v2849_v10 }
 0xd35   : > { %v2878_v38 = vadd.f32 1.0, %v4038_v40 }
 0xd36   : > { %v4040_v23 = vpop.eup %4039  ;;  %4051 = vtanh.f32 %v2861_v7 }
 0xd37   : > { %v2879_v30 = vadd.f32 1.0, %v4040_v23  ;;  %v2890_v44 = vmul.f32 0.5, %v2878_v38 }
 0xd38   : > { %v4042_v14 = vpop.eup %4041 }
 0xd39   : > { %v2891_v41 = vmul.f32 0.5, %v2879_v30  ;;  %v2880_v6 = vadd.f32 1.0, %v4042_v14  ;;  %v2902_v45 = vmul.f32 %v2890_v44, %v5089_v43 }
 0xd3a   : > { %v4044_v35 = vpop.eup %4043 }
 0xd3b   : > { %v2903_v48 = vmul.f32 %v2891_v41, %v5094_v42  ;;  %v2881_v39 = vadd.f32 1.0, %v4044_v35  ;;  %v2892_v25 = vmul.f32 0.5, %v2880_v6 }
 0xd3d   : > { %v4046_v33 = vpop.eup %4045  ;;  %3016 = vmatprep.mubr.f32.mxu0 %v2903_v48  ;;  %v2893_v50 = vmul.f32 0.5, %v2881_v39  ;;  %v2904_v54 = vmul.f32 %v2892_v25, %v5100_v15 }
 0xd3e   : > { %3017 = vmatmul.mubr.f32.gmra.mxu0 %v2902_v45  ;;  %v2882_v59 = vadd.f32 1.0, %v4046_v33 }
 0xd3f   : > { %v4048_v51 = vpop.eup %4047  ;;  %v2905_v61 = vmul.f32 %v2893_v50, %v5106_v47 }
 0xd40   : > { %v2883_v49 = vadd.f32 1.0, %v4048_v51  ;;  %v2894_v56 = vmul.f32 0.5, %v2882_v59 }
 0xd41   : > { %v4050_v24 = vpop.eup %4049  ;;  %3021 = vmatprep.mubr.f32.mxu0 %v2905_v61 }
 0xd42   : > { %3022 = vmatmul.mubr.f32.gmra.mxu0 %v2904_v54  ;;  %v2895_v42 = vmul.f32 0.5, %v2883_v49  ;;  %v2884_v18 = vadd.f32 1.0, %v4050_v24  ;;  %v2906_v63 = vmul.f32 %v2894_v56, %v5113_v53 }
 0xd43   : > { %v4052_v43 = vpop.eup %4051 }
 0xd44   : > { %v2907_v58 = vmul.f32 %v2895_v42, %v5120_v28  ;;  %v2885_v60 = vadd.f32 1.0, %v4052_v43  ;;  %v2896_v1 = vmul.f32 0.5, %v2884_v18 }
 0xd46   : > { %3026 = vmatprep.mubr.f32.mxu0 %v2907_v58  ;;  %v2897_v55 = vmul.f32 0.5, %v2885_v60  ;;  %v2908_v15 = vmul.f32 %v2896_v1, %v5127_v2 }
 0xd47   : > { %3027 = vmatmul.mubr.f32.gmra.mxu0 %v2906_v63 }
 0xd48   : > { %v2909_v47 = vmul.f32 %v2897_v55, %v2800_v16 }
 0xd4a   : > { %3031 = vmatprep.mubr.f32.mxu0 %v2909_v47 }
 0xd4b   : > { %3032 = vmatmul.mubr.f32.gmra.mxu0 %v2908_v15 }
 0xdbd   : > { %v3593_v46 = vpop.f32.mrf.mxu0 }
 0xdbf   : > { %v3594_v3 = vpop.f32.mrf.mxu0 }
 0xdc0   : > { %v3595_v4 = vadd.f32 %v3594_v3, %v3593_v46 }
 0xdc1   : > { %v3596_v5 = vpop.f32.mrf.mxu0 }
 0xdc2   : > { %v3037_v52 = vadd.f32 %v3595_v4, %v4958_v0 }
 0xdc3   : > { %v3597_v28 = vpop.f32.mrf.mxu0 }
 0xdc4   : > { %v3047_v9 = vadd.f32 %v3441_v8, %v3037_v52  ;;  %v3598_v20 = vadd.f32 %v3597_v28, %v3596_v5 }
 0xdc6   : > { %3053 = vst.msk [vmem:[#allocation2] sm:$0xff] %vm1006_vm1, %v3047_v9  ;;  %v3038_v53 = vadd.f32 %v3598_v20, %v4956_v62 }
 0xdc8   : > { %v3048_v22 = vadd.f32 %v3441_v8, %v3038_v53 }
 0xdca   : > { %3054 = vst.msk [vmem:[#allocation2 + $0x8] sm:$0xff] %vm1006_vm1, %v3048_v22 }
 0xdfe   : > { %v3599_v2 = vpop.f32.mrf.mxu0 }
 0xe00   : > { %v3600_v16 = vpop.f32.mrf.mxu0 }
 0xe01   : > { %v3601_v26 = vadd.f32 %v3600_v16, %v3599_v2 }
 0xe02   : > { %v3602_v32 = vpop.f32.mrf.mxu0 }
 0xe03   : > { %v3039_v29 = vadd.f32 %v3601_v26, %v4964_v13 }
 0xe04   : > { %v3603_v34 = vpop.f32.mrf.mxu0 }
 0xe05   : > { %v3049_v36 = vadd.f32 %v3441_v8, %v3039_v29  ;;  %v3604_v57 = vadd.f32 %v3603_v34, %v3602_v32 }
 0xe07   : > { %3055 = vst.msk [vmem:[#allocation2 + $0x10] sm:$0xff] %vm1006_vm1, %v3049_v36  ;;  %v3040_v0 = vadd.f32 %v3604_v57, %v4966_v12  ;;  %v3605_v37 = vpop.f32.mrf.mxu0 }
 0xe09   : > { %v3050_v19 = vadd.f32 %v3441_v8, %v3040_v0  ;;  %v3606_v21 = vpop.f32.mrf.mxu0 }
 0xe0a   : > { %v3607_v62 = vadd.f32 %v3606_v21, %v3605_v37 }
 0xe0b   : > { %3056 = vst.msk [vmem:[#allocation2 + $0x18] sm:$0xff] %vm1006_vm1, %v3050_v19  ;;  %v3608_v27 = vpop.f32.mrf.mxu0 }
 0xe0c   : > { %v3041_v11 = vadd.f32 %v3607_v62, %v4974_v17 }
 0xe0d   : > { %v3609_v10 = vpop.f32.mrf.mxu0 }
 0xe0e   : > { %v3051_v40 = vadd.f32 %v3441_v8, %v3041_v11  ;;  %v3610_v7 = vadd.f32 %v3609_v10, %v3608_v27 }
 0xe10   : > { %3057 = vst.msk [vmem:[#allocation2 + $0x20] sm:$0xff] %vm1006_vm1, %v3051_v40  ;;  %v3042_v13 = vadd.f32 %v3610_v7, %v4970_v31  ;;  %3062 = sbr.rel (%p3442_p6) target bundleno = 4267 (0x10ab), region = 96 }
 0xe12   : > { %v3052_v38 = vadd.f32 %v3441_v8, %v3042_v13 }
 0xe14   : > { %3058 = vst.msk [vmem:[#allocation2 + $0x28] sm:$0xff] %vm1006_vm1, %v3052_v38 }
 0xe15   : > { %v3064_v12 = vrot.slane %v3050_v19, 7  ;;  %vm3066_vm6 = vcmask 1040384   ;;  %vm3070_vm7 = vcmask 517120   ;;  %v3105_v31 = vld [vmem:[%s5232_s16 + $0x38] sm:$0xff]  ;;  %v4121_v35 = vmov 0.0   ;;  %v3104_v48 = vld [vmem:[%s5232_s16 + $0x30] sm:$0xff] }
 0xe16   : > { %3840 = vmatprep.subr.mxu0 %v4121_v35  ;;  %vm4122_vm8 = vmmov 0   ;;  %v3103_v39 = vld [vmem:[%s5232_s16 + $0x28] sm:$0xff]  ;;  %v3102_v45 = vld [vmem:[%s5232_s16 + $0x20] sm:$0xff]  ;;  %v3101_v25 = vld [vmem:[%s5232_s16 + $0x18] sm:$0xff]  ;;  %vm3180_vm9 = vcmask 254976  }
 0xe17   : > { %v3067_v23 = vsel %vm3066_vm6, %v3047_v9, %v3064_v12  ;;  %3856 = vmatprep.mubr.msk.f32.mxu0 %vm4122_vm8, %v4121_v35  ;;  %3841 = vmatpush3.msra.mxu0 %v3105_v31  ;;  %v3100_v33 = vld [vmem:[%s5232_s16 + $0x10] sm:$0xff]  ;;  %v3099_v50 = vld [vmem:[%s5232_s16 + $0x8] sm:$0xff]  ;;  %v3098_v59 = vld [vmem:[%s5232_s16] sm:$0xff] }
 0xe18   : > { %v3071_v30 = vsel %vm3070_vm7, %v3067_v23, 0.0  ;;  %3842 = vmatprep.subr.mxu0 %v4121_v35  ;;  %v3443_v24 = vld [vmem:[%s5256_s26] ss:$0 sm:$0xff] }
 0xe19   : > { %3072 = vadd.xlane.f32.xlu0 %v3071_v30  ;;  %3843 = vmatpush3.msra.mxu0 %v3104_v48  ;;  %v3444_v42 = vld [vmem:[%s5257_s9] ss:$0 sm:$0xff] }
 0xe1a   : > { %3844 = vmatprep.subr.mxu0 %v4121_v35 }
 0xe1b   : > { %3845 = vmatpush3.msra.mxu0 %v3103_v39 }
 0xe1c   : > { %3846 = vmatprep.subr.mxu0 %v4121_v35 }
 0xe1d   : > { %3847 = vmatpush3.msra.mxu0 %v3102_v45 }
 0xe1e   : > { %3848 = vmatprep.subr.mxu0 %v4121_v35 }
 0xe1f   : > { %3849 = vmatpush3.msra.mxu0 %v3101_v25 }
 0xe20   : > { %3850 = vmatprep.subr.mxu0 %v4121_v35 }
 0xe21   : > { %3851 = vmatpush3.msra.mxu0 %v3100_v33 }
 0xe22   : > { %3852 = vmatprep.subr.mxu0 %v4121_v35 }
 0xe23   : > { %3853 = vmatpush3.msra.mxu0 %v3099_v50 }
 0xe24   : > { %3854 = vmatprep.subr.mxu0 %v4121_v35 }
 0xe25   : > { %3855 = vmatpush3.msra.mxu0 %v3098_v59 }
 0xea2   : > { %v3073_v17 = vpop.xlane.xlu0 %3072 }
 0xea3   : > { %v3074_v14 = vmul.f32 0.015625, %v3073_v17 }
 0xea5   : > { %v3075_v44 = vsub.f32 %v3067_v23, %v3074_v14 }
 0xea7   : > { %v3076_v41 = vmul.f32 %v3075_v44, %v3075_v44 }
 0xea9   : > { %v3077_v6 = vsel %vm3070_vm7, %v3076_v41, 0.0 }
 0xeaa   : > { %3078 = vadd.xlane.f32.xlu0 %v3077_v6 }
 0xf33   : > { %v3079_v51 = vpop.xlane.xlu0 %3078 }
 0xf34   : > { %v3080_v61 = vmul.f32 0.015625, %v3079_v51 }
 0xf36   : > { %v3081_v54 = vadd.f32 1e-05, %v3080_v61 }
 0xf38   : > { %4060 = vrsqrt.f32 %v3081_v54 }
 0xf45   : > { %v4061_v49 = vpop.eup %4060 }
 0xf46   : > { %v3083_v56 = vmul.f32 %v4061_v49, %v3075_v44 }
 0xf48   : > { %v3090_v18 = vmul.f32 %v3443_v24, %v3083_v56 }
 0xf4a   : > { %v3097_v43 = vadd.f32 %v3444_v42, %v3090_v18 }
 0xf4c   : > { %3857 = vmatmul.mubr.msk.f32.vlgmr.msra.gmra.mxu0 %vm1006_vm1, %v3097_v43 }
0x100c   : > { %v3175_v58 = vpop.f32.mrf.mxu0 }
0x100d   : > { %v3179_v60 = vmul.f32 %v3175_v58, %v3175_v58 }
0x100e   : > { %v3858_v63 = vpop.f32.mrf.mxu0 }
0x100f   : > { %v3181_v1 = vsel %vm3180_vm9, %v3179_v60, 0.0 }
0x1010   : > { %3182 = vadd.xlane.f32.xlu1 %v3181_v1 }
0x1099   : > { %v3183_v55 = vpop.xlane.xlu1 %3182 }
0x109a   : > { %4062 = vrsqrt.f32 %v3183_v55 }
0x10a7   : > { %v4063_v47 = vpop.eup %4062 }
0x10a8   : > { %v3185_v15 = vmul.f32 %v4063_v47, %v3175_v58 }
0x10aa   : > { %3186 = vst.msk [vmem:[#allocation3] sm:$0x3] %vm3180_vm9, %v3185_v15 }
0x10ab PF: > { %s5258_s24 = sld [smem:[#allocation7_spill]]  ;;  %s4123_s0 = smov [#allocation3]  }
0x10ac   : > { %s3196_s21 = sshll.u32 %s4123_s0, 4  ;;  %s3197_s21 = int_to_ptr.vmem [resolvable:$true] %s3196_s21 }
0x10ad   : > { %s4064_s17 = scalar_lea.vmem %s3197_s21, 32  ;;  %p4071_p11 = scmp.lt.s32.totalorder %s3197_s21, %s3197_s21 }
0x10ae   : > { %p4065_p8 = scmp.ne.s32.totalorder %s3197_s21, %s4064_s17  ;;  %p4072_p12 = scmp.lt.s32.totalorder %s4064_s17, %s4064_s17 }
0x10b0   : > { %p4073_p13 = por %p4072_p12, %p4071_p11 }
0x10b1   : > { %s5259_s1 = sadd.s32 4294967295, %s5258_s24  }
0x10b2   : > { %p5192_p7 = scmp.eq.s32.totalorder %s5259_s1, 1 }
0x10b4   : > { %p4066_p9 = pnand %p4065_p8, %p5192_p7 }
0x10b6   : > { %p4067_p10 = pneg %p4066_p9 }
0x10b8   : > { %p4074_p0 = pnand %p4073_p13, %p4067_p10 }
0x10ba   : > { %4077 = shalt.err (!%p4074_p0)
}
0x10bb   : > { %s5261_s15 = sld [smem:[#allocation17_spill]] }
0x10c1   : > { %3908 = dma.vmem_to_hbm [thread:$0]  (%p5192_p7), %s3197_s21, 32, %s5261_s15, [#allocation4]  }
0x10c2   : > { %4101 = dma.done.wait (%p5192_p7), [#allocation4], 32  }
0x10c3   : > { %4103 = vsyncadd (%p5192_p7), [#allocation4], 4294967264 }
0x10c4 PF: > { %s5262_s18 = sld [smem:[#allocation7_spill]] }
0x10c5   : > { %s5263_s24 = sld [smem:[#allocation6_spill]] }
0x10c6   : > { %s5264_s25 = sld [smem:[#allocation8_spill]] }
0x10ca   : > { %s28_s26 = sadd.s32 1, %s5262_s18  }
0x10cb   : > { %p25_p1 = scmp.ge.s32.totalorder %s28_s26, 4  }
0x10cd   :  { %27 = sbr.rel (!%p25_p1) target bundleno = 12 (0xc), region = 148 }
0x10d2   :  { %3209 = vsyncpa [#allocation4], 1 }
0x10d3   :  { %3211 = vsyncpa [#allocation4 + $0x1], 1 }

</bundles_post_ra>
